<compile_context>
chip_gen: v7x
topology: tpu7x:2x2x1
jax: 0.10.0
libtpu: 0.0.40
codegen_flags: <defaults>
</compile_context>

<pallas_src>
import jax
import jax.numpy as jnp
from jax import lax
from jax.experimental import pallas as pl
from jax.experimental.pallas import tpu as pltpu

IMG_SIZE = 736
VECTOR_DIM = (128 // 4) * 2        # = 64  (module's self.vector_dim)
EMB_LEN = 2 * VECTOR_DIM           # = 128 (sin+cos concat -> conv "H" extent)
C_IN, C_MID, C_OUT = 4, 64, 128
BN_EPS = 1e-5

# Packed parameter tensor layout (single [P_ROWS, 128] f32 array):
#   row  0            : 1 / dim_mat, duplicated to length 128
#   row  1            : phase (0 for the sin half, pi/2 for the cos half)
#   row  2            : sh2 (folded conv2 bias + BN2 shift), per output channel
#   rows 3:8          : padding (keeps following slabs 8-row aligned)
#   rows 8:72         : w2 * bn2_scale, [64, 128]
#   rows 72:136       : sh1 slab: sh1[o] replicated across 128 lanes
#   rows 136:392      : w1 slabs: for c in 0..3, w1f[c, o] replicated across lanes
ROW_INV_DM = 0
ROW_PHASE = 1
ROW_SH2 = 2
ROW_W2 = 8
ROW_SH1 = ROW_W2 + C_MID           # 72
ROW_W1 = ROW_SH1 + C_MID           # 136
P_ROWS = ROW_W1 + C_IN * C_MID     # 392


def _round_up(x, m):
    return ((x + m - 1) // m) * m


def _make_kernel(height, width):
    """Kernel closure with the coordinate scaling constants baked in."""
    sx = 100.0 / float(width)      # scales cy and box-height (faithful to reference)
    sy = 100.0 / float(height)     # scales cx and box-width

    def kernel(boxes_ref, p_ref, o_ref, h1_ref):
        tk = boxes_ref.shape[0]

        b = boxes_ref[...]                                   # [TK, 8] f32
        x1 = b[:, 0:1]
        y1 = b[:, 1:2]
        x2 = b[:, 2:3]
        y2 = b[:, 3:4]
        # pos = (cy/width, cx/height, h/width, w/height) * 100  -- as in the module
        p0 = (y1 + y2) * (0.5 * sx)
        p1 = (x1 + x2) * (0.5 * sy)
        p2 = (y2 - y1) * sx
        p3 = (x2 - x1) * sy

        inv_dm = p_ref[ROW_INV_DM, :]                        # [128] = 1/dim_mat (dup)
        phase = p_ref[ROW_PHASE, :]                          # [128] = 0 | pi/2

        # Lane-dense sin/cos embedding: one [TK, 128] slab per input channel.
        def emb(pc):
            return jnp.sin(pc * inv_dm[None, :] + phase[None, :])   # [TK, 128]

        e0, e1, e2, e3 = emb(p0), emb(p1), emb(p2), emb(p3)

        # conv1x1 (4 -> 64) + BN1 (folded) + ReLU on the VPU as 4 rank-1 FMAs
        # against pre-broadcast [64, 128] weight slabs (no MXU, no transposes).
        w1_0 = p_ref[ROW_W1 + 0 * C_MID:ROW_W1 + 1 * C_MID, :]       # [64, 128]
        w1_1 = p_ref[ROW_W1 + 1 * C_MID:ROW_W1 + 2 * C_MID, :]
        w1_2 = p_ref[ROW_W1 + 2 * C_MID:ROW_W1 + 3 * C_MID, :]
        w1_3 = p_ref[ROW_W1 + 3 * C_MID:ROW_W1 + 4 * C_MID, :]
        sh1 = p_ref[ROW_SH1:ROW_SH1 + C_MID, :]                      # [64, 128]
        h1 = (e0[:, None, :] * w1_0[None, :, :]
              + e1[:, None, :] * w1_1[None, :, :]
              + e2[:, None, :] * w1_2[None, :, :]
              + e3[:, None, :] * w1_3[None, :, :]
              + sh1[None, :, :])                                     # [TK, 64, 128]
        h1_ref[...] = jnp.maximum(h1, 0.0).astype(jnp.bfloat16)

        # conv1x1 (64 -> 128) + BN2 (folded) + ReLU + AdaptiveMaxPool, fused per box.
        w2 = p_ref[ROW_W2:ROW_W2 + C_MID, :].astype(jnp.bfloat16)    # [64, 128] (o, m)
        sh2 = p_ref[ROW_SH2, :]                                      # [128]

        def box_body(k, carry):
            h1k = h1_ref[k]                                          # [64, 128] bf16
            # contract the 64 mid channels (lhs dim 0 with rhs dim 0) -> [pos, out]
            h2 = lax.dot_general(h1k, w2, (((0,), (0,)), ((), ())),
                                 preferred_element_type=jnp.float32)  # [128, 128]
            pooled = jnp.max(h2, axis=0)                             # max over positions
            # bias + ReLU commute with the max (monotone), so apply them after the pool
            o_ref[k, :] = jnp.maximum(pooled + sh2, 0.0)             # lane-dense row
            return carry

        lax.fori_loop(0, tk, box_body, 0)

    return kernel


def init_params(key):
    ks = jax.random.split(key, 12)
    p = {}
    p["w1"] = jax.random.normal(ks[0], (C_IN, C_MID), jnp.float32) / jnp.sqrt(C_IN)
    p["b1"] = 0.1 * jax.random.normal(ks[1], (C_MID,), jnp.float32)
    p["g1"] = 1.0 + 0.1 * jax.random.normal(ks[2], (C_MID,), jnp.float32)
    p["beta1"] = 0.1 * jax.random.normal(ks[3], (C_MID,), jnp.float32)
    p["m1"] = 0.05 * jax.random.normal(ks[4], (C_MID,), jnp.float32)
    p["v1"] = jax.random.uniform(ks[5], (C_MID,), jnp.float32, minval=0.5, maxval=1.5)
    p["w2"] = jax.random.normal(ks[6], (C_MID, C_OUT), jnp.float32) / jnp.sqrt(C_MID)
    p["b2"] = 0.1 * jax.random.normal(ks[7], (C_OUT,), jnp.float32)
    p["g2"] = 1.0 + 0.1 * jax.random.normal(ks[8], (C_OUT,), jnp.float32)
    p["beta2"] = 0.1 * jax.random.normal(ks[9], (C_OUT,), jnp.float32)
    p["m2"] = 0.05 * jax.random.normal(ks[10], (C_OUT,), jnp.float32)
    p["v2"] = jax.random.uniform(ks[11], (C_OUT,), jnp.float32, minval=0.5, maxval=1.5)
    return p


def pack_params(params):
    """One-time folding of conv bias + eval-mode BN into the weights, packed into a
    single [P_ROWS, 128] tensor (hoisted out of the per-call path).  The conv1
    weights / shift are pre-broadcast to [64, 128] slabs so the kernel's VPU FMAs
    need no lane<->sublane broadcasts."""
    sc1 = params["g1"] / jnp.sqrt(params["v1"] + BN_EPS)
    sh1 = (params["b1"] - params["m1"]) * sc1 + params["beta1"]
    sc2 = params["g2"] / jnp.sqrt(params["v2"] + BN_EPS)
    sh2 = (params["b2"] - params["m2"]) * sc2 + params["beta2"]
    w1f = params["w1"] * sc1[None, :]                       # [4, 64]
    w2f = params["w2"] * sc2[None, :]                       # [64, 128]

    dm = 1000.0 ** (jnp.arange(VECTOR_DIM, dtype=jnp.float32) / VECTOR_DIM)
    inv_dm = 1.0 / dm
    inv_dm_dup = jnp.concatenate([inv_dm, inv_dm])          # [128]
    phase = jnp.concatenate([jnp.zeros((VECTOR_DIM,), jnp.float32),
                             jnp.full((VECTOR_DIM,), jnp.pi / 2, jnp.float32)])

    pk = jnp.zeros((P_ROWS, C_OUT), jnp.float32)
    pk = pk.at[ROW_INV_DM].set(inv_dm_dup)
    pk = pk.at[ROW_PHASE].set(phase)
    pk = pk.at[ROW_SH2].set(sh2)
    pk = pk.at[ROW_W2:ROW_W2 + C_MID].set(w2f)
    pk = pk.at[ROW_SH1:ROW_SH1 + C_MID].set(jnp.tile(sh1[:, None], (1, C_OUT)))
    for c in range(C_IN):
        pk = pk.at[ROW_W1 + c * C_MID:ROW_W1 + (c + 1) * C_MID].set(
            jnp.tile(w1f[c][:, None], (1, C_OUT)))
    return pk


def position_encoder_forward(boxes, packed_params, height=IMG_SIZE, width=IMG_SIZE,
                             block_k=64):
    """boxes [K,6] -> [K, 128, 1, 1], matching the PyTorch module (eval-mode BN)."""
    K = boxes.shape[0]
    k8 = _round_up(max(K, 1), 8)
    tk = min(block_k, k8)
    # Keep >= 2 grid steps when there is enough work so the "parallel" box axis can
    # shard across both v7x TensorCores (costs one extra ~0.35us step on v5e/v6e).
    if k8 > 8:
        tk = min(tk, _round_up(pl.cdiv(k8, 2), 8))
    k_pad = _round_up(k8, tk)

    b8 = jnp.zeros((k_pad, 8), jnp.float32)
    b8 = b8.at[:K, :6].set(boxes.astype(jnp.float32))

    # Computed VMEM budget: ~1 MiB of params/IO double-buffers + ~50 KiB/box of
    # intermediates, with generous headroom; stays far below v7x's 64 MiB physical VMEM.
    vmem_limit = 16 * 1024 * 1024 + tk * 64 * 1024

    out = pl.pallas_call(
        _make_kernel(height, width),
        out_shape=jax.ShapeDtypeStruct((k_pad, C_OUT), jnp.float32),
        grid=(k_pad // tk,),
        in_specs=[
            pl.BlockSpec((tk, 8), lambda i: (i, 0)),
            pl.BlockSpec((P_ROWS, C_OUT), lambda i: (0, 0)),   # constant block -> resident
        ],
        out_specs=pl.BlockSpec((tk, C_OUT), lambda i: (i, 0)),
        scratch_shapes=[pltpu.VMEM((tk, C_MID, EMB_LEN), jnp.bfloat16)],
        compiler_params=pltpu.CompilerParams(
            dimension_semantics=("parallel",),
            vmem_limit_bytes=vmem_limit,
        ),
    )(b8, packed_params)

    return out[:K].reshape(K, C_OUT, 1, 1)


def _coordinate_pos(boxes, height, width):
    boxes = boxes.astype(jnp.float32)
    cy = (boxes[:, 1] + boxes[:, 3]) / 2.0
    cx = (boxes[:, 0] + boxes[:, 2]) / 2.0
    h = boxes[:, 3] - boxes[:, 1]
    w = boxes[:, 2] - boxes[:, 0]
    # NOTE: faithful to the reference (cy scaled by width, cx by height, etc.)
    pos = jnp.stack([cy / width * 100.0,
                     cx / height * 100.0,
                     h / width * 100.0,
                     w / height * 100.0], axis=1)
    return pos


def _reference_forward(boxes, params, height=IMG_SIZE, width=IMG_SIZE):
    """Pure-JAX mirror of the PyTorch module (eval-mode BN), NCHW layout, f32."""
    pos = _coordinate_pos(boxes, height, width)                       # [K, 4]
    dm = 1000.0 ** (jnp.arange(VECTOR_DIM, dtype=jnp.float32) / VECTOR_DIM)
    arg = pos[:, :, None] / dm[None, None, :]                         # [K, 4, 64]
    emb = jnp.concatenate([jnp.sin(arg), jnp.cos(arg)], axis=-1)      # [K, C=4, H=128]
    y1 = jnp.einsum('kch,co->koh', emb, params["w1"]) + params["b1"][None, :, None]
    y1 = ((y1 - params["m1"][None, :, None])
          / jnp.sqrt(params["v1"] + BN_EPS)[None, :, None]
          * params["g1"][None, :, None] + params["beta1"][None, :, None])
    y1 = jnp.maximum(y1, 0.0)
    y2 = jnp.einsum('koh,om->kmh', y1, params["w2"]) + params["b2"][None, :, None]
    y2 = ((y2 - params["m2"][None, :, None])
          / jnp.sqrt(params["v2"] + BN_EPS)[None, :, None]
          * params["g2"][None, :, None] + params["beta2"][None, :, None])
    y2 = jnp.maximum(y2, 0.0)
    return jnp.max(y2, axis=-1).reshape(-1, C_OUT, 1, 1)              # [K, 128, 1, 1]


def _make_boxes(key, K):
    kb1, kb2, kb3, kb4 = jax.random.split(key, 4)
    x1 = jax.random.uniform(kb1, (K,), jnp.float32, 0.0, 400.0)
    y1 = jax.random.uniform(kb2, (K,), jnp.float32, 0.0, 400.0)
    x2 = x1 + jax.random.uniform(kb3, (K,), jnp.float32, 10.0, 300.0)
    y2 = y1 + jax.random.uniform(kb4, (K,), jnp.float32, 10.0, 300.0)
    wh = jnp.full((K,), float(IMG_SIZE), jnp.float32)
    return jnp.stack([x1, y1, x2, y2, wh, wh], axis=1)                # [K, 6]


if __name__ == "__main__":
    key = jax.random.PRNGKey(0)
    k_param, k_box = jax.random.split(key)
    params = init_params(k_param)
    packed = pack_params(params)      # folded once, reused across calls

    k1, k2 = jax.random.split(k_box)

    # Tolerance is relaxed vs the pure-f32 version because conv2 runs with bf16
    # MXU operands (f32 accumulation); expected error is ~1e-2.
    ATOL = 5e-2
    RTOL = 5e-2

    # K=8 boxes: [x1, y1, x2, y2, w_image, h_image] -> single grid step.
    boxes = _make_boxes(k1, 8)
    out = jax.block_until_ready(position_encoder_forward(boxes, packed))
    ref = _reference_forward(boxes, params)
    assert out.shape == (8, C_OUT, 1, 1), out.shape
    assert jnp.allclose(out, ref, atol=ATOL, rtol=RTOL), \
        float(jnp.max(jnp.abs(out - ref)))

    # K=40 (not a multiple of the tile): exercises padding + a 2-step "parallel" grid.
    boxes2 = _make_boxes(k2, 40)
    out2 = jax.block_until_ready(position_encoder_forward(boxes2, packed))
    ref2 = _reference_forward(boxes2, params)
    assert out2.shape == (40, C_OUT, 1, 1), out2.shape
    assert jnp.allclose(out2, ref2, atol=ATOL, rtol=RTOL), \
        float(jnp.max(jnp.abs(out2 - ref2)))

    # TODO(synk): training-mode BatchNorm (batch statistics) and the `.half()` fp16
    # path are not implemented; the kernel uses eval-mode BN folded into the weights
    # (conv2 runs with bf16 MXU operands / f32 accumulation instead of fp16).
    print("KERNEL_OK")
</pallas_src>

<mosaic_0001>
module attributes {stable_mosaic.version = 11 : i64} {
  func.func @kernel(%arg0: i32, %arg1: memref<8x8xf32, #tpu.memory_space<vmem>>, %arg2: memref<392x128xf32, #tpu.memory_space<vmem>>, %arg3: memref<8x128xf32, #tpu.memory_space<vmem>>, %arg4: memref<8x64x128xbf16, #tpu.memory_space<vmem>>) attributes {dimension_semantics = [#tpu.dimension_semantics<parallel>], iteration_bounds = array<i64: 1>, scalar_prefetch = 0 : i64, scratch_operands = 1 : i64, tpu.core_type = #tpu.core_type<tc>, window_params = [{transform_indices = @transform_0, window_bounds = array<i64: 8, 8>}, {pipeline_mode = #tpu.pipeline_mode<synchronous>, transform_indices = @transform_1, window_bounds = array<i64: 392, 128>}, {transform_indices = @transform_2, window_bounds = array<i64: 8, 128>}]} {
    %c0 = arith.constant 0 : index
    %c0_0 = arith.constant 0 : index
    %0 = vector.load %arg1[%c0, %c0_0] : memref<8x8xf32, #tpu.memory_space<vmem>>, vector<8x8xf32>
    %1 = vector.extract_strided_slice %0 {offsets = [0, 0], sizes = [8, 1], strides = [1, 1]} : vector<8x8xf32> to vector<8x1xf32>
    %2 = vector.extract_strided_slice %0 {offsets = [0, 1], sizes = [8, 1], strides = [1, 1]} : vector<8x8xf32> to vector<8x1xf32>
    %3 = vector.extract_strided_slice %0 {offsets = [0, 2], sizes = [8, 1], strides = [1, 1]} : vector<8x8xf32> to vector<8x1xf32>
    %4 = vector.extract_strided_slice %0 {offsets = [0, 3], sizes = [8, 1], strides = [1, 1]} : vector<8x8xf32> to vector<8x1xf32>
    %5 = arith.addf %2, %4 : vector<8x1xf32>
    %cst = arith.constant 0.0679347813 : f32
    %6 = vector.broadcast %cst : f32 to vector<8x1xf32>
    %7 = arith.mulf %5, %6 : vector<8x1xf32>
    %8 = arith.addf %1, %3 : vector<8x1xf32>
    %cst_1 = arith.constant 0.0679347813 : f32
    %9 = vector.broadcast %cst_1 : f32 to vector<8x1xf32>
    %10 = arith.mulf %8, %9 : vector<8x1xf32>
    %11 = arith.subf %4, %2 : vector<8x1xf32>
    %cst_2 = arith.constant 0.135869563 : f32
    %12 = vector.broadcast %cst_2 : f32 to vector<8x1xf32>
    %13 = arith.mulf %11, %12 : vector<8x1xf32>
    %14 = arith.subf %3, %1 : vector<8x1xf32>
    %cst_3 = arith.constant 0.135869563 : f32
    %15 = vector.broadcast %cst_3 : f32 to vector<8x1xf32>
    %16 = arith.mulf %14, %15 : vector<8x1xf32>
    %c0_4 = arith.constant 0 : index
    %c0_5 = arith.constant 0 : index
    %17 = vector.load %arg2[%c0_4, %c0_5] : memref<392x128xf32, #tpu.memory_space<vmem>>, vector<1x128xf32>
    %18 = vector.shape_cast %17 : vector<1x128xf32> to vector<128xf32>
    %c1 = arith.constant 1 : index
    %c0_6 = arith.constant 0 : index
    %19 = vector.load %arg2[%c1, %c0_6] : memref<392x128xf32, #tpu.memory_space<vmem>>, vector<1x128xf32>
    %20 = vector.shape_cast %19 : vector<1x128xf32> to vector<128xf32>
    %21 = vector.shape_cast %18 : vector<128xf32> to vector<1x128xf32>
    %22 = vector.broadcast %7 : vector<8x1xf32> to vector<8x128xf32>
    %23 = vector.broadcast %21 : vector<1x128xf32> to vector<8x128xf32>
    %24 = arith.mulf %22, %23 : vector<8x128xf32>
    %25 = vector.shape_cast %20 : vector<128xf32> to vector<1x128xf32>
    %26 = vector.broadcast %25 : vector<1x128xf32> to vector<8x128xf32>
    %27 = arith.addf %24, %26 : vector<8x128xf32>
    %28 = math.sin %27 : vector<8x128xf32>
    %29 = vector.shape_cast %18 : vector<128xf32> to vector<1x128xf32>
    %30 = vector.broadcast %10 : vector<8x1xf32> to vector<8x128xf32>
    %31 = vector.broadcast %29 : vector<1x128xf32> to vector<8x128xf32>
    %32 = arith.mulf %30, %31 : vector<8x128xf32>
    %33 = vector.shape_cast %20 : vector<128xf32> to vector<1x128xf32>
    %34 = vector.broadcast %33 : vector<1x128xf32> to vector<8x128xf32>
    %35 = arith.addf %32, %34 : vector<8x128xf32>
    %36 = math.sin %35 : vector<8x128xf32>
    %37 = vector.shape_cast %18 : vector<128xf32> to vector<1x128xf32>
    %38 = vector.broadcast %13 : vector<8x1xf32> to vector<8x128xf32>
    %39 = vector.broadcast %37 : vector<1x128xf32> to vector<8x128xf32>
    %40 = arith.mulf %38, %39 : vector<8x128xf32>
    %41 = vector.shape_cast %20 : vector<128xf32> to vector<1x128xf32>
    %42 = vector.broadcast %41 : vector<1x128xf32> to vector<8x128xf32>
    %43 = arith.addf %40, %42 : vector<8x128xf32>
    %44 = math.sin %43 : vector<8x128xf32>
    %45 = vector.shape_cast %18 : vector<128xf32> to vector<1x128xf32>
    %46 = vector.broadcast %16 : vector<8x1xf32> to vector<8x128xf32>
    %47 = vector.broadcast %45 : vector<1x128xf32> to vector<8x128xf32>
    %48 = arith.mulf %46, %47 : vector<8x128xf32>
    %49 = vector.shape_cast %20 : vector<128xf32> to vector<1x128xf32>
    %50 = vector.broadcast %49 : vector<1x128xf32> to vector<8x128xf32>
    %51 = arith.addf %48, %50 : vector<8x128xf32>
    %52 = math.sin %51 : vector<8x128xf32>
    %c136 = arith.constant 136 : index
    %c0_7 = arith.constant 0 : index
    %53 = vector.load %arg2[%c136, %c0_7] : memref<392x128xf32, #tpu.memory_space<vmem>>, vector<64x128xf32>
    %c200 = arith.constant 200 : index
    %c0_8 = arith.constant 0 : index
    %54 = vector.load %arg2[%c200, %c0_8] : memref<392x128xf32, #tpu.memory_space<vmem>>, vector<64x128xf32>
    %c264 = arith.constant 264 : index
    %c0_9 = arith.constant 0 : index
    %55 = vector.load %arg2[%c264, %c0_9] : memref<392x128xf32, #tpu.memory_space<vmem>>, vector<64x128xf32>
    %c328 = arith.constant 328 : index
    %c0_10 = arith.constant 0 : index
    %56 = vector.load %arg2[%c328, %c0_10] : memref<392x128xf32, #tpu.memory_space<vmem>>, vector<64x128xf32>
    %c72 = arith.constant 72 : index
    %c0_11 = arith.constant 0 : index
    %57 = vector.load %arg2[%c72, %c0_11] : memref<392x128xf32, #tpu.memory_space<vmem>>, vector<64x128xf32>
    %58 = vector.shape_cast %28 : vector<8x128xf32> to vector<8x1x128xf32>
    %59 = vector.shape_cast %53 : vector<64x128xf32> to vector<1x64x128xf32>
    %60 = vector.broadcast %58 : vector<8x1x128xf32> to vector<8x64x128xf32>
    %61 = vector.broadcast %59 : vector<1x64x128xf32> to vector<8x64x128xf32>
    %62 = arith.mulf %60, %61 : vector<8x64x128xf32>
    %63 = vector.shape_cast %36 : vector<8x128xf32> to vector<8x1x128xf32>
    %64 = vector.shape_cast %54 : vector<64x128xf32> to vector<1x64x128xf32>
    %65 = vector.broadcast %63 : vector<8x1x128xf32> to vector<8x64x128xf32>
    %66 = vector.broadcast %64 : vector<1x64x128xf32> to vector<8x64x128xf32>
    %67 = arith.mulf %65, %66 : vector<8x64x128xf32>
    %68 = arith.addf %62, %67 : vector<8x64x128xf32>
    %69 = vector.shape_cast %44 : vector<8x128xf32> to vector<8x1x128xf32>
    %70 = vector.shape_cast %55 : vector<64x128xf32> to vector<1x64x128xf32>
    %71 = vector.broadcast %69 : vector<8x1x128xf32> to vector<8x64x128xf32>
    %72 = vector.broadcast %70 : vector<1x64x128xf32> to vector<8x64x128xf32>
    %73 = arith.mulf %71, %72 : vector<8x64x128xf32>
    %74 = arith.addf %68, %73 : vector<8x64x128xf32>
    %75 = vector.shape_cast %52 : vector<8x128xf32> to vector<8x1x128xf32>
    %76 = vector.shape_cast %56 : vector<64x128xf32> to vector<1x64x128xf32>
    %77 = vector.broadcast %75 : vector<8x1x128xf32> to vector<8x64x128xf32>
    %78 = vector.broadcast %76 : vector<1x64x128xf32> to vector<8x64x128xf32>
    %79 = arith.mulf %77, %78 : vector<8x64x128xf32>
    %80 = arith.addf %74, %79 : vector<8x64x128xf32>
    %81 = vector.shape_cast %57 : vector<64x128xf32> to vector<1x64x128xf32>
    %82 = vector.broadcast %81 : vector<1x64x128xf32> to vector<8x64x128xf32>
    %83 = arith.addf %80, %82 : vector<8x64x128xf32>
    %cst_12 = arith.constant 0.000000e+00 : f32
    %84 = vector.broadcast %cst_12 : f32 to vector<8x64x128xf32>
    %85 = arith.maximumf %83, %84 : vector<8x64x128xf32>
    %86 = arith.truncf %85 : vector<8x64x128xf32> to vector<8x64x128xbf16>
    %c0_13 = arith.constant 0 : index
    %c0_14 = arith.constant 0 : index
    %c0_15 = arith.constant 0 : index
    %87 = vector.load %arg4[%c0_13, %c0_14, %c0_15] : memref<8x64x128xbf16, #tpu.memory_space<vmem>>, vector<8x64x128xbf16>
    tpu.vector_store %arg4[%c0_13, %c0_14, %c0_15], %86 {strides = array<i32>} : memref<8x64x128xbf16, #tpu.memory_space<vmem>>, vector<8x64x128xbf16>,
    %c8 = arith.constant 8 : index
    %c0_16 = arith.constant 0 : index
    %88 = vector.load %arg2[%c8, %c0_16] : memref<392x128xf32, #tpu.memory_space<vmem>>, vector<64x128xf32>
    %89 = arith.truncf %88 : vector<64x128xf32> to vector<64x128xbf16>
    %c2 = arith.constant 2 : index
    %c0_17 = arith.constant 0 : index
    %90 = vector.load %arg2[%c2, %c0_17] : memref<392x128xf32, #tpu.memory_space<vmem>>, vector<1x128xf32>
    %91 = vector.shape_cast %90 : vector<1x128xf32> to vector<128xf32>
    %c0_i32 = arith.constant 0 : i32
    %c8_i32 = arith.constant 8 : i32
    %92 = arith.addi %c0_i32, %c8_i32 : i32
    %c1_i32 = arith.constant 1 : i32
    scf.for %arg5 = %c0_i32 to %92 step %c1_i32  : i32 {
      %93 = arith.index_cast %arg5 : i32 to index
      %c0_19 = arith.constant 0 : index
      %c0_20 = arith.constant 0 : index
      %94 = vector.load %arg4[%93, %c0_19, %c0_20] : memref<8x64x128xbf16, #tpu.memory_space<vmem>>, vector<1x64x128xbf16>
      %95 = vector.shape_cast %94 : vector<1x64x128xbf16> to vector<64x128xbf16>
      %cst_21 = arith.constant dense<0.000000e+00> : vector<128x128xf32>
      %96 = tpu.matmul %95, %89, %cst_21 {dimension_numbers = #tpu.dot_dimension_numbers<[0], [0], [1], [1], [0, 1, 1, 1], [], []>} : vector<64x128xbf16>, vector<64x128xbf16>, vector<128x128xf32> -> vector<128x128xf32>
      %cst_22 = arith.constant dense<0xFF800000> : vector<128xf32>
      %97 = vector.multi_reduction <maximumf>, %96, %cst_22 [0] : vector<128x128xf32> to vector<128xf32>
      %98 = arith.addf %97, %91 : vector<128xf32>
      %cst_23 = arith.constant 0.000000e+00 : f32
      %99 = vector.broadcast %cst_23 : f32 to vector<128xf32>
      %100 = arith.maximumf %98, %99 : vector<128xf32>
      %101 = arith.index_cast %arg5 : i32 to index
      %c0_24 = arith.constant 0 : index
      %102 = vector.load %arg3[%101, %c0_24] : memref<8x128xf32, #tpu.memory_space<vmem>>, vector<1x128xf32>
      %103 = vector.shape_cast %102 : vector<1x128xf32> to vector<128xf32>
      %104 = vector.shape_cast %100 : vector<128xf32> to vector<1x128xf32>
      tpu.vector_store %arg3[%101, %c0_24], %104 {strides = array<i32>} : memref<8x128xf32, #tpu.memory_space<vmem>>, vector<1x128xf32>,
    }
    %c8_i32_18 = arith.constant 8 : i32
    return
  }
  func.func @transform_0(%arg0: i32) -> (i32, i32) {
    %c0_i32 = arith.constant 0 : i32
    %c0_i32_0 = arith.constant 0 : i32
    return %arg0, %c0_i32 : i32, i32
  }
  func.func @transform_1(%arg0: i32) -> (i32, i32) {
    %c0_i32 = arith.constant 0 : i32
    %c0_i32_0 = arith.constant 0 : i32
    %c0_i32_1 = arith.constant 0 : i32
    return %c0_i32, %c0_i32_0 : i32, i32
  }
  func.func @transform_2(%arg0: i32) -> (i32, i32) {
    %c0_i32 = arith.constant 0 : i32
    %c0_i32_0 = arith.constant 0 : i32
    return %arg0, %c0_i32 : i32, i32
  }
}

</mosaic_0001>

<bundles_post_ra>
// kernel: tpu_custom_call.1
= control target key start
LH: loop header
LB: loop body
LE: loop exit
PB: predicated region body
PF: predicated region fallthrough
CT: control target
= control target key end

     0   :  { %7 = vsyncpa [#allocation4], 0  ;;  %s4555_s0 = inlined_call_operand.hbm [shape: f32[8,8], index: 0, kind: input, shape index: {}]   ;;  %s4556_s1 = inlined_call_operand.hbm [shape: f32[392,128], index: 1, kind: input, shape index: {}]   ;;  %s4557_s2 = inlined_call_operand.hbm [shape: f32[8,128], index: 2, kind: output, shape index: {}]  }
   0x1   :  { %8 = vsyncpa [#allocation7], 0 }
   0x2   :  { %9 = vsyncpa [#allocation5], 0  ;;  %s1973_s9 = smov [#allocation3]   ;;  %s1974_s11 = smov [#allocation6]  }
   0x3   :  { %s16_s10 = sshll.u32 %s1973_s9, 4  ;;  %s25_s12 = sshll.u32 %s1974_s11, 4  ;;  %s17_s10 = int_to_ptr.vmem [resolvable:$true] %s16_s10  ;;  %s2006_s12 = int_to_ptr.vmem [resolvable:$true] %s25_s12 }
   0x4   :  { %s1893_s15 = scalar_lea.hbm %s4555_s0, 128 }
   0x5   :  { %p1894_p0 = scmp.ne.s32.totalorder %s4555_s0, %s1893_s15  ;;  %p1897_p1 = scmp.lt.u32.totalorder %s1893_s15, %s4555_s0 }
   0x7   :  { %p1899_p2 = pnand %p1897_p1, %p1894_p0 }
   0x9   :  { %1902 = shalt.err (!%p1899_p2)
}
   0xa   :  { %s1903_s20 = scalar_lea.vmem %s17_s10, 128  ;;  %p1908_p4 = scmp.lt.s32.totalorder %s17_s10, %s17_s10 }
   0xb   :  { %p1904_p3 = scmp.ne.s32.totalorder %s17_s10, %s1903_s20  ;;  %p1909_p5 = scmp.lt.s32.totalorder %s1903_s20, %s1903_s20 }
   0xd   :  { %p1910_p6 = por %p1909_p5, %p1908_p4 }
   0xf   :  { %p1911_p7 = pnand %p1910_p6, %p1904_p3 }
  0x11   :  { %1914 = shalt.err (!%p1911_p7)
}
  0x12   :  { %19 = dma.hbm_to_vmem [thread:$0]  %s4555_s0, 128, %s17_s10, [#allocation4]  }
  0x13   :  { %s1915_s25 = scalar_lea.hbm %s4556_s1, 6272 }
  0x14   :  { %p1916_p8 = scmp.ne.s32.totalorder %s4556_s1, %s1915_s25  ;;  %p1919_p9 = scmp.lt.u32.totalorder %s1915_s25, %s4556_s1 }
  0x16   :  { %p1921_p10 = pnand %p1919_p9, %p1916_p8 }
  0x18   :  { %1924 = shalt.err (!%p1921_p10)
}
  0x19   :  { %s1925_s30 = scalar_lea.vmem %s2006_s12, 6272  ;;  %p1930_p12 = scmp.lt.s32.totalorder %s2006_s12, %s2006_s12 }
  0x1a   :  { %p1926_p11 = scmp.ne.s32.totalorder %s2006_s12, %s1925_s30  ;;  %p1931_p13 = scmp.lt.s32.totalorder %s1925_s30, %s1925_s30 }
  0x1c   :  { %p1932_p0 = por %p1931_p13, %p1930_p12 }
  0x1e   :  { %p1933_p1 = pnand %p1932_p0, %p1926_p11 }
  0x20   :  { %1936 = shalt.err (!%p1933_p1)
}
  0x21   :  { %s1975_s0 = smov 128   ;;  %s1976_s3 = smov 8  }
  0x22   :  { %31 = dma.hbm_to_vmem [thread:$0]  %s4556_s1, 6272, %s2006_s12, [#allocation7], %s1975_s0, %s1975_s0, %s1976_s3  }
  0x23   :  { %1963 = dma.done.wait [#allocation4], 128  }
  0x24   :  { %1964 = vsyncadd [#allocation4], 4294967168 }
  0x25   :  { %1965 = dma.done.wait [#allocation7], 6272  }
  0x26   :  { %1966 = vsyncadd [#allocation7], 4294961024  ;;  %v1977_v0 = vmov 1   ;;  %v1978_v1 = vmov 3   ;;  %v39_v2 = vld [vmem:[#allocation3] sm:$0xff]  ;;  %s1979_s6 = smov 126  }
  0x27   :  { %1872 = vset.pattern.permute.xlu1 %v1977_v0  ;;  %1874 = vset.pattern.permute.xlu0 %v1978_v1  ;;  %s1980_s7 = smov 2   ;;  %v1981_v9 = vmov 0   ;;  %v1982_v10 = vmov 2   ;;  %v2037_v11 = vld [vmem:[#allocation6] ss:$0 sm:$0xff]  ;;  %s4508_s1 = smov 0  }
  0x28   :  { %41 = vrot.lane.b32.xlu0 %v39_v2, %s1979_s6  ;;  %v2039_v13 = vld [vmem:[#allocation6 + $0x1] ss:$0 sm:$0xff]  ;;  %v1983_v43 = vmov 683565275   ;;  %v1984_v45 = vmov 2475754826  }
  0x29   :  { %v1985_v48 = vmov 2131351028   ;;  %v1986_v50 = vmov 2102212464   ;;  %v1987_v52 = vmov 920167782  }
  0x2a   :  { %v1988_v59 = vmov 1326507024  }
  0x2c   :  { %46 = vrot.lane.b32.xlu0 %v39_v2, %s1980_s7 }
  0x9a   :  { %v42_v3 = vpop.permute.xlu0 %41 }
  0x9b   :  { %v44_v4 = vadd.f32 %v42_v3, %v39_v2 }
  0x9d   :  { %v45_v5 = vmul.f32 0.06793478, %v44_v4 }
  0x9e   :  { %v47_v6 = vpop.permute.xlu0 %46 }
  0x9f   :  { %55 = vperm.xlu1 %1872, %v45_v5   ;;  %v49_v7 = vsub.f32 %v39_v2, %v47_v6 }
  0xa1   :  { %v50_v8 = vmul.f32 0.13586956, %v49_v7 }
  0xa3   :  { %1873 = vset.pattern.permute.xlu1 %v1981_v9  ;;  %284 = vperm.xlu0 %1874, %v50_v8  }
  0xa4   :  { %173 = vperm.xlu1 %1873, %v45_v5  }
  0xa7   :  { %1876 = vset.pattern.permute.xlu0 %v1982_v10 }
  0xa8   :  { %1875 = vset.pattern.permute.xlu1 %v1982_v10 }
  0xa9   :  { %394 = vperm.xlu1 %1875, %v50_v8  }
 0x11e   :  { %v56_v12 = vpop.permute.xlu1 %55 }
 0x11f   :  { %v62_v14 = vmul.f32 %v2037_v11, %v56_v12 }
 0x121   :  { %v2043_v15 = vadd.f32 %v2039_v13, %v62_v14 }
 0x122   :  { %v285_v16 = vpop.permute.xlu0 %284 }
 0x123   :  { %v174_v17 = vpop.permute.xlu1 %173  ;;  %v68_v18 = vand.u32 2147483647, %v2043_v15  ;;  %v71_v19 = vand.u32 2139095040, %v2043_v15  ;;  %v287_v21 = vmul.f32 %v2037_v11, %v285_v16  ;;  %vm70_vm13 = vcmp.lt.s32.totalorder %v2043_v15, 0 }
 0x124   :  { %v176_v20 = vmul.f32 %v2037_v11, %v174_v17 }
 0x125   :  { %v72_v22 = vshrl.u32 %v71_v19, 23  ;;  %v75_v23 = vand.u32 8388607, %v68_v18  ;;  %v2055_v25 = vadd.f32 %v2039_v13, %v287_v21 }
 0x126   :  { %v2052_v24 = vadd.f32 %v2039_v13, %v176_v20 }
 0x127   :  { %v1758_v26 = vadd.s32 4294967169, %v72_v22  ;;  %v76_v30 = vor.u32 8388608, %v75_v23  ;;  %v292_v33 = vand.u32 2139095040, %v2055_v25 }
 0x128   :  { %v178_v27 = vand.u32 2147483647, %v2052_v24  ;;  %v181_v28 = vand.u32 2139095040, %v2052_v24 }
 0x129   :  { %v78_v29 = vadd.s32 1, %v1758_v26  ;;  %v293_v36 = vshrl.u32 %v292_v33, 23  ;;  %v2062_v39 = vshll.u32 %v76_v30, 8 }
 0x12a   :  { %v182_v31 = vshrl.u32 %v181_v28, 23  ;;  %v185_v32 = vand.u32 8388607, %v178_v27 }
 0x12b   :  { %vm79_vm0 = vcmp.gt.s32.totalorder %v78_v29, 0  ;;  %v1766_v47 = vadd.s32 4294967169, %v293_v36 }
 0x12c   :  { %v80_v34 = vsel %vm79_vm0, %v78_v29, 0  ;;  %v1762_v35 = vadd.s32 4294967169, %v182_v31  ;;  %v186_v40 = vor.u32 8388608, %v185_v32  ;;  %vm2170_vm0 = vcmp.le.f32.partialorder %v68_v18, 0.7853982 }
 0x12d   :  { %v81_v37 = vshrl.u32 %v80_v34, 5  ;;  %v82_v38 = vand.u32 31, %v80_v34  ;;  %v299_v31 = vadd.s32 1, %v1766_v47 }
 0x12e   :  { %v188_v41 = vadd.s32 1, %v1762_v35  ;;  %v2084_v21 = vshll.u32 %v186_v40, 8 }
 0x12f   :  { %v83_v42 = vsub.s32 32, %v82_v38  ;;  %v85_v44 = vshll.u32 %v1983_v43, %v82_v38  ;;  %v88_v46 = vshll.u32 %v1984_v45, %v82_v38  ;;  %v91_v49 = vshll.u32 %v1985_v48, %v82_v38 }
 0x130   :  { %v94_v51 = vshll.u32 %v1986_v50, %v82_v38  ;;  %v97_v53 = vshll.u32 %v1987_v52, %v82_v38  ;;  %vm100_vm1 = vcmp.lt.s32.totalorder %v81_v37, 1  ;;  %vm101_vm2 = vcmp.lt.s32.totalorder %v81_v37, 2 }
 0x131   :  { %v86_v54 = vshrl.u32 %v1984_v45, %v83_v42  ;;  %v89_v55 = vshrl.u32 %v1985_v48, %v83_v42  ;;  %v92_v56 = vshrl.u32 %v1986_v50, %v83_v42  ;;  %v84_v57 = vshrl.u32 %v1983_v43, %v83_v42 }
 0x132   :  { %v95_v58 = vshrl.u32 %v1987_v52, %v83_v42  ;;  %v98_v60 = vshrl.u32 %v1988_v59, %v83_v42  ;;  %vm102_vm3 = vcmp.lt.s32.totalorder %v81_v37, 3  ;;  %vm189_vm4 = vcmp.gt.s32.totalorder %v188_v41, 0 }
 0x133   :  { %v87_v61 = vor.u32 %v86_v54, %v85_v44  ;;  %v90_v62 = vor.u32 %v89_v55, %v88_v46  ;;  %v93_v63 = vor.u32 %v92_v56, %v91_v49  ;;  %vm103_vm5 = vcmp.lt.s32.totalorder %v81_v37, 4 }
 0x134   :  { %v96_v0 = vor.u32 %v95_v58, %v94_v51  ;;  %v99_v1 = vor.u32 %v98_v60, %v97_v53  ;;  %v190_v2 = vsel %vm189_vm4, %v188_v41, 0  ;;  %vm300_vm10 = vcmp.gt.s32.totalorder %v299_v31, 0 }
 0x135   :  { %v104_v3 = vsel %vm100_vm1, %v84_v57, %v87_v61  ;;  %v105_v4 = vsel %vm103_vm5, %v93_v63, 2102212464  ;;  %v108_v5 = vsel %vm100_vm1, %v87_v61, %v90_v62  ;;  %v112_v6 = vsel %vm100_vm1, %v90_v62, %v93_v63 }
 0x136   :  { %v106_v7 = vsel %vm102_vm3, %v90_v62, %v105_v4  ;;  %v109_v8 = vsel %vm103_vm5, %v96_v0, 920167782  ;;  %v113_v9 = vsel %vm103_vm5, %v99_v1, 1326507024  ;;  %v191_v10 = vshrl.u32 %v190_v2, 5 }
 0x137   :  { %v107_v12 = vsel %vm101_vm2, %v104_v3, %v106_v7  ;;  %v110_v14 = vsel %vm102_vm3, %v93_v63, %v109_v8  ;;  %v114_v16 = vsel %vm102_vm3, %v96_v0, %v113_v9  ;;  %v192_v17 = vand.u32 31, %v190_v2 }
 0x138   :  { %v111_v19 = vsel %vm101_vm2, %v108_v5, %v110_v14  ;;  %v115_v20 = vsel %vm101_vm2, %v112_v6, %v114_v16  ;;  %v123_v29 = vmul.u32 %v2062_v39, %v107_v12  ;;  %vm210_vm6 = vcmp.lt.s32.totalorder %v191_v10, 1 }
 0x139   :  { %v2087_v22 = vmul.u32.u64.low %v2062_v39, %v115_v20  ;;  %v2088_v23 = vmul.u32.u64.high %v2062_v39, %v115_v20, %v2087_v22  ;;  %v2091_v26 = vmul.u32.u64.low %v2062_v39, %v111_v19  ;;  %v2092_v28 = vmul.u32.u64.high %v2062_v39, %v111_v19, %v2091_v26 }
 0x13a   :  { %v193_v30 = vsub.s32 32, %v192_v17  ;;  %v195_v32 = vshll.u32 %v1983_v43, %v192_v17  ;;  %v198_v33 = vshll.u32 %v1984_v45, %v192_v17  ;;  %v201_v34 = vshll.u32 %v1985_v48, %v192_v17 }
 0x13b   :  { %v204_v35 = vshll.u32 %v1986_v50, %v192_v17  ;;  %v207_v40 = vshll.u32 %v1987_v52, %v192_v17  ;;  %vm125_vm7 = vc.u32 %v2088_v23, %v2091_v26  ;;  %v126_v39 = vadd.s32 1, %v2092_v28 }
 0x13c   :  { %v196_v36 = vshrl.u32 %v1984_v45, %v193_v30  ;;  %v199_v37 = vshrl.u32 %v1985_v48, %v193_v30  ;;  %v202_v38 = vshrl.u32 %v1986_v50, %v193_v30  ;;  %v205_v41 = vshrl.u32 %v1987_v52, %v193_v30 }
 0x13d   :  { %vm211_vm8 = vcmp.lt.s32.totalorder %v191_v10, 2  ;;  %v208_v47 = vshrl.u32 %v1988_v59, %v193_v30  ;;  %v127_v49 = vsel %vm125_vm7, %v126_v39, %v2092_v28  ;;  %v194_v51 = vshrl.u32 %v1983_v43, %v193_v30 }
 0x13e   :  { %v197_v42 = vor.u32 %v196_v36, %v195_v32  ;;  %v200_v44 = vor.u32 %v199_v37, %v198_v33  ;;  %v203_v46 = vor.u32 %v202_v38, %v201_v34  ;;  %v206_v53 = vor.u32 %v205_v41, %v204_v35  ;;  %v395_v36 = vpop.permute.xlu1 %394 }
 0x13f   :  { %vm213_vm9 = vcmp.lt.s32.totalorder %v191_v10, 4  ;;  %v128_v54 = vadd.s32 %v127_v49, %v123_v29  ;;  %v209_v55 = vor.u32 %v208_v47, %v207_v40  ;;  %vm212_vm11 = vcmp.lt.s32.totalorder %v191_v10, 3 }
 0x140   :  { %v215_v56 = vsel %vm213_vm9, %v203_v46, 2102212464  ;;  %v218_v57 = vsel %vm210_vm6, %v197_v42, %v200_v44  ;;  %v219_v58 = vsel %vm213_vm9, %v206_v53, 920167782  ;;  %v222_v60 = vsel %vm210_vm6, %v200_v44, %v203_v46 }
 0x141   :  { %v129_v61 = vadd.s32 536870912, %v128_v54  ;;  %v214_v62 = vsel %vm210_vm6, %v194_v51, %v197_v42  ;;  %v220_v63 = vsel %vm212_vm11, %v203_v46, %v219_v58  ;;  %v223_v0 = vsel %vm213_vm9, %v209_v55, 1326507024 }
 0x142   :  { %v216_v1 = vsel %vm212_vm11, %v200_v44, %v215_v56  ;;  %v221_v2 = vsel %vm211_vm8, %v218_v57, %v220_v63  ;;  %v224_v3 = vsel %vm212_vm11, %v206_v53, %v223_v0  ;;  %v301_v4 = vsel %vm300_vm10, %v299_v31, 0 }
 0x143   :  { %v2115_v5 = vshrl.u32 %v129_v61, 30  ;;  %v225_v6 = vsel %vm211_vm8, %v222_v60, %v224_v3  ;;  %v2119_v7 = vmul.u32.u64.low %v2084_v21, %v221_v2  ;;  %v2120_v8 = vmul.u32.u64.high %v2084_v21, %v221_v2, %v2119_v7 }
 0x144   :  { %v2124_v9 = vmul.u32.u64.low %v2084_v21, %v225_v6  ;;  %v2125_v12 = vmul.u32.u64.high %v2084_v21, %v225_v6, %v2124_v9  ;;  %v303_v14 = vand.u32 31, %v301_v4  ;;  %v217_v17 = vsel %vm211_vm8, %v214_v62, %v216_v1 }
 0x145   :  { %v131_v16 = vshll.u32 %v2115_v5, 30  ;;  %v289_v19 = vand.u32 2147483647, %v2055_v25  ;;  %v236_v28 = vadd.s32 1, %v2120_v8  ;;  %v233_v29 = vmul.u32 %v2084_v21, %v217_v17 }
 0x146   :  { %v304_v20 = vsub.s32 32, %v303_v14  ;;  %vm235_vm12 = vc.u32 %v2125_v12, %v2119_v7  ;;  %v315_v10 = vshll.u32 %v1986_v50, %v303_v14  ;;  %v2138_v34 = vshrl.u32 %v301_v4, 5 }
 0x147   :  { %v132_v22 = vsub.s32 %v128_v54, %v131_v16  ;;  %v237_v31 = vsel %vm235_vm12, %v236_v28, %v2120_v8  ;;  %v296_v32 = vand.u32 8388607, %v289_v19  ;;  %v306_v21 = vshll.u32 %v1983_v43, %v303_v14 }
 0x148   :  { %v238_v33 = vadd.s32 %v237_v31, %v233_v29  ;;  %v316_v35 = vshrl.u32 %v1987_v52, %v304_v20  ;;  %v307_v38 = vshrl.u32 %v1984_v45, %v304_v20  ;;  %v309_v40 = vshll.u32 %v1984_v45, %v303_v14 }
 0x149   :  { %v134_v30 = vsub.s32 0, %v132_v22  ;;  %v310_v41 = vshrl.u32 %v1985_v48, %v304_v20  ;;  %v312_v42 = vshll.u32 %v1985_v48, %v303_v14  ;;  %v313_v44 = vshrl.u32 %v1986_v50, %v304_v20 }
 0x14a   :  { %v239_v39 = vadd.s32 536870912, %v238_v33  ;;  %v297_v47 = vor.u32 8388608, %v296_v32  ;;  %v317_v49 = vor.u32 %v316_v35, %v315_v10  ;;  %v318_v51 = vshll.u32 %v1987_v52, %v303_v14 }
 0x14b   :  { %v1759_v37 = vmin.u32 %v134_v30, %v132_v22  ;;  %v319_v54 = vshrl.u32 %v1988_v59, %v304_v20  ;;  %v397_v55 = vmul.f32 %v2037_v11, %v395_v36  ;;  %v124_v56 = vadd.s32 %v2091_v26, %v2088_v23 }
 0x14c   :  { %v2148_v53 = vshrl.u32 %v239_v39, 30  ;;  %v154_v58 = vsub.s32 4, %v2115_v5  ;;  %v308_v60 = vor.u32 %v307_v38, %v306_v21  ;;  %v311_v62 = vor.u32 %v310_v41, %v309_v40 }
 0x14d   :  { %v136_v46 = vclz %v1759_v37  ;;  %v314_v63 = vor.u32 %v313_v44, %v312_v42  ;;  %vm324_vm14 = vcmp.lt.s32.totalorder %v2138_v34, 4  ;;  %v320_v0 = vor.u32 %v319_v54, %v318_v51 }
 0x14e   :  { %v241_v61 = vshll.u32 %v2148_v53, 30  ;;  %v330_v11 = vsel %vm324_vm14, %v317_v49, 920167782  ;;  %v2160_v1 = vshll.u32 %v297_v47, 8  ;;  %v305_v23 = vshrl.u32 %v1983_v43, %v304_v20 }
 0x14f   :  { %v1760_v57 = vadd.s32 4294967294, %v136_v46  ;;  %v2166_v26 = vadd.f32 %v2039_v13, %v397_v55  ;;  %vm321_vm1 = vcmp.lt.s32.totalorder %v2138_v34, 1  ;;  %vm323_vm2 = vcmp.lt.s32.totalorder %v2138_v34, 3 }
 0x150   :  { %v2162_v3 = vsub.s32 %v238_v33, %v241_v61  ;;  %v329_v14 = vsel %vm321_vm1, %v308_v60, %v311_v62  ;;  %v331_v13 = vsel %vm323_vm2, %v314_v63, %v330_v11  ;;  %v333_v18 = vsel %vm321_vm1, %v311_v62, %v314_v63 }
 0x151   :  { %vm1761_vm15 = vcmp.lt.s32.totalorder %v1760_v57, 0  ;;  %v334_v28 = vsel %vm324_vm14, %v320_v0, 1326507024  ;;  %vm322_vm3 = vcmp.lt.s32.totalorder %v2138_v34, 2  ;;  %v326_v30 = vsel %vm324_vm14, %v314_v63, 2102212464 }
 0x152   :  { %v139_v2 = vsel %vm1761_vm15, 0, %v1760_v57  ;;  %v244_v9 = vsub.s32 0, %v2162_v3  ;;  %v335_v31 = vsel %vm323_vm2, %v317_v49, %v334_v28  ;;  %v155_v35 = vsel %vm70_vm13, %v154_v58, %v2115_v5 }
 0x153   :  { %v140_v6 = vsub.s32 32, %v139_v2  ;;  %v144_v8 = vsub.s32 4294967266, %v139_v2  ;;  %v141_v16 = vshll.u32 %v132_v22, %v139_v2  ;;  %v332_v22 = vsel %vm322_vm3, %v329_v14, %v331_v13 }
 0x154   :  { %v1763_v29 = vmin.u32 %v244_v9, %v2162_v3  ;;  %v336_v33 = vsel %vm322_vm3, %v333_v18, %v335_v31  ;;  %vm180_vm4 = vcmp.lt.s32.totalorder %v2052_v24, 0  ;;  %v325_v37 = vsel %vm321_vm1, %v305_v23, %v308_v60 }
 0x155   :  { %v142_v17 = vshrl.u32 %v124_v56, %v140_v6  ;;  %v145_v20 = vadd.s32 127, %v144_v8  ;;  %v327_v38 = vsel %vm323_vm2, %v311_v62, %v326_v30  ;;  %v264_v42 = vsub.s32 4, %v2148_v53 }
 0x156   :  { %v246_v36 = vclz %v1763_v29  ;;  %v2204_v40 = vmul.u32.u64.low %v2160_v1, %v336_v33  ;;  %v2205_v39 = vmul.u32.u64.high %v2160_v1, %v336_v33, %v2204_v40  ;;  %vm2214_vm5 = vcmp.le.f32.partialorder %v178_v27, 0.7853982 }
 0x157   :  { %v143_v32 = vor.u32 %v142_v17, %v141_v16  ;;  %v146_v10 = vshll.u32 %v145_v20, 23  ;;  %v2209_v44 = vmul.u32.u64.low %v2160_v1, %v332_v22  ;;  %v2210_v5 = vmul.u32.u64.high %v2160_v1, %v332_v22, %v2209_v44 }
 0x158   :  { %v1764_v41 = vadd.s32 4294967294, %v246_v36  ;;  %v402_v51 = vand.u32 2139095040, %v2166_v26  ;;  %v157_v54 = vsel %vm2170_vm0, 0, %v155_v35  ;;  %v328_v55 = vsel %vm322_vm3, %v325_v37, %v327_v38 }
 0x159   :  { %v147_v21 = vor.u32 4788187, %v146_v10  ;;  %v150_v47 = vcvt.s32.f32 %v143_v32  ;;  %v234_v57 = vadd.s32 %v2119_v7, %v2125_v12  ;;  %vm346_vm7 = vc.u32 %v2205_v39, %v2209_v44 }
 0x15a   :  { %vm1765_vm6 = vcmp.lt.s32.totalorder %v1764_v41, 0  ;;  %v265_v61 = vsel %vm180_vm4, %v264_v42, %v2148_v53  ;;  %v347_v62 = vadd.s32 1, %v2210_v5  ;;  %v344_v0 = vmul.u32 %v2160_v1, %v328_v55 }
 0x15b   :  { %v148_v46 = vand.u32 2147483647, %v147_v21  ;;  %v249_v58 = vsel %vm1765_vm6, 0, %v1764_v41  ;;  %v399_v34 = vand.u32 2147483647, %v2166_v26  ;;  %v403_v11 = vshrl.u32 %v402_v51, 23 }
 0x15c   :  { %v250_v27 = vsub.s32 32, %v249_v58  ;;  %v254_v60 = vsub.s32 4294967266, %v249_v58  ;;  %v251_v2 = vshll.u32 %v2162_v3, %v249_v58  ;;  %v348_v23 = vsel %vm346_vm7, %v347_v62, %v2210_v5 }
 0x15d   :  { %v151_v56 = vmul.f32 %v150_v47, %v148_v46  ;;  %v161_v8 = vadd.s32 3, %v157_v54  ;;  %v349_v9 = vadd.s32 %v348_v23, %v344_v0  ;;  %v1770_v53 = vadd.s32 4294967169, %v403_v11 }
 0x15e   :  { %v252_v7 = vshrl.u32 %v234_v57, %v250_v27  ;;  %v255_v12 = vadd.s32 127, %v254_v60  ;;  %v267_v18 = vsel %vm2214_vm5, 0, %v265_v61  ;;  %v406_v16 = vand.u32 8388607, %v399_v34 }
 0x15f   :  { %v152_v63 = vxor.u32 2147483648, %v151_v56  ;;  %v350_v3 = vadd.s32 536870912, %v349_v9  ;;  %v409_v17 = vadd.s32 1, %v1770_v53  ;;  %v162_v28 = vand.u32 3, %v161_v8 }
 0x160   :  { %v253_v1 = vor.u32 %v252_v7, %v251_v2  ;;  %v256_v13 = vshll.u32 %v255_v12, 23  ;;  %v271_v29 = vadd.s32 3, %v267_v18  ;;  %v1989_v10 = vmov 1966171168  }
 0x161   :  { %v153_v6 = vsel %vm70_vm13, %v152_v63, %v151_v56  ;;  %v351_v30 = vshrl.u32 %v350_v3, 30  ;;  %vm410_vm8 = vcmp.gt.s32.totalorder %v409_v17, 0  ;;  %v546_v22 = vunpack.c.l.s4 %v1989_v10 }
 0x162   :  { %v156_v14 = vsel %vm2170_vm0, %v2043_v15, %v153_v6  ;;  %v257_v20 = vor.u32 4788187, %v256_v13  ;;  %v260_v4 = vcvt.s32.f32 %v253_v1  ;;  %v411_v32 = vsel %vm410_vm8, %v409_v17, 0 }
 0x163   :  { %1877 = vcosq.f32 %v156_v14  ;;  %v352_v33 = vshll.u32 %v351_v30, 30  ;;  %v407_v35 = vor.u32 8388608, %v406_v16  ;;  %v413_v36 = vand.u32 31, %v411_v32 }
 0x164   :  { %1879 = vsinq.f32 %v156_v14  ;;  %v258_v31 = vand.u32 2147483647, %v257_v20  ;;  %v548_v37 = vlaneseq  ;;  %vm163_vm9 = vcmp.lt.s32.totalorder %v162_v28, 2 }
 0x165   :  { %vm164_vm10 = vcmp.eq.s32.totalorder %v162_v28, 0  ;;  %vm167_vm11 = vcmp.eq.s32.totalorder %v162_v28, 2  ;;  %v2243_v38 = vsub.s32 %v349_v9, %v352_v33  ;;  %v414_v40 = vsub.s32 32, %v413_v36 }
 0x166   :  { %v261_v21 = vmul.f32 %v260_v4, %v258_v31  ;;  %v2245_v42 = vand.u32 3, %v271_v29  ;;  %vm291_vm12 = vcmp.lt.s32.totalorder %v2055_v25, 0  ;;  %v345_v5 = vadd.s32 %v2209_v44, %v2205_v39 }
 0x167   :  { %v547_v46 = vunpack.c.0.s8 %v546_v22  ;;  %vm160_vm13 = vweird.f32 %v2043_v15  ;;  %v355_v47 = vsub.s32 0, %v2243_v38  ;;  %v375_v51 = vsub.s32 4, %v351_v30 }
 0x168   :  { %v262_v41 = vxor.u32 2147483648, %v261_v21  ;;  %v2251_v54 = vshll.u32 %v407_v35, 8  ;;  %v2253_v55 = vshrl.u32 %v548_v37, 7  ;;  %v2257_v57 = vshrl.u32 %v411_v32, 5 }
 0x169   :  { %v417_v58 = vshrl.u32 %v1984_v45, %v414_v40  ;;  %v420_v27 = vshrl.u32 %v1985_v48, %v414_v40  ;;  %v1767_v60 = vmin.u32 %v355_v47, %v2243_v38  ;;  %v416_v61 = vshll.u32 %v1983_v43, %v413_v36 }
 0x16a   :  { %v263_v56 = vsel %vm180_vm4, %v262_v41, %v261_v21  ;;  %v419_v62 = vshll.u32 %v1984_v45, %v413_v36  ;;  %v422_v11 = vshll.u32 %v1985_v48, %v413_v36  ;;  %v423_v2 = vshrl.u32 %v1986_v50, %v414_v40 }
 0x16b   :  { %v266_v44 = vsel %vm2214_vm5, %v2052_v24, %v263_v56  ;;  %v357_v12 = vclz %v1767_v60  ;;  %v425_v23 = vshll.u32 %v1986_v50, %v413_v36  ;;  %v418_v6 = vor.u32 %v417_v58, %v416_v61 }
 0x16c   :  { %1881 = vcosq.f32 %v266_v44  ;;  %v421_v8 = vor.u32 %v420_v27, %v419_v62  ;;  %v426_v9 = vshrl.u32 %v1987_v52, %v414_v40  ;;  %v428_v14 = vshll.u32 %v1987_v52, %v413_v36 }
 0x16d   :  { %v1878_v39 = vpop.eup %1877  ;;  %1883 = vsinq.f32 %v266_v44  ;;  %v1768_v53 = vadd.s32 4294967294, %v357_v12  ;;  %v429_v48 = vshrl.u32 %v1988_v59, %v414_v40  ;;  %v424_v13 = vor.u32 %v423_v2, %v422_v11 }
 0x16e   :  { %v1880_v63 = vpop.eup %1879  ;;  %v168_v0 = vxor.u32 2147483648, %v1878_v39  ;;  %v427_v18 = vor.u32 %v426_v9, %v425_v23  ;;  %v2277_v3 = vsub.s32 %v547_v46, %v2253_v55  ;;  %v376_v50 = vsel %vm291_vm12, %v375_v51, %v351_v30 }
 0x16f   :  { %v165_v7 = vxor.u32 2147483648, %v1880_v63  ;;  %vm1769_vm14 = vcmp.lt.s32.totalorder %v1768_v53, 0  ;;  %v415_v16 = vshrl.u32 %v1983_v43, %v414_v40  ;;  %v430_v17 = vor.u32 %v429_v48, %v428_v14 }
 0x170   :  { %v169_v49 = vsel %vm167_vm11, %v168_v0, %v1880_v63  ;;  %4582 = vst [vmem:[#allocation12_spill] sm:$0xff] %v2277_v3  ;;  %v360_v52 = vsel %vm1769_vm14, 0, %v1768_v53  ;;  %vm431_vm15 = vcmp.lt.s32.totalorder %v2257_v57, 1  ;;  %vm432_vm0 = vcmp.lt.s32.totalorder %v2257_v57, 2 }
 0x171   :  { %v166_v45 = vsel %vm164_vm10, %v1878_v39, %v165_v7  ;;  %vm2288_vm1 = vcmp.le.f32.partialorder %v289_v19, 0.7853982  ;;  %v361_v28 = vsub.s32 32, %v360_v52  ;;  %v365_v29 = vsub.s32 4294967266, %v360_v52 }
 0x172   :  { %v170_v1 = vsel %vm163_vm9, %v166_v45, %v169_v49  ;;  %vm434_vm2 = vcmp.lt.s32.totalorder %v2257_v57, 4  ;;  %v439_v43 = vsel %vm431_vm15, %v418_v6, %v421_v8  ;;  %vm433_vm3 = vcmp.lt.s32.totalorder %v2257_v57, 3 }
 0x173   :  { %v171_v20 = vsel %vm160_vm13, nan, %v170_v1  ;;  %v440_v15 = vsel %vm434_vm2, %v427_v18, 920167782  ;;  %v443_v30 = vsel %vm431_vm15, %v421_v8, %v424_v13  ;;  %v444_v31 = vsel %vm434_vm2, %v430_v17, 1326507024 }
 0x174   :  { %v362_v4 = vshll.u32 %v2243_v38, %v360_v52  ;;  %v363_v19 = vshrl.u32 %v345_v5, %v361_v28  ;;  %v366_v32 = vadd.s32 127, %v365_v29  ;;  %v441_v10 = vsel %vm433_vm3, %v424_v13, %v440_v15  ;;  %v2355_v15 = vld [vmem:[#allocation6 + $0x88] sm:$0xff] }
 0x175   :  { %v436_v33 = vsel %vm434_vm2, %v424_v13, 2102212464  ;;  %v442_v35 = vsel %vm432_vm0, %v439_v43, %v441_v10  ;;  %v445_v36 = vsel %vm433_vm3, %v427_v18, %v444_v31  ;;  %v544_v37 = vcombine.high %v171_v20, %v171_v20  ;;  %v2366_v31 = vld [vmem:[#allocation6 + $0x98] sm:$0xff]  ;;  %v2373_v10 = vld [vmem:[#allocation6 + $0xa8] sm:$0xff] }
 0x176   :  { %v1882_v22 = vpop.eup %1881  ;;  %v364_v41 = vor.u32 %v363_v19, %v362_v4  ;;  %v367_v46 = vshll.u32 %v366_v32, 23  ;;  %v446_v38 = vsel %vm432_vm0, %v443_v30, %v445_v36  ;;  %v551_v56 = vrot.slane %v171_v20, %v2277_v3  ;;  %v2364_v30 = vld [vmem:[#allocation6 + $0x90] sm:$0xff]  ;;  %v2368_v4 = vld [vmem:[#allocation6 + $0xa0] sm:$0xff] }
 0x177   :  { %v1884_v21 = vpop.eup %1883  ;;  %v278_v40 = vxor.u32 2147483648, %v1882_v22  ;;  %v2308_v47 = vmul.u32.u64.low %v2251_v54, %v446_v38  ;;  %v2309_v51 = vmul.u32.u64.high %v2251_v54, %v446_v38, %v2308_v47  ;;  %v435_v27 = vsel %vm431_vm15, %v415_v16, %v418_v6 }
 0x178   :  { %v275_v5 = vxor.u32 2147483648, %v1884_v21  ;;  %v368_v58 = vor.u32 4788187, %v367_v46  ;;  %v437_v39 = vsel %vm433_vm3, %v421_v8, %v436_v33  ;;  %v558_v44 = vrot.slane %v544_v37, %v2277_v3  ;;  %v2384_v37 = vld [vmem:[#allocation6 + $0xc0] sm:$0xff] }
 0x179   :  { %vm274_vm4 = vcmp.eq.s32.totalorder %v2245_v42, 0  ;;  %v2319_v60 = vmul.u32.u64.low %v2251_v54, %v442_v35  ;;  %v2320_v61 = vmul.u32.u64.high %v2251_v54, %v442_v35, %v2319_v60  ;;  %v559_v62 = vcombine.high %v551_v56, %v551_v56 }
 0x17a   :  { %vm277_vm5 = vcmp.eq.s32.totalorder %v2245_v42, 2  ;;  %v369_v63 = vand.u32 2147483647, %v368_v58  ;;  %v371_v0 = vcvt.s32.f32 %v364_v41  ;;  %v560_v11 = vcombine.high %v558_v44, %v558_v44 }
 0x17b   :  { %v276_v2 = vsel %vm274_vm4, %v1882_v22, %v275_v5  ;;  %v279_v7 = vsel %vm277_vm5, %v278_v40, %v1884_v21  ;;  %v378_v12 = vsel %vm2288_vm1, 0, %v376_v50  ;;  %v438_v23 = vsel %vm432_vm0, %v435_v27, %v437_v39  ;;  %v2375_v22 = vld [vmem:[#allocation6 + $0xb0] sm:$0xff] }
 0x17c   :  { %v372_v49 = vmul.f32 %v371_v0, %v369_v63  ;;  %vm456_vm6 = vc.u32 %v2309_v51, %v2319_v60  ;;  %v567_v6 = vrot.slane %v551_v56, %v2277_v3  ;;  %v574_v8 = vrot.slane %v558_v44, %v2277_v3 }
 0x17d   :  { %v457_v9 = vadd.s32 1, %v2320_v61  ;;  %v581_v45 = vrot.slane %v559_v62, %v2277_v3  ;;  %v588_v53 = vrot.slane %v560_v11, %v2277_v3  ;;  %v2334_v14 = vsub.s32 0, %v2253_v55 }
 0x17e   :  { %vm273_vm7 = vcmp.lt.s32.totalorder %v2245_v42, 2  ;;  %v373_v57 = vxor.u32 2147483648, %v372_v49  ;;  %v382_v48 = vadd.s32 3, %v378_v12  ;;  %v454_v1 = vmul.u32 %v2251_v54, %v438_v23 }
 0x17f   :  { %4585 = vst [vmem:[#allocation13_spill] sm:$0xff] %v2334_v14  ;;  %vm270_vm8 = vweird.f32 %v2052_v24  ;;  %v280_v13 = vsel %vm273_vm7, %v276_v2, %v279_v7  ;;  %v458_v18 = vsel %vm456_vm6, %v457_v9, %v2320_v61  ;;  %v589_v17 = vcombine.high %v567_v6, %v567_v6  ;;  %v2377_v24 = vld [vmem:[#allocation6 + $0xb8] sm:$0xff] }
 0x180   :  { %v374_v50 = vsel %vm291_vm12, %v373_v57, %v372_v49  ;;  %v459_v16 = vadd.s32 %v458_v18, %v454_v1  ;;  %v590_v20 = vcombine.high %v574_v8, %v574_v8  ;;  %vm2347_vm9 = vcmp.le.f32.partialorder %v399_v34, 0.7853982 }
 0x181   :  { %v377_v55 = vsel %vm2288_vm1, %v2055_v25, %v374_v50  ;;  %v591_v54 = vcombine.high %v581_v45, %v581_v45  ;;  %v592_v52 = vcombine.high %v588_v53, %v588_v53  ;;  %v596_v28 = vrot.slane %v567_v6, %v2334_v14 }
 0x182   :  { %1885 = vcosq.f32 %v377_v55  ;;  %v2352_v29 = vand.u32 3, %v382_v48  ;;  %vm401_vm10 = vcmp.lt.s32.totalorder %v2166_v26, 0  ;;  %v460_v43 = vadd.s32 536870912, %v459_v16 }
 0x183   :  { %v2359_v59 = vsel %vm270_vm8, nan, %v280_v13  ;;  %1887 = vsinq.f32 %v377_v55  ;;  %v2362_v34 = vadd.s32 %v2319_v60, %v2309_v51  ;;  %v2371_v19 = vrot.slane %v574_v8, %v2334_v14 }
 0x184   :  { %v461_v32 = vshrl.u32 %v460_v43, 30  ;;  %v600_v33 = vrot.slane %v581_v45, %v2334_v14  ;;  %v604_v35 = vrot.slane %v589_v17, %v2334_v14  ;;  %v2382_v36 = vrot.slane %v588_v53, %v2334_v14 }
 0x185   :  { %v608_v21 = vrot.slane %v591_v54, %v2334_v14  ;;  %v2388_v40 = vrot.slane %v590_v20, %v2334_v14  ;;  %v2391_v41 = vrot.slane %v592_v52, %v2334_v14  ;;  %v2394_v46 = vmul.f32 %v596_v28, %v2355_v15 }
 0x186   :  { %vm388_vm11 = vcmp.eq.s32.totalorder %v2352_v29, 2  ;;  %v462_v38 = vshll.u32 %v461_v32, 30  ;;  %v485_v5 = vsub.s32 4, %v461_v32  ;;  %v2398_v47 = vmul.f32 %v596_v28, %v2364_v30 }
 0x187   :  { %v2401_v51 = vmul.f32 %v596_v28, %v2366_v31  ;;  %vm385_vm12 = vcmp.eq.s32.totalorder %v2352_v29, 0  ;;  %v2405_v56 = vmul.f32 %v596_v28, %v2368_v4  ;;  %v2408_v58 = vmul.f32 %v596_v28, %v2373_v10 }
 0x188   :  { %v2411_v27 = vmul.f32 %v596_v28, %v2375_v22  ;;  %v2414_v39 = vmul.f32 %v596_v28, %v2377_v24  ;;  %v2416_v44 = vsub.s32 %v459_v16, %v462_v38  ;;  %v486_v60 = vsel %vm401_vm10, %v485_v5, %v461_v32 }
 0x189   :  { %v2421_v61 = vmul.f32 %v596_v28, %v2384_v37  ;;  %v2424_v62 = vmul.f32 %v600_v33, %v2355_v15  ;;  %vm384_vm13 = vcmp.lt.s32.totalorder %v2352_v29, 2  ;;  %v2428_v63 = vmul.f32 %v600_v33, %v2364_v30 }
 0x18a   :  { %v2431_v0 = vmul.f32 %v600_v33, %v2366_v31  ;;  %v2434_v11 = vmul.f32 %v600_v33, %v2368_v4  ;;  %v2437_v2 = vmul.f32 %v600_v33, %v2373_v10  ;;  %v465_v7 = vsub.s32 0, %v2416_v44 }
 0x18b   :  { %v488_v12 = vsel %vm2347_vm9, 0, %v486_v60  ;;  %v2443_v23 = vmul.f32 %v600_v33, %v2375_v22  ;;  %v2446_v49 = vmul.f32 %v600_v33, %v2377_v24  ;;  %v2449_v6 = vmul.f32 %v600_v33, %v2384_v37 }
 0x18c   :  { %v2452_v8 = vmul.f32 %v604_v35, %v2355_v15  ;;  %v2455_v9 = vmul.f32 %v604_v35, %v2364_v30  ;;  %v2458_v45 = vmul.f32 %v604_v35, %v2366_v31  ;;  %v1886_v53 = vpop.eup %1885  ;;  %vm381_vm14 = vweird.f32 %v2055_v25 }
 0x18d   :  { %v1771_v57 = vmin.u32 %v465_v7, %v2416_v44  ;;  %v2463_v48 = vmul.f32 %v604_v35, %v2368_v4  ;;  %v2466_v1 = vmul.f32 %v604_v35, %v2373_v10  ;;  %v2469_v13 = vmul.f32 %v604_v35, %v2375_v22  ;;  %v1888_v18 = vpop.eup %1887 }
 0x18e   :  { %v389_v50 = vxor.u32 2147483648, %v1886_v53  ;;  %v492_v16 = vadd.s32 3, %v488_v12  ;;  %v2472_v17 = vmul.f32 %v604_v35, %v2377_v24  ;;  %v2475_v20 = vmul.f32 %v604_v35, %v2384_v37 }
 0x18f   :  { %4588 = vst [vmem:[#allocation14_spill] sm:$0xff] %v2466_v1  ;;  %4589 = vst [vmem:[#allocation15_spill] sm:$0xff] %v2469_v13  ;;  %v386_v55 = vxor.u32 2147483648, %v1888_v18  ;;  %v467_v54 = vclz %v1771_v57  ;;  %v2478_v52 = vmul.f32 %v608_v21, %v2355_v15  ;;  %v2481_v28 = vmul.f32 %v608_v21, %v2364_v30 }
 0x190   :  { %4590 = vst [vmem:[#allocation16_spill] sm:$0xff] %v2472_v17  ;;  %4591 = vst [vmem:[#allocation17_spill] sm:$0xff] %v2475_v20  ;;  %v390_v43 = vsel %vm388_vm11, %v389_v50, %v1888_v18  ;;  %v2486_v32 = vmul.f32 %v608_v21, %v2366_v31  ;;  %v2489_v33 = vmul.f32 %v608_v21, %v2368_v4  ;;  %v2502_v12 = vand.u32 3, %v492_v16 }
 0x191   :  { %4592 = vst [vmem:[#allocation18_spill] sm:$0xff] %v2478_v52  ;;  %4593 = vst [vmem:[#allocation19_spill] sm:$0xff] %v2481_v28  ;;  %v2492_v35 = vmul.f32 %v608_v21, %v2373_v10  ;;  %v387_v38 = vsel %vm385_vm12, %v1886_v53, %v386_v55  ;;  %v1772_v5 = vadd.s32 4294967294, %v467_v54  ;;  %v2497_v60 = vmul.f32 %v608_v21, %v2375_v22 }
 0x192   :  { %4594 = vst [vmem:[#allocation20_spill] sm:$0xff] %v2486_v32  ;;  %4595 = vst [vmem:[#allocation21_spill] sm:$0xff] %v2489_v33  ;;  %v2500_v7 = vmul.f32 %v608_v21, %v2377_v24  ;;  %v2505_v57 = vmul.f32 %v608_v21, %v2384_v37  ;;  %v2509_v18 = vmul.f32 %v2371_v19, %v2355_v15  ;;  %vm498_vm0 = vcmp.eq.s32.totalorder %v2502_v12, 2 }
 0x193   :  { %4596 = vst [vmem:[#allocation22_spill] sm:$0xff] %v2492_v35  ;;  %4597 = vst [vmem:[#allocation23_spill] sm:$0xff] %v2497_v60  ;;  %v2513_v50 = vmul.f32 %v2371_v19, %v2364_v30  ;;  %v391_v53 = vsel %vm384_vm13, %v387_v38, %v390_v43  ;;  %vm1773_vm15 = vcmp.lt.s32.totalorder %v1772_v5, 0  ;;  %v2519_v55 = vmul.f32 %v2371_v19, %v2366_v31 }
 0x194   :  { %4598 = vst [vmem:[#allocation24_spill] sm:$0xff] %v2500_v7  ;;  %4599 = vst [vmem:[#allocation25_spill] sm:$0xff] %v2505_v57  ;;  %v2523_v21 = vmul.f32 %v2371_v19, %v2368_v4  ;;  %v470_v16 = vsel %vm1773_vm15, 0, %v1772_v5  ;;  %v2527_v54 = vmul.f32 %v2371_v19, %v2373_v10  ;;  %v2535_v29 = vmul.f32 %v2371_v19, %v2377_v24 }
 0x195   :  { %4600 = vst [vmem:[#allocation26_spill] sm:$0xff] %v2509_v18  ;;  %4601 = vst [vmem:[#allocation27_spill] sm:$0xff] %v2513_v50  ;;  %v2531_v50 = vmul.f32 %v2371_v19, %v2375_v22  ;;  %v471_v43 = vsub.s32 32, %v470_v16  ;;  %v475_v38 = vsub.s32 4294967266, %v470_v16  ;;  %v2543_v5 = vmul.f32 %v2382_v36, %v2355_v15 }
 0x196   :  { %4602 = vst [vmem:[#allocation28_spill] sm:$0xff] %v2519_v55  ;;  %4603 = vst [vmem:[#allocation29_spill] sm:$0xff] %v2523_v21  ;;  %v2539_v55 = vmul.f32 %v2371_v19, %v2384_v37  ;;  %v2557_v21 = vmul.f32 %v2382_v36, %v2368_v4  ;;  %v472_v19 = vshll.u32 %v2416_v44, %v470_v16  ;;  %vm495_vm1 = vcmp.eq.s32.totalorder %v2502_v12, 0 }
 0x197   :  { %4604 = vst [vmem:[#allocation30_spill] sm:$0xff] %v2527_v54  ;;  %4605 = vst [vmem:[#allocation31_spill] sm:$0xff] %v2531_v50  ;;  %v392_v54 = vsel %vm381_vm14, nan, %v391_v53  ;;  %v2549_v50 = vmul.f32 %v2382_v36, %v2364_v30  ;;  %v2563_v25 = vmul.f32 %v2382_v36, %v2373_v10  ;;  %v2567_v53 = vmul.f32 %v2382_v36, %v2375_v22 }
 0x198   :  { %4606 = vst [vmem:[#allocation32_spill] sm:$0xff] %v2535_v29  ;;  %4607 = vst [vmem:[#allocation33_spill] sm:$0xff] %v2539_v55  ;;  %v2553_v29 = vmul.f32 %v2382_v36, %v2366_v31  ;;  %v473_v55 = vshrl.u32 %v2362_v34, %v471_v43  ;;  %v2579_v34 = vmul.f32 %v2388_v40, %v2355_v15  ;;  %vm494_vm2 = vcmp.lt.s32.totalorder %v2502_v12, 2 }
 0x199   :  { %4608 = vst [vmem:[#allocation34_spill] sm:$0xff] %v2543_v5  ;;  %4609 = vst [vmem:[#allocation35_spill] sm:$0xff] %v2549_v50  ;;  %v476_v5 = vadd.s32 127, %v475_v38  ;;  %v2583_v43 = vmul.f32 %v2388_v40, %v2364_v30  ;;  %v2587_v38 = vmul.f32 %v2388_v40, %v2366_v31  ;;  %vm491_vm3 = vweird.f32 %v2166_v26 }
 0x19a   :  { %4610 = vst [vmem:[#allocation36_spill] sm:$0xff] %v2553_v29  ;;  %4611 = vst [vmem:[#allocation37_spill] sm:$0xff] %v2557_v21  ;;  %v2571_v29 = vmul.f32 %v2382_v36, %v2377_v24  ;;  %v2575_v21 = vmul.f32 %v2382_v36, %v2384_v37  ;;  %v474_v44 = vor.u32 %v473_v55, %v472_v19 }
 0x19b   :  { %4612 = vst [vmem:[#allocation38_spill] sm:$0xff] %v2563_v25  ;;  %4613 = vst [vmem:[#allocation39_spill] sm:$0xff] %v2567_v53  ;;  %v477_v16 = vshll.u32 %v476_v5, 23  ;;  %v2595_v36 = vmul.f32 %v2388_v40, %v2373_v10  ;;  %v698_v55 = vcombine.high %v2359_v59, %v2359_v59  ;;  %v705_v5 = vrot.slane %v2359_v59, %v2277_v3 }
 0x19c   :  { %4614 = vst [vmem:[#allocation40_spill] sm:$0xff] %v2571_v29  ;;  %4615 = vst [vmem:[#allocation41_spill] sm:$0xff] %v2575_v21  ;;  %v2591_v29 = vmul.f32 %v2388_v40, %v2368_v4  ;;  %v2617_v25 = vmul.f32 %v2391_v41, %v2355_v15  ;;  %v2634_v15 = vmul.f32 %v2391_v41, %v2368_v4 }
 0x19d   :  { %4616 = vst [vmem:[#allocation42_spill] sm:$0xff] %v2579_v34  ;;  %4617 = vst [vmem:[#allocation43_spill] sm:$0xff] %v2583_v43  ;;  %v478_v19 = vor.u32 4788187, %v477_v16  ;;  %v2603_v43 = vmul.f32 %v2388_v40, %v2375_v22  ;;  %v2611_v34 = vmul.f32 %v2388_v40, %v2384_v37  ;;  %v713_v21 = vcombine.high %v705_v5, %v705_v5 }
 0x19e   :  { %4618 = vst [vmem:[#allocation44_spill] sm:$0xff] %v2587_v38  ;;  %4619 = vst [vmem:[#allocation45_spill] sm:$0xff] %v2591_v29  ;;  %v2607_v38 = vmul.f32 %v2388_v40, %v2377_v24  ;;  %v916_v29 = vcombine.high %v392_v54, %v392_v54  ;;  %v721_v53 = vrot.slane %v705_v5, %v2277_v3  ;;  %v481_v16 = vcvt.s32.f32 %v474_v44 }
 0x19f   :  { %4620 = vst [vmem:[#allocation46_spill] sm:$0xff] %v2595_v36  ;;  %4621 = vst [vmem:[#allocation47_spill] sm:$0xff] %v2603_v43  ;;  %v712_v36 = vrot.slane %v698_v55, %v2277_v3  ;;  %v479_v59 = vand.u32 2147483647, %v478_v19  ;;  %v2621_v43 = vmul.f32 %v2391_v41, %v2364_v30  ;;  %v735_v40 = vrot.slane %v713_v21, %v2277_v3 }
 0x1a0   :  { %4622 = vst [vmem:[#allocation48_spill] sm:$0xff] %v2607_v38  ;;  %4623 = vst [vmem:[#allocation49_spill] sm:$0xff] %v2611_v34  ;;  %v2626_v55 = vrot.slane %v392_v54, %v2277_v3  ;;  %v2630_v44 = vmul.f32 %v2391_v41, %v2366_v31  ;;  %v2637_v30 = vrot.slane %v916_v29, %v2277_v3 }
 0x1a1   :  { %4624 = vst [vmem:[#allocation50_spill] sm:$0xff] %v2617_v25  ;;  %4625 = vst [vmem:[#allocation51_spill] sm:$0xff] %v2621_v43  ;;  %v714_v38 = vcombine.high %v712_v36, %v712_v36  ;;  %v728_v50 = vrot.slane %v712_v36, %v2277_v3  ;;  %v482_v34 = vmul.f32 %v481_v16, %v479_v59  ;;  %v2653_v59 = vld [vmem:[#allocation6 + $0xc8] sm:$0xff]  ;;  %v2691_v43 = vld [vmem:[#allocation6 + $0x100] sm:$0xff] }
 0x1a2   :  { %4626 = vst [vmem:[#allocation52_spill] sm:$0xff] %v2626_v55  ;;  %4627 = vst [vmem:[#allocation53_spill] sm:$0xff] %v2630_v44  ;;  %v2641_v36 = vmul.f32 %v2391_v41, %v2373_v10  ;;  %v2645_v21 = vmul.f32 %v2391_v41, %v2375_v22  ;;  %v743_v5 = vcombine.high %v721_v53, %v721_v53  ;;  %v2689_v44 = vld [vmem:[#allocation6 + $0xf8] sm:$0xff] }
 0x1a3   :  { %4628 = vst [vmem:[#allocation54_spill] sm:$0xff] %v2634_v15  ;;  %4629 = vst [vmem:[#allocation55_spill] sm:$0xff] %v2637_v30  ;;  %v742_v54 = vrot.slane %v714_v38, %v2277_v3  ;;  %v483_v31 = vxor.u32 2147483648, %v482_v34  ;;  %v2650_v19 = vmul.f32 %v2391_v41, %v2377_v24  ;;  %v745_v4 = vcombine.high %v735_v40, %v735_v40 }
 0x1a4   :  { %4630 = vst [vmem:[#allocation56_spill] sm:$0xff] %v2641_v36  ;;  %4631 = vst [vmem:[#allocation57_spill] sm:$0xff] %v2645_v21  ;;  %v750_v29 = vrot.slane %v721_v53, %v2334_v14  ;;  %v2657_v10 = vmul.f32 %v2391_v41, %v2384_v37  ;;  %v744_v16 = vcombine.high %v728_v50, %v728_v50  ;;  %v2669_v53 = vld [vmem:[#allocation6 + $0xd8] sm:$0xff]  ;;  %v2682_v36 = vld [vmem:[#allocation6 + $0xe8] sm:$0xff] }
 0x1a5   :  { %4632 = vst [vmem:[#allocation58_spill] sm:$0xff] %v2650_v19  ;;  %v2663_v38 = vrot.slane %v2626_v55, %v2277_v3  ;;  %v484_v24 = vsel %vm401_vm10, %v483_v31, %v482_v34  ;;  %v2667_v19 = vld [vmem:[#allocation6 + $0xd0] sm:$0xff]  ;;  %v746_v21 = vcombine.high %v742_v54, %v742_v54  ;;  %v2675_v41 = vrot.slane %v2637_v30, %v2277_v3 }
 0x1a6   :  { %4633 = vst [vmem:[#allocation59_spill] sm:$0xff] %v2657_v10  ;;  %v487_v22 = vsel %vm2347_vm9, %v2166_v26, %v484_v24  ;;  %v2680_v10 = vld [vmem:[#allocation6 + $0xe0] sm:$0xff]  ;;  %v2684_v34 = vld [vmem:[#allocation6 + $0xf0] sm:$0xff]  ;;  %v754_v31 = vrot.slane %v735_v40, %v2334_v14  ;;  %v758_v15 = vrot.slane %v743_v5, %v2334_v14  ;;  %v766_v37 = vrot.slane %v728_v50, %v2334_v14 }
 0x1a7   :  { %4634 = vst [vmem:[#allocation60_spill] sm:$0xff] %v2663_v38  ;;  %4635 = vst [vmem:[#allocation61_spill] sm:$0xff] %v2675_v41  ;;  %1889 = vcosq.f32 %v487_v22  ;;  %v762_v42 = vrot.slane %v745_v4, %v2334_v14  ;;  %v770_v24 = vrot.slane %v742_v54, %v2334_v14  ;;  %v2696_v25 = vmul.f32 %v750_v29, %v2653_v59 }
 0x1a8   :  { %1891 = vsinq.f32 %v487_v22  ;;  %v2699_v41 = vrot.slane %v744_v16, %v2334_v14  ;;  %v2702_v40 = vmul.f32 %v750_v29, %v2667_v19  ;;  %v2705_v50 = vmul.f32 %v750_v29, %v2669_v53 }
 0x1a9   :  { %v2708_v5 = vrot.slane %v746_v21, %v2334_v14  ;;  %v2711_v4 = vmul.f32 %v750_v29, %v2680_v10  ;;  %v2714_v54 = vmul.f32 %v750_v29, %v2682_v36  ;;  %v2717_v22 = vmul.f32 %v750_v29, %v2684_v34 }
 0x1aa   :  { %v2720_v16 = vmul.f32 %v750_v29, %v2689_v44  ;;  %v2723_v38 = vmul.f32 %v750_v29, %v2691_v43  ;;  %v2726_v30 = vmul.f32 %v754_v31, %v2653_v59  ;;  %v2729_v21 = vmul.f32 %v754_v31, %v2667_v19 }
 0x1ab   :  { %v2733_v14 = vmul.f32 %v754_v31, %v2669_v53  ;;  %v2736_v55 = vmul.f32 %v754_v31, %v2680_v10  ;;  %v2739_v3 = vmul.f32 %v754_v31, %v2682_v36  ;;  %v2742_v29 = vmul.f32 %v754_v31, %v2684_v34 }
 0x1ac   :  { %v2746_v18 = vmul.f32 %v754_v31, %v2689_v44  ;;  %v2749_v57 = vmul.f32 %v754_v31, %v2691_v43  ;;  %v2752_v7 = vmul.f32 %v758_v15, %v2653_v59  ;;  %v2755_v60 = vmul.f32 %v758_v15, %v2667_v19 }
 0x1ad   :  { %v2759_v35 = vmul.f32 %v758_v15, %v2669_v53  ;;  %v2762_v33 = vmul.f32 %v758_v15, %v2680_v10  ;;  %v2765_v32 = vmul.f32 %v758_v15, %v2682_v36  ;;  %v2768_v31 = vmul.f32 %v758_v15, %v2684_v34 }
 0x1ae   :  { %v2771_v28 = vmul.f32 %v758_v15, %v2689_v44  ;;  %v2774_v52 = vmul.f32 %v758_v15, %v2691_v43  ;;  %v2777_v20 = vmul.f32 %v762_v42, %v2653_v59  ;;  %v2780_v17 = vmul.f32 %v762_v42, %v2667_v19 }
 0x1af   :  { %4636 = vst [vmem:[#allocation62_spill] sm:$0xff] %v2762_v33  ;;  %4637 = vst [vmem:[#allocation63_spill] sm:$0xff] %v2765_v32  ;;  %v2783_v13 = vmul.f32 %v762_v42, %v2669_v53  ;;  %v2786_v32 = vmul.f32 %v762_v42, %v2680_v10  ;;  %v2796_v15 = vmul.f32 %v762_v42, %v2689_v44 }
 0x1b0   :  { %4638 = vst [vmem:[#allocation64_spill] sm:$0xff] %v2768_v31  ;;  %4639 = vst [vmem:[#allocation65_spill] sm:$0xff] %v2771_v28  ;;  %v2789_v31 = vmul.f32 %v762_v42, %v2682_v36  ;;  %v2792_v28 = vmul.f32 %v762_v42, %v2684_v34  ;;  %v2826_v1 = vmul.f32 %v770_v24, %v2653_v59 }
 0x1b1   :  { %4640 = vst [vmem:[#allocation66_spill] sm:$0xff] %v2774_v52  ;;  %4641 = vst [vmem:[#allocation67_spill] sm:$0xff] %v2777_v20  ;;  %v2799_v20 = vmul.f32 %v762_v42, %v2691_v43  ;;  %v2814_v52 = vmul.f32 %v766_v37, %v2682_v36  ;;  %v2881_v12 = vmul.f32 %v2699_v41, %v2689_v44 }
 0x1b2   :  { %4642 = vst [vmem:[#allocation68_spill] sm:$0xff] %v2780_v17  ;;  %4643 = vst [vmem:[#allocation69_spill] sm:$0xff] %v2783_v13  ;;  %v2802_v17 = vmul.f32 %v766_v37, %v2653_v59  ;;  %v2805_v13 = vmul.f32 %v766_v37, %v2667_v19  ;;  %v2929_v26 = vadd.f32 %v2702_v40, %v2398_v47 }
 0x1b3   :  { %4644 = vst [vmem:[#allocation70_spill] sm:$0xff] %v2786_v32  ;;  %4645 = vst [vmem:[#allocation71_spill] sm:$0xff] %v2789_v31  ;;  %v1890_v32 = vpop.eup %1889  ;;  %v2808_v31 = vmul.f32 %v766_v37, %v2669_v53  ;;  %v2949_v47 = vadd.f32 %v2720_v16, %v2414_v39  ;;  %v2969_v39 = vadd.f32 %v2736_v55, %v2434_v11 }
 0x1b4   :  { %4646 = vst [vmem:[#allocation72_spill] sm:$0xff] %v2792_v28  ;;  %4647 = vst [vmem:[#allocation73_spill] sm:$0xff] %v2796_v15  ;;  %v2811_v28 = vmul.f32 %v766_v37, %v2680_v10  ;;  %v2817_v15 = vmul.f32 %v766_v37, %v2684_v34  ;;  %v1892_v42 = vpop.eup %1891  ;;  %v2997_v11 = vadd.f32 %v2759_v35, %v2458_v45  ;;  %v3019_v35 = vld [vmem:[#allocation6 + $0x2] sm:$0x1] }
 0x1b5   :  { %4648 = vst [vmem:[#allocation74_spill] sm:$0xff] %v2799_v20  ;;  %4649 = vst [vmem:[#allocation75_spill] sm:$0xff] %v2802_v17  ;;  %v499_v20 = vxor.u32 2147483648, %v1890_v32  ;;  %v2820_v17 = vmul.f32 %v766_v37, %v2689_v44 }
 0x1b6   :  { %4650 = vst [vmem:[#allocation76_spill] sm:$0xff] %v2805_v13  ;;  %4651 = vst [vmem:[#allocation77_spill] sm:$0xff] %v2808_v31  ;;  %v2823_v13 = vmul.f32 %v766_v37, %v2691_v43  ;;  %v496_v31 = vxor.u32 2147483648, %v1892_v42  ;;  %v2843_v37 = vmul.f32 %v770_v24, %v2684_v34 }
 0x1b7   :  { %4652 = vst [vmem:[#allocation78_spill] sm:$0xff] %v2811_v28  ;;  %4653 = vst [vmem:[#allocation79_spill] sm:$0xff] %v2814_v52  ;;  %v2829_v28 = vmul.f32 %v770_v24, %v2667_v19  ;;  %v2832_v52 = vmul.f32 %v770_v24, %v2669_v53  ;;  %v500_v33 = vsel %vm498_vm0, %v499_v20, %v1892_v42  ;;  %v4671_v55 = vld [vmem:[#allocation65_spill] sm:$0xff] }
 0x1b8   :  { %4654 = vst [vmem:[#allocation80_spill] sm:$0xff] %v2817_v15  ;;  %4655 = vst [vmem:[#allocation81_spill] sm:$0xff] %v2820_v17  ;;  %v2835_v15 = vmul.f32 %v770_v24, %v2680_v10  ;;  %v2840_v17 = vmul.f32 %v770_v24, %v2682_v36  ;;  %v2859_v20 = vmul.f32 %v2699_v41, %v2667_v19 }
 0x1b9   :  { %4656 = vst [vmem:[#allocation82_spill] sm:$0xff] %v2826_v1  ;;  %4657 = vst [vmem:[#allocation83_spill] sm:$0xff] %v2829_v28  ;;  %v2846_v1 = vmul.f32 %v770_v24, %v2689_v44  ;;  %v497_v28 = vsel %vm495_vm1, %v1890_v32, %v496_v31  ;;  %v2869_v32 = vmul.f32 %v2699_v41, %v2680_v10 }
 0x1ba   :  { %4658 = vst [vmem:[#allocation84_spill] sm:$0xff] %v2832_v52  ;;  %4659 = vst [vmem:[#allocation85_spill] sm:$0xff] %v2835_v15  ;;  %v2851_v52 = vmul.f32 %v770_v24, %v2691_v43  ;;  %v2855_v15 = vmul.f32 %v2699_v41, %v2653_v59  ;;  %v501_v42 = vsel %vm494_vm2, %v497_v28, %v500_v33 }
 0x1bb   :  { %4660 = vst [vmem:[#allocation86_spill] sm:$0xff] %v2846_v1  ;;  %v2865_v1 = vmul.f32 %v2699_v41, %v2669_v53  ;;  %4661 = vst [vmem:[#allocation87_spill] sm:$0xff] %v2869_v32  ;;  %v2873_v24 = vmul.f32 %v2699_v41, %v2682_v36  ;;  %v2877_v31 = vmul.f32 %v2699_v41, %v2684_v34 }
 0x1bc   :  { %v2885_v28 = vmul.f32 %v2699_v41, %v2691_v43  ;;  %v2889_v33 = vmul.f32 %v2708_v5, %v2653_v59  ;;  %v2893_v32 = vmul.f32 %v2708_v5, %v2667_v19  ;;  %v2905_v41 = vmul.f32 %v2708_v5, %v2682_v36 }
 0x1bd   :  { %4662 = vst [vmem:[#allocation88_spill] sm:$0xff] %v2873_v24  ;;  %4663 = vst [vmem:[#allocation89_spill] sm:$0xff] %v2877_v31  ;;  %v2897_v24 = vmul.f32 %v2708_v5, %v2669_v53  ;;  %v2901_v31 = vmul.f32 %v2708_v5, %v2680_v10  ;;  %v2909_v59 = vsel %vm491_vm3, nan, %v501_v42  ;;  %v2913_v19 = vmul.f32 %v2708_v5, %v2684_v34 }
 0x1be   :  { %4664 = vst [vmem:[#allocation90_spill] sm:$0xff] %v2909_v59  ;;  %v2917_v53 = vmul.f32 %v2708_v5, %v2689_v44  ;;  %v2921_v10 = vmul.f32 %v2708_v5, %v2691_v43  ;;  %v2925_v36 = vadd.f32 %v2696_v25, %v2394_v46  ;;  %v2933_v34 = vadd.f32 %v2705_v50, %v2401_v51  ;;  %v4669_v25 = vld [vmem:[#allocation64_spill] sm:$0xff]  ;;  %v4680_v50 = vld [vmem:[#allocation19_spill] sm:$0xff]  ;;  %v4711_v59 = vld [vmem:[#allocation78_spill] sm:$0xff] }
 0x1bf   :  { %v2937_v44 = vadd.f32 %v2711_v4, %v2405_v56  ;;  %v2941_v43 = vadd.f32 %v2714_v54, %v2408_v58  ;;  %v2945_v46 = vadd.f32 %v2717_v22, %v2411_v27  ;;  %v2953_v51 = vadd.f32 %v2723_v38, %v2421_v61  ;;  %v4678_v38 = vld [vmem:[#allocation67_spill] sm:$0xff]  ;;  %v4681_v5 = vld [vmem:[#allocation68_spill] sm:$0xff]  ;;  %v4684_v22 = vld [vmem:[#allocation69_spill] sm:$0xff] }
 0x1c0   :  { %v2957_v56 = vadd.f32 %v2726_v30, %v2424_v62  ;;  %v2961_v58 = vadd.f32 %v2729_v21, %v2428_v63  ;;  %v2965_v27 = vadd.f32 %v2733_v14, %v2431_v0  ;;  %v2973_v61 = vadd.f32 %v2739_v3, %v2437_v2  ;;  %v4665_v2 = vld [vmem:[#allocation62_spill] sm:$0xff]  ;;  %v4683_v54 = vld [vmem:[#allocation20_spill] sm:$0xff]  ;;  %v4686_v21 = vld [vmem:[#allocation21_spill] sm:$0xff] }
 0x1c1   :  { %v2977_v62 = vadd.f32 %v2742_v29, %v2443_v23  ;;  %v2981_v63 = vadd.f32 %v2746_v18, %v2446_v49  ;;  %v2985_v14 = vadd.f32 %v2749_v57, %v2449_v6  ;;  %v2989_v0 = vadd.f32 %v2752_v7, %v2452_v8  ;;  %v4666_v49 = vld [vmem:[#allocation14_spill] sm:$0xff]  ;;  %v4667_v18 = vld [vmem:[#allocation63_spill] sm:$0xff]  ;;  %v4670_v7 = vld [vmem:[#allocation16_spill] sm:$0xff] }
 0x1c2   :  { %v2993_v3 = vadd.f32 %v2755_v60, %v2455_v9  ;;  %v3001_v23 = vadd.f32 %v4665_v2, %v2463_v48  ;;  %v3005_v6 = vadd.f32 %v4667_v18, %v4666_v49  ;;  %v4668_v57 = vld [vmem:[#allocation15_spill] sm:$0xff]  ;;  %v3013_v9 = vadd.f32 %v4671_v55, %v4670_v7  ;;  %v4673_v60 = vld [vmem:[#allocation17_spill] sm:$0xff]  ;;  %v4674_v30 = vld [vmem:[#allocation66_spill] sm:$0xff]  ;;  %4676 = vst [vmem:[#allocation63_spill] sm:$0xff] %v3019_v35 }
 0x1c3   :  { %v3009_v8 = vadd.f32 %v4669_v25, %v4668_v57  ;;  %v3017_v45 = vadd.f32 %v4674_v30, %v4673_v60  ;;  %v4677_v48 = vld [vmem:[#allocation18_spill] sm:$0xff]  ;;  %v3027_v4 = vadd.f32 %v4681_v5, %v4680_v50  ;;  %v3031_v16 = vadd.f32 %v4684_v22, %v4683_v54  ;;  %v4690_v49 = vld [vmem:[#allocation71_spill] sm:$0xff]  ;;  %v4693_v25 = vld [vmem:[#allocation72_spill] sm:$0xff] }
 0x1c4   :  { %4672 = vst [vmem:[#allocation62_spill] sm:$0xff] %v3013_v9  ;;  %v3023_v40 = vadd.f32 %v4678_v38, %v4677_v48  ;;  %v4687_v29 = vld [vmem:[#allocation70_spill] sm:$0xff]  ;;  %v4692_v57 = vld [vmem:[#allocation23_spill] sm:$0xff]  ;;  %v4695_v55 = vld [vmem:[#allocation24_spill] sm:$0xff] }
 0x1c5   :  { %4675 = vst [vmem:[#allocation14_spill] sm:$0xff] %v3017_v45  ;;  %4682 = vst [vmem:[#allocation64_spill] sm:$0xff] %v3027_v4  ;;  %v3035_v42 = vadd.f32 %v4687_v29, %v4686_v21  ;;  %v4689_v2 = vld [vmem:[#allocation22_spill] sm:$0xff]  ;;  %v3043_v7 = vadd.f32 %v4693_v25, %v4692_v57  ;;  %v4696_v60 = vld [vmem:[#allocation73_spill] sm:$0xff] }
 0x1c6   :  { %4679 = vst [vmem:[#allocation15_spill] sm:$0xff] %v3023_v40  ;;  %4685 = vst [vmem:[#allocation16_spill] sm:$0xff] %v3031_v16  ;;  %v3039_v18 = vadd.f32 %v4690_v49, %v4689_v2  ;;  %v3047_v30 = vadd.f32 %v4696_v60, %v4695_v55  ;;  %v4698_v48 = vld [vmem:[#allocation25_spill] sm:$0xff]  ;;  %v4699_v38 = vld [vmem:[#allocation74_spill] sm:$0xff] }
 0x1c7   :  { %4688 = vst [vmem:[#allocation65_spill] sm:$0xff] %v3035_v42  ;;  %4694 = vst [vmem:[#allocation66_spill] sm:$0xff] %v3043_v7  ;;  %v3051_v50 = vadd.f32 %v4699_v38, %v4698_v48  ;;  %v4701_v5 = vld [vmem:[#allocation26_spill] sm:$0xff]  ;;  %v4702_v54 = vld [vmem:[#allocation75_spill] sm:$0xff] }
 0x1c8   :  { %4691 = vst [vmem:[#allocation17_spill] sm:$0xff] %v3039_v18  ;;  %4697 = vst [vmem:[#allocation18_spill] sm:$0xff] %v3047_v30  ;;  %v3055_v22 = vadd.f32 %v4702_v54, %v4701_v5  ;;  %v4704_v21 = vld [vmem:[#allocation27_spill] sm:$0xff]  ;;  %v4705_v29 = vld [vmem:[#allocation76_spill] sm:$0xff] }
 0x1c9   :  { %4700 = vst [vmem:[#allocation67_spill] sm:$0xff] %v3051_v50  ;;  %v3059_v2 = vadd.f32 %v4705_v29, %v4704_v21  ;;  %v4707_v49 = vld [vmem:[#allocation28_spill] sm:$0xff]  ;;  %v4708_v35 = vld [vmem:[#allocation77_spill] sm:$0xff]  ;;  %v4713_v60 = vld [vmem:[#allocation30_spill] sm:$0xff] }
 0x1ca   :  { %4703 = vst [vmem:[#allocation19_spill] sm:$0xff] %v3055_v22  ;;  %v3063_v57 = vadd.f32 %v4708_v35, %v4707_v49  ;;  %v4710_v25 = vld [vmem:[#allocation29_spill] sm:$0xff]  ;;  %v4714_v30 = vld [vmem:[#allocation79_spill] sm:$0xff]  ;;  %v4717_v50 = vld [vmem:[#allocation80_spill] sm:$0xff] }
 0x1cb   :  { %4706 = vst [vmem:[#allocation68_spill] sm:$0xff] %v3059_v2  ;;  %v3067_v55 = vadd.f32 %v4711_v59, %v4710_v25  ;;  %v3071_v48 = vadd.f32 %v4714_v30, %v4713_v60  ;;  %v4716_v38 = vld [vmem:[#allocation31_spill] sm:$0xff]  ;;  %v4719_v54 = vld [vmem:[#allocation32_spill] sm:$0xff]  ;;  %v4720_v22 = vld [vmem:[#allocation81_spill] sm:$0xff] }
 0x1cc   :  { %4709 = vst [vmem:[#allocation20_spill] sm:$0xff] %v3063_v57  ;;  %v3075_v5 = vadd.f32 %v4717_v50, %v4716_v38  ;;  %v3079_v21 = vadd.f32 %v4720_v22, %v4719_v54  ;;  %v4722_v29 = vld [vmem:[#allocation33_spill] sm:$0xff]  ;;  %v4724_v49 = vld [vmem:[#allocation34_spill] sm:$0xff]  ;;  %v4727_v25 = vld [vmem:[#allocation35_spill] sm:$0xff] }
 0x1cd   :  { %4712 = vst [vmem:[#allocation69_spill] sm:$0xff] %v3067_v55  ;;  %4715 = vst [vmem:[#allocation21_spill] sm:$0xff] %v3071_v48  ;;  %v3083_v35 = vadd.f32 %v2823_v13, %v4722_v29  ;;  %v4725_v57 = vld [vmem:[#allocation82_spill] sm:$0xff]  ;;  %v4728_v55 = vld [vmem:[#allocation83_spill] sm:$0xff] }
 0x1ce   :  { %4718 = vst [vmem:[#allocation70_spill] sm:$0xff] %v3075_v5  ;;  %4721 = vst [vmem:[#allocation22_spill] sm:$0xff] %v3079_v21  ;;  %v3087_v59 = vadd.f32 %v4725_v57, %v4724_v49  ;;  %v3091_v30 = vadd.f32 %v4728_v55, %v4727_v25  ;;  %v4730_v60 = vld [vmem:[#allocation36_spill] sm:$0xff]  ;;  %v4733_v38 = vld [vmem:[#allocation37_spill] sm:$0xff] }
 0x1cf   :  { %4723 = vst [vmem:[#allocation71_spill] sm:$0xff] %v3083_v35  ;;  %v4731_v48 = vld [vmem:[#allocation84_spill] sm:$0xff]  ;;  %v4734_v5 = vld [vmem:[#allocation85_spill] sm:$0xff]  ;;  %v4736_v54 = vld [vmem:[#allocation38_spill] sm:$0xff] }
 0x1d0   :  { %4726 = vst [vmem:[#allocation23_spill] sm:$0xff] %v3087_v59  ;;  %4729 = vst [vmem:[#allocation72_spill] sm:$0xff] %v3091_v30  ;;  %v3095_v50 = vadd.f32 %v4731_v48, %v4730_v60  ;;  %v3099_v22 = vadd.f32 %v4734_v5, %v4733_v38  ;;  %v3103_v13 = vadd.f32 %v2840_v17, %v4736_v54  ;;  %v4738_v29 = vld [vmem:[#allocation39_spill] sm:$0xff]  ;;  %v4740_v49 = vld [vmem:[#allocation40_spill] sm:$0xff] }
 0x1d1   :  { %v3107_v57 = vadd.f32 %v2843_v37, %v4738_v29  ;;  %v4741_v59 = vld [vmem:[#allocation86_spill] sm:$0xff]  ;;  %v4743_v25 = vld [vmem:[#allocation41_spill] sm:$0xff]  ;;  %v4747_v38 = vld [vmem:[#allocation43_spill] sm:$0xff] }
 0x1d2   :  { %4732 = vst [vmem:[#allocation24_spill] sm:$0xff] %v3095_v50  ;;  %4735 = vst [vmem:[#allocation73_spill] sm:$0xff] %v3099_v22  ;;  %v3111_v55 = vadd.f32 %v4741_v59, %v4740_v49  ;;  %v3115_v48 = vadd.f32 %v2851_v52, %v4743_v25  ;;  %v4745_v60 = vld [vmem:[#allocation42_spill] sm:$0xff]  ;;  %v3123_v17 = vadd.f32 %v2859_v20, %v4747_v38  ;;  %v4749_v54 = vld [vmem:[#allocation44_spill] sm:$0xff] }
 0x1d3   :  { %4737 = vst [vmem:[#allocation25_spill] sm:$0xff] %v3103_v13  ;;  %4739 = vst [vmem:[#allocation74_spill] sm:$0xff] %v3107_v57  ;;  %v3119_v5 = vadd.f32 %v2855_v15, %v4745_v60  ;;  %v3127_v37 = vadd.f32 %v2865_v1, %v4749_v54  ;;  %v4751_v29 = vld [vmem:[#allocation45_spill] sm:$0xff]  ;;  %v4752_v57 = vld [vmem:[#allocation87_spill] sm:$0xff] }
 0x1d4   :  { %4742 = vst [vmem:[#allocation26_spill] sm:$0xff] %v3111_v55  ;;  %4744 = vst [vmem:[#allocation75_spill] sm:$0xff] %v3115_v48  ;;  %v3131_v59 = vadd.f32 %v4752_v57, %v4751_v29  ;;  %v4754_v49 = vld [vmem:[#allocation46_spill] sm:$0xff]  ;;  %v4755_v55 = vld [vmem:[#allocation88_spill] sm:$0xff] }
 0x1d5   :  { %4746 = vst [vmem:[#allocation27_spill] sm:$0xff] %v3119_v5  ;;  %4748 = vst [vmem:[#allocation76_spill] sm:$0xff] %v3123_v17  ;;  %v3135_v52 = vadd.f32 %v4755_v55, %v4754_v49  ;;  %v4757_v25 = vld [vmem:[#allocation47_spill] sm:$0xff]  ;;  %v4758_v48 = vld [vmem:[#allocation89_spill] sm:$0xff] }
 0x1d6   :  { %4750 = vst [vmem:[#allocation28_spill] sm:$0xff] %v3127_v37  ;;  %4753 = vst [vmem:[#allocation77_spill] sm:$0xff] %v3131_v59  ;;  %v3139_v15 = vadd.f32 %v4758_v48, %v4757_v25  ;;  %v4760_v60 = vld [vmem:[#allocation12_spill] sm:$0xff]  ;;  %v4763_v1 = vld [vmem:[#allocation55_spill] sm:$0xff] }
 0x1d7   :  { %4756 = vst [vmem:[#allocation29_spill] sm:$0xff] %v3135_v52  ;;  %v4761_v5 = vld [vmem:[#allocation52_spill] sm:$0xff]  ;;  %v4764_v54 = vcombine.high %v4763_v1, %v4763_v1  ;;  %v4767_v55 = vld [vmem:[#allocation49_spill] sm:$0xff]  ;;  %v3189_v13 = vld [vmem:[#allocation6 + $0x120] sm:$0xff] }
 0x1d8   :  { %4759 = vst [vmem:[#allocation78_spill] sm:$0xff] %v3139_v15  ;;  %v4762_v20 = vcombine.high %v4761_v5, %v4761_v5  ;;  %v4765_v57 = vld [vmem:[#allocation48_spill] sm:$0xff]  ;;  %v3155_v49 = vadd.f32 %v2885_v28, %v4767_v55  ;;  %v4770_v15 = vld [vmem:[#allocation61_spill] sm:$0xff]  ;;  %v4774_v55 = vld [vmem:[#allocation51_spill] sm:$0xff] }
 0x1d9   :  { %v960_v37 = vrot.slane %v4764_v54, %v4760_v60  ;;  %v3151_v29 = vadd.f32 %v2881_v12, %v4765_v57  ;;  %v4769_v48 = vld [vmem:[#allocation60_spill] sm:$0xff]  ;;  %v962_v5 = vcombine.high %v4770_v15, %v4770_v15  ;;  %v3167_v57 = vld [vmem:[#allocation6 + $0x108] sm:$0xff]  ;;  %v3171_v28 = vld [vmem:[#allocation6 + $0x118] sm:$0xff] }
 0x1da   :  { %v953_v38 = vrot.slane %v4762_v20, %v4760_v60  ;;  %4768 = vst [vmem:[#allocation79_spill] sm:$0xff] %v3155_v49  ;;  %v961_v25 = vcombine.high %v4769_v48, %v4769_v48  ;;  %v4771_v20 = vld [vmem:[#allocation50_spill] sm:$0xff]  ;;  %v4773_v60 = vld [vmem:[#allocation13_spill] sm:$0xff]  ;;  %v3175_v49 = vadd.f32 %v2893_v32, %v4774_v55  ;;  %v3191_v22 = vld [vmem:[#allocation6 + $0x128] sm:$0xff] }
 0x1db   :  { %4766 = vst [vmem:[#allocation30_spill] sm:$0xff] %v3151_v29  ;;  %v3163_v52 = vadd.f32 %v2889_v33, %v4771_v20  ;;  %v964_v54 = vcombine.high %v960_v37, %v960_v37  ;;  %v968_v12 = vrot.slane %v4769_v48, %v4773_v60  ;;  %v3169_v29 = vld [vmem:[#allocation6 + $0x110] sm:$0xff]  ;;  %v4776_v59 = vld [vmem:[#allocation53_spill] sm:$0xff]  ;;  %v4778_v33 = vld [vmem:[#allocation54_spill] sm:$0xff] }
 0x1dc   :  { %v963_v1 = vcombine.high %v953_v38, %v953_v38  ;;  %4775 = vst [vmem:[#allocation80_spill] sm:$0xff] %v3175_v49  ;;  %v3179_v17 = vadd.f32 %v2897_v24, %v4776_v59  ;;  %v3183_v20 = vadd.f32 %v2901_v31, %v4778_v33  ;;  %v3193_v50 = vld [vmem:[#allocation6 + $0x130] sm:$0xff]  ;;  %v4782_v32 = vld [vmem:[#allocation57_spill] sm:$0xff]  ;;  %v4784_v24 = vld [vmem:[#allocation58_spill] sm:$0xff] }
 0x1dd   :  { %4772 = vst [vmem:[#allocation31_spill] sm:$0xff] %v3163_v52  ;;  %v4780_v52 = vld [vmem:[#allocation56_spill] sm:$0xff]  ;;  %v3197_v55 = vadd.f32 %v2913_v19, %v4782_v32  ;;  %v3201_v59 = vadd.f32 %v2917_v53, %v4784_v24  ;;  %v4786_v31 = vld [vmem:[#allocation59_spill] sm:$0xff]  ;;  %v984_v19 = vrot.slane %v4770_v15, %v4773_v60  ;;  %v988_v32 = vrot.slane %v960_v37, %v4773_v60 }
 0x1de   :  { %4777 = vst [vmem:[#allocation32_spill] sm:$0xff] %v3179_v17  ;;  %4779 = vst [vmem:[#allocation81_spill] sm:$0xff] %v3183_v20  ;;  %v3187_v48 = vadd.f32 %v2905_v41, %v4780_v52  ;;  %v3205_v33 = vadd.f32 %v2921_v10, %v4786_v31  ;;  %v972_v41 = vrot.slane %v953_v38, %v4773_v60  ;;  %v3208_v52 = vld [vmem:[#allocation6 + $0x138] sm:$0xff] }
 0x1df   :  { %4783 = vst [vmem:[#allocation34_spill] sm:$0xff] %v3197_v55  ;;  %4785 = vst [vmem:[#allocation82_spill] sm:$0xff] %v3201_v59  ;;  %v976_v20 = vrot.slane %v961_v25, %v4773_v60  ;;  %v992_v53 = vrot.slane %v962_v5, %v4773_v60  ;;  %v980_v24 = vrot.slane %v963_v1, %v4773_v60 }
 0x1e0   :  { %4781 = vst [vmem:[#allocation33_spill] sm:$0xff] %v3187_v48  ;;  %4787 = vst [vmem:[#allocation35_spill] sm:$0xff] %v3205_v33  ;;  %v3210_v48 = vld [vmem:[#allocation6 + $0x140] sm:$0xff]  ;;  %v3219_v10 = vrot.slane %v964_v54, %v4773_v60  ;;  %v3222_v38 = vmul.f32 %v968_v12, %v3167_v57  ;;  %v3225_v31 = vmul.f32 %v968_v12, %v3169_v29 }
 0x1e1   :  { %v3228_v25 = vmul.f32 %v968_v12, %v3171_v28  ;;  %v3231_v15 = vmul.f32 %v968_v12, %v3189_v13  ;;  %v3234_v37 = vmul.f32 %v968_v12, %v3191_v22  ;;  %v3237_v5 = vmul.f32 %v968_v12, %v3193_v50 }
 0x1e2   :  { %v3240_v1 = vmul.f32 %v968_v12, %v3208_v52  ;;  %v3243_v54 = vmul.f32 %v968_v12, %v3210_v48  ;;  %v3246_v60 = vmul.f32 %v972_v41, %v3167_v57  ;;  %v3249_v33 = vmul.f32 %v972_v41, %v3169_v29 }
 0x1e3   :  { %v3252_v59 = vmul.f32 %v972_v41, %v3171_v28  ;;  %v3255_v55 = vmul.f32 %v972_v41, %v3189_v13  ;;  %v3258_v17 = vmul.f32 %v972_v41, %v3191_v22  ;;  %v3261_v49 = vmul.f32 %v972_v41, %v3193_v50 }
 0x1e4   :  { %v3264_v12 = vmul.f32 %v972_v41, %v3208_v52  ;;  %v3267_v30 = vmul.f32 %v972_v41, %v3210_v48  ;;  %v3270_v35 = vmul.f32 %v976_v20, %v3167_v57  ;;  %v3273_v21 = vmul.f32 %v976_v20, %v3169_v29 }
 0x1e5   :  { %v3276_v2 = vmul.f32 %v976_v20, %v3171_v28  ;;  %v3279_v7 = vmul.f32 %v976_v20, %v3189_v13  ;;  %v3282_v18 = vmul.f32 %v976_v20, %v3191_v22  ;;  %v3285_v42 = vmul.f32 %v976_v20, %v3193_v50 }
 0x1e6   :  { %v3288_v41 = vmul.f32 %v976_v20, %v3208_v52  ;;  %v3291_v16 = vmul.f32 %v976_v20, %v3210_v48  ;;  %v3294_v4 = vmul.f32 %v980_v24, %v3167_v57  ;;  %v3297_v40 = vmul.f32 %v980_v24, %v3169_v29 }
 0x1e7   :  { %4788 = vst [vmem:[#allocation83_spill] sm:$0xff] %v3285_v42  ;;  %v3300_v45 = vmul.f32 %v980_v24, %v3171_v28  ;;  %v3303_v9 = vmul.f32 %v980_v24, %v3189_v13  ;;  %v3306_v42 = vmul.f32 %v980_v24, %v3191_v22  ;;  %v3312_v20 = vmul.f32 %v980_v24, %v3208_v52 }
 0x1e8   :  { %4789 = vst [vmem:[#allocation36_spill] sm:$0xff] %v3288_v41  ;;  %4790 = vst [vmem:[#allocation84_spill] sm:$0xff] %v3294_v4  ;;  %v3309_v41 = vmul.f32 %v980_v24, %v3193_v50  ;;  %v3315_v4 = vmul.f32 %v980_v24, %v3210_v48  ;;  %v3336_v24 = vmul.f32 %v984_v19, %v3208_v52 }
 0x1e9   :  { %4791 = vst [vmem:[#allocation37_spill] sm:$0xff] %v3297_v40  ;;  %4792 = vst [vmem:[#allocation85_spill] sm:$0xff] %v3300_v45  ;;  %v3318_v40 = vmul.f32 %v984_v19, %v3167_v57  ;;  %v3321_v45 = vmul.f32 %v984_v19, %v3169_v29 }
 0x1ea   :  { %4793 = vst [vmem:[#allocation38_spill] sm:$0xff] %v3303_v9  ;;  %4794 = vst [vmem:[#allocation39_spill] sm:$0xff] %v3306_v42  ;;  %v3324_v9 = vmul.f32 %v984_v19, %v3171_v28  ;;  %v3327_v42 = vmul.f32 %v984_v19, %v3189_v13 }
 0x1eb   :  { %4795 = vst [vmem:[#allocation40_spill] sm:$0xff] %v3309_v41  ;;  %4796 = vst [vmem:[#allocation86_spill] sm:$0xff] %v3312_v20  ;;  %v3330_v41 = vmul.f32 %v984_v19, %v3191_v22  ;;  %v3333_v20 = vmul.f32 %v984_v19, %v3193_v50 }
 0x1ec   :  { %4797 = vst [vmem:[#allocation41_spill] sm:$0xff] %v3318_v40  ;;  %4798 = vst [vmem:[#allocation42_spill] sm:$0xff] %v3321_v45  ;;  %v3339_v40 = vmul.f32 %v984_v19, %v3210_v48  ;;  %v3342_v45 = vmul.f32 %v988_v32, %v3167_v57  ;;  %v3360_v19 = vmul.f32 %v988_v32, %v3208_v52 }
 0x1ed   :  { %4799 = vst [vmem:[#allocation43_spill] sm:$0xff] %v3324_v9  ;;  %4800 = vst [vmem:[#allocation44_spill] sm:$0xff] %v3327_v42  ;;  %v3345_v9 = vmul.f32 %v988_v32, %v3169_v29  ;;  %v3348_v42 = vmul.f32 %v988_v32, %v3171_v28 }
 0x1ee   :  { %4801 = vst [vmem:[#allocation45_spill] sm:$0xff] %v3330_v41  ;;  %4802 = vst [vmem:[#allocation87_spill] sm:$0xff] %v3333_v20  ;;  %v3351_v41 = vmul.f32 %v988_v32, %v3189_v13  ;;  %v3354_v20 = vmul.f32 %v988_v32, %v3191_v22 }
 0x1ef   :  { %4803 = vst [vmem:[#allocation46_spill] sm:$0xff] %v3336_v24  ;;  %4804 = vst [vmem:[#allocation88_spill] sm:$0xff] %v3342_v45  ;;  %v3357_v24 = vmul.f32 %v988_v32, %v3193_v50  ;;  %v3363_v45 = vmul.f32 %v988_v32, %v3210_v48  ;;  %v3384_v32 = vmul.f32 %v992_v53, %v3208_v52 }
 0x1f0   :  { %4805 = vst [vmem:[#allocation47_spill] sm:$0xff] %v3345_v9  ;;  %4806 = vst [vmem:[#allocation89_spill] sm:$0xff] %v3348_v42  ;;  %v3366_v9 = vmul.f32 %v992_v53, %v3167_v57  ;;  %v3369_v42 = vmul.f32 %v992_v53, %v3169_v29 }
 0x1f1   :  { %4807 = vst [vmem:[#allocation52_spill] sm:$0xff] %v3351_v41  ;;  %4808 = vst [vmem:[#allocation55_spill] sm:$0xff] %v3354_v20  ;;  %v3372_v41 = vmul.f32 %v992_v53, %v3171_v28  ;;  %v3375_v20 = vmul.f32 %v992_v53, %v3189_v13 }
 0x1f2   :  { %4809 = vst [vmem:[#allocation48_spill] sm:$0xff] %v3357_v24  ;;  %4810 = vst [vmem:[#allocation49_spill] sm:$0xff] %v3360_v19  ;;  %v3378_v24 = vmul.f32 %v992_v53, %v3191_v22  ;;  %v3381_v19 = vmul.f32 %v992_v53, %v3193_v50 }
 0x1f3   :  { %4811 = vst [vmem:[#allocation60_spill] sm:$0xff] %v3366_v9  ;;  %4812 = vst [vmem:[#allocation61_spill] sm:$0xff] %v3369_v42  ;;  %v3387_v9 = vmul.f32 %v992_v53, %v3210_v48  ;;  %v3391_v42 = vmul.f32 %v3219_v10, %v3167_v57  ;;  %v3407_v53 = vmul.f32 %v3219_v10, %v3191_v22 }
 0x1f4   :  { %4813 = vst [vmem:[#allocation50_spill] sm:$0xff] %v3372_v41  ;;  %4814 = vst [vmem:[#allocation51_spill] sm:$0xff] %v3378_v24  ;;  %v3395_v41 = vmul.f32 %v3219_v10, %v3169_v29  ;;  %v3399_v24 = vmul.f32 %v3219_v10, %v3171_v28  ;;  %v3411_v57 = vmul.f32 %v3219_v10, %v3193_v50 }
 0x1f5   :  { %4815 = vst [vmem:[#allocation53_spill] sm:$0xff] %v3381_v19  ;;  %v3403_v19 = vmul.f32 %v3219_v10, %v3189_v13  ;;  %v3415_v29 = vmul.f32 %v3219_v10, %v3208_v52  ;;  %v3419_v28 = vmul.f32 %v3219_v10, %v3210_v48  ;;  %v3423_v13 = vadd.f32 %v3222_v38, %v2925_v36  ;;  %v4834_v38 = vld [vmem:[#allocation17_spill] sm:$0xff] }
 0x1f6   :  { %v3427_v22 = vadd.f32 %v3225_v31, %v2929_v26  ;;  %v3431_v50 = vadd.f32 %v3228_v25, %v2933_v34  ;;  %v3435_v52 = vadd.f32 %v3231_v15, %v2937_v44  ;;  %v3439_v48 = vadd.f32 %v3234_v37, %v2941_v43  ;;  %v4835_v31 = vld [vmem:[#allocation39_spill] sm:$0xff]  ;;  %v4837_v25 = vld [vmem:[#allocation66_spill] sm:$0xff]  ;;  %v4838_v15 = vld [vmem:[#allocation40_spill] sm:$0xff] }
 0x1f7   :  { %v3443_v36 = vadd.f32 %v3237_v5, %v2945_v46  ;;  %v3447_v26 = vadd.f32 %v3240_v1, %v2949_v47  ;;  %v3451_v34 = vadd.f32 %v3243_v54, %v2953_v51  ;;  %v3455_v44 = vadd.f32 %v3246_v60, %v2957_v56  ;;  %v4823_v60 = vld [vmem:[#allocation84_spill] sm:$0xff]  ;;  %v4840_v5 = vld [vmem:[#allocation18_spill] sm:$0xff] }
 0x1f8   :  { %v3459_v43 = vadd.f32 %v3249_v33, %v2961_v58  ;;  %v3463_v46 = vadd.f32 %v3252_v59, %v2965_v27  ;;  %v3467_v47 = vadd.f32 %v3255_v55, %v2969_v39  ;;  %v3471_v51 = vadd.f32 %v3258_v17, %v2973_v61  ;;  %v4818_v17 = vld [vmem:[#allocation36_spill] sm:$0xff]  ;;  %v4829_v55 = vld [vmem:[#allocation85_spill] sm:$0xff]  ;;  %v4832_v33 = vld [vmem:[#allocation38_spill] sm:$0xff] }
 0x1f9   :  { %v3475_v56 = vadd.f32 %v3261_v49, %v2977_v62  ;;  %v3479_v58 = vadd.f32 %v3264_v12, %v2981_v63  ;;  %v3483_v27 = vadd.f32 %v3267_v30, %v2985_v14  ;;  %v3487_v39 = vadd.f32 %v3270_v35, %v2989_v0  ;;  %v4816_v30 = vld [vmem:[#allocation83_spill] sm:$0xff]  ;;  %v4817_v35 = vld [vmem:[#allocation62_spill] sm:$0xff]  ;;  %v4826_v49 = vld [vmem:[#allocation37_spill] sm:$0xff] }
 0x1fa   :  { %v3491_v61 = vadd.f32 %v3273_v21, %v2993_v3  ;;  %v3495_v62 = vadd.f32 %v3276_v2, %v2997_v11  ;;  %v3499_v63 = vadd.f32 %v3279_v7, %v3001_v23  ;;  %v3503_v14 = vadd.f32 %v3282_v18, %v3005_v6  ;;  %v4820_v21 = vld [vmem:[#allocation14_spill] sm:$0xff]  ;;  %v4822_v2 = vld [vmem:[#allocation15_spill] sm:$0xff]  ;;  %v4825_v7 = vld [vmem:[#allocation64_spill] sm:$0xff] }
 0x1fb   :  { %v3507_v0 = vadd.f32 %v4816_v30, %v3009_v8  ;;  %v3511_v3 = vadd.f32 %v4818_v17, %v4817_v35  ;;  %v3515_v11 = vadd.f32 %v3291_v16, %v4820_v21  ;;  %v3519_v23 = vadd.f32 %v4823_v60, %v4822_v2  ;;  %v4828_v18 = vld [vmem:[#allocation16_spill] sm:$0xff]  ;;  %v4831_v59 = vld [vmem:[#allocation65_spill] sm:$0xff]  ;;  %v4841_v1 = vld [vmem:[#allocation86_spill] sm:$0xff] }
 0x1fc   :  { %v3523_v6 = vadd.f32 %v4826_v49, %v4825_v7  ;;  %v3527_v8 = vadd.f32 %v4829_v55, %v4828_v18  ;;  %v3531_v10 = vadd.f32 %v4832_v33, %v4831_v59  ;;  %v3535_v16 = vadd.f32 %v4835_v31, %v4834_v38  ;;  %v4843_v12 = vld [vmem:[#allocation67_spill] sm:$0xff]  ;;  %v4846_v17 = vld [vmem:[#allocation41_spill] sm:$0xff]  ;;  %v4848_v2 = vld [vmem:[#allocation68_spill] sm:$0xff] }
 0x1fd   :  { %4819 = vst [vmem:[#allocation54_spill] sm:$0xff] %v3511_v3  ;;  %4821 = vst [vmem:[#allocation56_spill] sm:$0xff] %v3515_v11  ;;  %v3539_v37 = vadd.f32 %v4838_v15, %v4837_v25  ;;  %v3543_v54 = vadd.f32 %v4841_v1, %v4840_v5  ;;  %v3547_v30 = vadd.f32 %v3315_v4, %v4843_v12  ;;  %v4845_v35 = vld [vmem:[#allocation19_spill] sm:$0xff]  ;;  %v4849_v60 = vld [vmem:[#allocation42_spill] sm:$0xff] }
 0x1fe   :  { %4824 = vst [vmem:[#allocation57_spill] sm:$0xff] %v3519_v23  ;;  %4827 = vst [vmem:[#allocation58_spill] sm:$0xff] %v3523_v6  ;;  %v3551_v21 = vadd.f32 %v4846_v17, %v4845_v35  ;;  %v3555_v7 = vadd.f32 %v4849_v60, %v4848_v2  ;;  %v4851_v49 = vld [vmem:[#allocation20_spill] sm:$0xff]  ;;  %v4852_v18 = vld [vmem:[#allocation43_spill] sm:$0xff] }
 0x1ff   :  { %4830 = vst [vmem:[#allocation59_spill] sm:$0xff] %v3527_v8  ;;  %4833 = vst [vmem:[#allocation83_spill] sm:$0xff] %v3531_v10  ;;  %v3559_v55 = vadd.f32 %v4852_v18, %v4851_v49  ;;  %v4854_v59 = vld [vmem:[#allocation69_spill] sm:$0xff]  ;;  %v4855_v33 = vld [vmem:[#allocation44_spill] sm:$0xff] }
 0x200   :  { %4836 = vst [vmem:[#allocation62_spill] sm:$0xff] %v3535_v16  ;;  %4839 = vst [vmem:[#allocation36_spill] sm:$0xff] %v3539_v37  ;;  %v3563_v38 = vadd.f32 %v4855_v33, %v4854_v59  ;;  %v4857_v31 = vld [vmem:[#allocation21_spill] sm:$0xff]  ;;  %v4860_v15 = vld [vmem:[#allocation70_spill] sm:$0xff] }
 0x201   :  { %4842 = vst [vmem:[#allocation14_spill] sm:$0xff] %v3543_v54  ;;  %4844 = vst [vmem:[#allocation15_spill] sm:$0xff] %v3547_v30  ;;  %v4858_v25 = vld [vmem:[#allocation45_spill] sm:$0xff]  ;;  %v4861_v5 = vld [vmem:[#allocation87_spill] sm:$0xff] }
 0x202   :  { %4847 = vst [vmem:[#allocation84_spill] sm:$0xff] %v3551_v21  ;;  %4850 = vst [vmem:[#allocation64_spill] sm:$0xff] %v3555_v7  ;;  %v3567_v4 = vadd.f32 %v4858_v25, %v4857_v31  ;;  %v3571_v1 = vadd.f32 %v4861_v5, %v4860_v15  ;;  %v4863_v12 = vld [vmem:[#allocation22_spill] sm:$0xff]  ;;  %v4866_v2 = vld [vmem:[#allocation71_spill] sm:$0xff] }
 0x203   :  { %4853 = vst [vmem:[#allocation37_spill] sm:$0xff] %v3559_v55  ;;  %4856 = vst [vmem:[#allocation16_spill] sm:$0xff] %v3563_v38  ;;  %v4864_v35 = vld [vmem:[#allocation46_spill] sm:$0xff]  ;;  %v3579_v60 = vadd.f32 %v3339_v40, %v4866_v2  ;;  %v4868_v49 = vld [vmem:[#allocation23_spill] sm:$0xff] }
 0x204   :  { %4859 = vst [vmem:[#allocation85_spill] sm:$0xff] %v3567_v4  ;;  %4862 = vst [vmem:[#allocation65_spill] sm:$0xff] %v3571_v1  ;;  %v3575_v17 = vadd.f32 %v4864_v35, %v4863_v12  ;;  %v4869_v18 = vld [vmem:[#allocation88_spill] sm:$0xff]  ;;  %v4872_v38 = vld [vmem:[#allocation47_spill] sm:$0xff] }
 0x205   :  { %4867 = vst [vmem:[#allocation17_spill] sm:$0xff] %v3579_v60  ;;  %v3583_v59 = vadd.f32 %v4869_v18, %v4868_v49  ;;  %v4871_v33 = vld [vmem:[#allocation72_spill] sm:$0xff]  ;;  %v1543_v25 = vld [vmem:[#allocation6 + $0x8] sm:$0xff]  ;;  %v4875_v5 = vld [vmem:[#allocation89_spill] sm:$0xff] }
 0x206   :  { %4865 = vst [vmem:[#allocation38_spill] sm:$0xff] %v3575_v17  ;;  %v3587_v31 = vadd.f32 %v4872_v38, %v4871_v33  ;;  %v1544_v4 = vld [vmem:[#allocation6 + $0x10] sm:$0xff]  ;;  %v4877_v12 = vld [vmem:[#allocation73_spill] sm:$0xff]  ;;  %v4881_v2 = vld [vmem:[#allocation55_spill] sm:$0xff] }
 0x207   :  { %4870 = vst [vmem:[#allocation39_spill] sm:$0xff] %v3583_v59  ;;  %v4874_v15 = vld [vmem:[#allocation24_spill] sm:$0xff]  ;;  %v4880_v40 = vld [vmem:[#allocation25_spill] sm:$0xff]  ;;  %v4883_v49 = vld [vmem:[#allocation74_spill] sm:$0xff] }
 0x208   :  { %4873 = vst [vmem:[#allocation66_spill] sm:$0xff] %v3587_v31  ;;  %v3591_v1 = vadd.f32 %v4875_v5, %v4874_v15  ;;  %v4878_v35 = vld [vmem:[#allocation52_spill] sm:$0xff]  ;;  %v3599_v60 = vadd.f32 %v4881_v2, %v4880_v40  ;;  %v1545_v38 = vld [vmem:[#allocation6 + $0x18] sm:$0xff]  ;;  %v1546_v33 = vld [vmem:[#allocation6 + $0x20] sm:$0xff] }
 0x209   :  { %v3595_v17 = vadd.f32 %v4878_v35, %v4877_v12  ;;  %v4884_v18 = vld [vmem:[#allocation48_spill] sm:$0xff]  ;;  %v1547_v31 = vld [vmem:[#allocation6 + $0x28] sm:$0xff]  ;;  %v4886_v55 = vld [vmem:[#allocation26_spill] sm:$0xff] }
 0x20a   :  { %4876 = vst [vmem:[#allocation40_spill] sm:$0xff] %v3591_v1  ;;  %4882 = vst [vmem:[#allocation86_spill] sm:$0xff] %v3599_v60  ;;  %v3603_v59 = vadd.f32 %v4884_v18, %v4883_v49  ;;  %v4887_v7 = vld [vmem:[#allocation49_spill] sm:$0xff]  ;;  %v4889_v15 = vld [vmem:[#allocation75_spill] sm:$0xff] }
 0x20b   :  { %4879 = vst [vmem:[#allocation18_spill] sm:$0xff] %v3595_v17  ;;  %v3607_v21 = vadd.f32 %v4887_v7, %v4886_v55  ;;  %v3611_v5 = vadd.f32 %v3363_v45, %v4889_v15  ;;  %v4891_v12 = vld [vmem:[#allocation27_spill] sm:$0xff]  ;;  %v4892_v35 = vld [vmem:[#allocation60_spill] sm:$0xff]  ;;  %v4895_v2 = vld [vmem:[#allocation61_spill] sm:$0xff] }
 0x20c   :  { %4885 = vst [vmem:[#allocation67_spill] sm:$0xff] %v3603_v59  ;;  %v3615_v17 = vadd.f32 %v4892_v35, %v4891_v12  ;;  %v4894_v40 = vld [vmem:[#allocation76_spill] sm:$0xff]  ;;  %v1549_v18 = vld [vmem:[#allocation6 + $0x38] sm:$0xff]  ;;  %v1550_v59 = vld [vmem:[#allocation6 + $0x40] sm:$0xff] }
 0x20d   :  { %4888 = vst [vmem:[#allocation19_spill] sm:$0xff] %v3607_v21  ;;  %4890 = vst [vmem:[#allocation41_spill] sm:$0xff] %v3611_v5  ;;  %v3619_v60 = vadd.f32 %v4895_v2, %v4894_v40  ;;  %v1548_v49 = vld [vmem:[#allocation6 + $0x30] sm:$0xff]  ;;  %v4898_v30 = vld [vmem:[#allocation50_spill] sm:$0xff] }
 0x20e   :  { %4893 = vst [vmem:[#allocation68_spill] sm:$0xff] %v3615_v17  ;;  %v4897_v1 = vld [vmem:[#allocation28_spill] sm:$0xff]  ;;  %v4900_v7 = vld [vmem:[#allocation77_spill] sm:$0xff]  ;;  %v4903_v15 = vld [vmem:[#allocation51_spill] sm:$0xff] }
 0x20f   :  { %4896 = vst [vmem:[#allocation42_spill] sm:$0xff] %v3619_v60  ;;  %v3623_v54 = vadd.f32 %v4898_v30, %v4897_v1  ;;  %v3627_v55 = vadd.f32 %v3375_v20, %v4900_v7  ;;  %v4902_v45 = vld [vmem:[#allocation29_spill] sm:$0xff]  ;;  %v4905_v12 = vld [vmem:[#allocation78_spill] sm:$0xff]  ;;  %v4909_v60 = vld [vmem:[#allocation12_spill] sm:$0xff]  ;;  %v3641_v30 = vpack.c.bf16 %v1544_v4, %v1543_v25  ;;  %v3643_v1 = vpack.c.bf16 %v1546_v33, %v1545_v38 }
 0x210   :  { %v3631_v5 = vadd.f32 %v4903_v15, %v4902_v45  ;;  %v4906_v35 = vld [vmem:[#allocation53_spill] sm:$0xff]  ;;  %v4908_v40 = vld [vmem:[#allocation90_spill] sm:$0xff]  ;;  %v4914_v45 = vld [vmem:[#allocation79_spill] sm:$0xff] }
 0x211   :  { %4899 = vst [vmem:[#allocation20_spill] sm:$0xff] %v3623_v54  ;;  %4901 = vst [vmem:[#allocation43_spill] sm:$0xff] %v3627_v55  ;;  %v3635_v17 = vadd.f32 %v4906_v35, %v4905_v12  ;;  %v1134_v2 = vcombine.high %v4908_v40, %v4908_v40  ;;  %v1141_v21 = vrot.slane %v4908_v40, %v4909_v60  ;;  %v4912_v20 = vld [vmem:[#allocation30_spill] sm:$0xff]  ;;  %v4920_v33 = vld [vmem:[#allocation80_spill] sm:$0xff] }
 0x212   :  { %4904 = vst [vmem:[#allocation69_spill] sm:$0xff] %v3631_v5  ;;  %4910 = vst [vmem:[#allocation21_spill] sm:$0xff] %v3641_v30  ;;  %v3647_v7 = vadd.f32 %v3384_v32, %v4912_v20  ;;  %v3651_v15 = vadd.f32 %v3387_v9, %v4914_v45  ;;  %v3653_v12 = vpack.c.bf16 %v1548_v49, %v1547_v31  ;;  %v4922_v40 = vld [vmem:[#allocation32_spill] sm:$0xff]  ;;  %v4924_v31 = vld [vmem:[#allocation81_spill] sm:$0xff] }
 0x213   :  { %4907 = vst [vmem:[#allocation44_spill] sm:$0xff] %v3635_v17  ;;  %4911 = vst [vmem:[#allocation45_spill] sm:$0xff] %v3643_v1  ;;  %v3655_v35 = vpack.c.bf16 %v1550_v59, %v1549_v18  ;;  %v4918_v17 = vld [vmem:[#allocation31_spill] sm:$0xff]  ;;  %v1148_v4 = vrot.slane %v1134_v2, %v4909_v60  ;;  %v1149_v25 = vcombine.high %v1141_v21, %v1141_v21  ;;  %v4926_v49 = vld [vmem:[#allocation33_spill] sm:$0xff] }
 0x214   :  { %4913 = vst [vmem:[#allocation70_spill] sm:$0xff] %v3647_v7  ;;  %4915 = vst [vmem:[#allocation87_spill] sm:$0xff] %v3651_v15  ;;  %v3659_v5 = vadd.f32 %v3391_v42, %v4918_v17  ;;  %v1157_v38 = vrot.slane %v1141_v21, %v4909_v60  ;;  %v3665_v32 = vadd.f32 %v3395_v41, %v4920_v33  ;;  %v3679_v17 = vld [vmem:[#allocation6 + $0x148] sm:$0xff]  ;;  %v3681_v18 = vld [vmem:[#allocation6 + $0x150] sm:$0xff] }
 0x215   :  { %4916 = vst [vmem:[#allocation22_spill] sm:$0xff] %v3653_v12  ;;  %4917 = vst [vmem:[#allocation46_spill] sm:$0xff] %v3655_v35  ;;  %v3669_v9 = vadd.f32 %v3399_v24, %v4922_v40  ;;  %v3673_v59 = vadd.f32 %v3403_v19, %v4924_v31  ;;  %v3677_v42 = vadd.f32 %v3407_v53, %v4926_v49  ;;  %v3685_v24 = vld [vmem:[#allocation6 + $0x158] sm:$0xff]  ;;  %v4928_v45 = vld [vmem:[#allocation34_spill] sm:$0xff] }
 0x216   :  { %4919 = vst [vmem:[#allocation71_spill] sm:$0xff] %v3659_v5  ;;  %4921 = vst [vmem:[#allocation23_spill] sm:$0xff] %v3665_v32  ;;  %v1150_v21 = vcombine.high %v1148_v4, %v1148_v4  ;;  %v1164_v41 = vrot.slane %v1148_v4, %v4909_v60  ;;  %v1171_v2 = vrot.slane %v1149_v25, %v4909_v60  ;;  %v4930_v33 = vld [vmem:[#allocation82_spill] sm:$0xff]  ;;  %v4932_v40 = vld [vmem:[#allocation35_spill] sm:$0xff] }
 0x217   :  { %4923 = vst [vmem:[#allocation88_spill] sm:$0xff] %v3669_v9  ;;  %4925 = vst [vmem:[#allocation72_spill] sm:$0xff] %v3673_v59  ;;  %v1179_v20 = vcombine.high %v1157_v38, %v1157_v38  ;;  %v3689_v19 = vadd.f32 %v3411_v57, %v4928_v45  ;;  %v3693_v53 = vadd.f32 %v3415_v29, %v4930_v33  ;;  %v4934_v49 = vld [vmem:[#allocation13_spill] sm:$0xff]  ;;  %v3700_v4 = vld [vmem:[#allocation6 + $0x160] sm:$0xff] }
 0x218   :  { %4927 = vst [vmem:[#allocation47_spill] sm:$0xff] %v3677_v42  ;;  %v3697_v31 = vadd.f32 %v3419_v28, %v4932_v40  ;;  %v1186_v35 = vrot.slane %v1157_v38, %v4934_v49  ;;  %v3702_v25 = vld [vmem:[#allocation6 + $0x168] sm:$0xff]  ;;  %v3704_v12 = vld [vmem:[#allocation6 + $0x170] sm:$0xff]  ;;  %v1178_v1 = vrot.slane %v1150_v21, %v4909_v60  ;;  %v1180_v57 = vcombine.high %v1164_v41, %v1164_v41  ;;  %v3708_v29 = vld [vmem:[#allocation6 + $0x178] sm:$0xff] }
 0x219   :  { %4929 = vst [vmem:[#allocation24_spill] sm:$0xff] %v3689_v19  ;;  %4931 = vst [vmem:[#allocation89_spill] sm:$0xff] %v3693_v53  ;;  %v1181_v45 = vcombine.high %v1171_v2, %v1171_v2  ;;  %v1190_v30 = vrot.slane %v1171_v2, %v4934_v49  ;;  %v3710_v33 = vld [vmem:[#allocation6 + $0x180] sm:$0xff]  ;;  %v1194_v28 = vrot.slane %v1179_v20, %v4934_v49 }
 0x21a   :  { %4933 = vst [vmem:[#allocation73_spill] sm:$0xff] %v3697_v31  ;;  %v1202_v38 = vrot.slane %v1164_v41, %v4934_v49  ;;  %v3715_v40 = vmul.f32 %v1186_v35, %v3679_v17  ;;  %v3718_v31 = vmul.f32 %v1186_v35, %v3681_v18  ;;  %v1182_v53 = vcombine.high %v1178_v1, %v1178_v1 }
 0x21b   :  { %v1198_v60 = vrot.slane %v1181_v45, %v4934_v49  ;;  %v1206_v21 = vrot.slane %v1178_v1, %v4934_v49  ;;  %v1210_v2 = vrot.slane %v1180_v57, %v4934_v49  ;;  %v3724_v19 = vmul.f32 %v1186_v35, %v3685_v24 }
 0x21c   :  { %v3727_v20 = vmul.f32 %v1186_v35, %v3700_v4  ;;  %v3730_v41 = vmul.f32 %v1186_v35, %v3702_v25  ;;  %v3733_v42 = vmul.f32 %v1186_v35, %v3704_v12  ;;  %v1214_v59 = vrot.slane %v1182_v53, %v4934_v49 }
 0x21d   :  { %v3737_v45 = vmul.f32 %v1186_v35, %v3708_v29  ;;  %v3740_v1 = vmul.f32 %v1186_v35, %v3710_v33  ;;  %v3743_v57 = vmul.f32 %v1190_v30, %v3679_v17  ;;  %v3746_v9 = vmul.f32 %v1190_v30, %v3681_v18 }
 0x21e   :  { %v3749_v32 = vmul.f32 %v1190_v30, %v3685_v24  ;;  %v3752_v5 = vmul.f32 %v1190_v30, %v3700_v4  ;;  %v3755_v53 = vmul.f32 %v1190_v30, %v3702_v25  ;;  %v3758_v49 = vmul.f32 %v1190_v30, %v3704_v12 }
 0x21f   :  { %v3761_v35 = vmul.f32 %v1190_v30, %v3708_v29  ;;  %v3764_v15 = vmul.f32 %v1190_v30, %v3710_v33  ;;  %v3767_v7 = vmul.f32 %v1194_v28, %v3679_v17  ;;  %v3770_v55 = vmul.f32 %v1194_v28, %v3681_v18 }
 0x220   :  { %v3773_v54 = vmul.f32 %v1194_v28, %v3685_v24  ;;  %v3776_v37 = vmul.f32 %v1194_v28, %v3700_v4  ;;  %v3779_v16 = vmul.f32 %v1194_v28, %v3702_v25  ;;  %v3782_v10 = vmul.f32 %v1194_v28, %v3704_v12 }
 0x221   :  { %v3785_v30 = vmul.f32 %v1194_v28, %v3708_v29  ;;  %v3788_v8 = vmul.f32 %v1194_v28, %v3710_v33  ;;  %v3791_v6 = vmul.f32 %v1198_v60, %v3679_v17  ;;  %v3794_v23 = vmul.f32 %v1198_v60, %v3681_v18 }
 0x222   :  { %4935 = vst [vmem:[#allocation52_spill] sm:$0xff] %v3782_v10  ;;  %v3797_v11 = vmul.f32 %v1198_v60, %v3685_v24  ;;  %v3800_v3 = vmul.f32 %v1198_v60, %v3700_v4  ;;  %v3803_v10 = vmul.f32 %v1198_v60, %v3702_v25  ;;  %v3809_v28 = vmul.f32 %v1198_v60, %v3708_v29 }
 0x223   :  { %4936 = vst [vmem:[#allocation25_spill] sm:$0xff] %v3785_v30  ;;  %4937 = vst [vmem:[#allocation55_spill] sm:$0xff] %v3791_v6  ;;  %v3806_v30 = vmul.f32 %v1198_v60, %v3704_v12  ;;  %v3812_v6 = vmul.f32 %v1198_v60, %v3710_v33  ;;  %v3833_v60 = vmul.f32 %v1202_v38, %v3708_v29 }
 0x224   :  { %4938 = vst [vmem:[#allocation74_spill] sm:$0xff] %v3794_v23  ;;  %4939 = vst [vmem:[#allocation48_spill] sm:$0xff] %v3797_v11  ;;  %v3815_v23 = vmul.f32 %v1202_v38, %v3679_v17  ;;  %v3818_v11 = vmul.f32 %v1202_v38, %v3681_v18 }
 0x225   :  { %4940 = vst [vmem:[#allocation26_spill] sm:$0xff] %v3800_v3  ;;  %4941 = vst [vmem:[#allocation49_spill] sm:$0xff] %v3803_v10  ;;  %v3821_v3 = vmul.f32 %v1202_v38, %v3685_v24  ;;  %v3824_v10 = vmul.f32 %v1202_v38, %v3700_v4 }
 0x226   :  { %4942 = vst [vmem:[#allocation75_spill] sm:$0xff] %v3806_v30  ;;  %4943 = vst [vmem:[#allocation27_spill] sm:$0xff] %v3809_v28  ;;  %v3827_v30 = vmul.f32 %v1202_v38, %v3702_v25  ;;  %v3830_v28 = vmul.f32 %v1202_v38, %v3704_v12 }
 0x227   :  { %4944 = vst [vmem:[#allocation60_spill] sm:$0xff] %v3815_v23  ;;  %4945 = vst [vmem:[#allocation76_spill] sm:$0xff] %v3818_v11  ;;  %v3836_v23 = vmul.f32 %v1202_v38, %v3710_v33  ;;  %v3839_v11 = vmul.f32 %v1206_v21, %v3679_v17  ;;  %v3857_v38 = vmul.f32 %v1206_v21, %v3708_v29 }
 0x228   :  { %4946 = vst [vmem:[#allocation61_spill] sm:$0xff] %v3821_v3  ;;  %4947 = vst [vmem:[#allocation28_spill] sm:$0xff] %v3824_v10  ;;  %v3842_v3 = vmul.f32 %v1206_v21, %v3681_v18  ;;  %v3845_v10 = vmul.f32 %v1206_v21, %v3685_v24 }
 0x229   :  { %4948 = vst [vmem:[#allocation50_spill] sm:$0xff] %v3827_v30  ;;  %4949 = vst [vmem:[#allocation77_spill] sm:$0xff] %v3830_v28  ;;  %v3848_v30 = vmul.f32 %v1206_v21, %v3700_v4  ;;  %v3851_v28 = vmul.f32 %v1206_v21, %v3702_v25 }
 0x22a   :  { %4950 = vst [vmem:[#allocation29_spill] sm:$0xff] %v3833_v60  ;;  %4951 = vst [vmem:[#allocation51_spill] sm:$0xff] %v3839_v11  ;;  %v3854_v60 = vmul.f32 %v1206_v21, %v3704_v12  ;;  %v3860_v11 = vmul.f32 %v1206_v21, %v3710_v33  ;;  %v3881_v21 = vmul.f32 %v1210_v2, %v3708_v29 }
 0x22b   :  { %4952 = vst [vmem:[#allocation78_spill] sm:$0xff] %v3842_v3  ;;  %4953 = vst [vmem:[#allocation53_spill] sm:$0xff] %v3845_v10  ;;  %v3863_v3 = vmul.f32 %v1210_v2, %v3679_v17  ;;  %v3866_v10 = vmul.f32 %v1210_v2, %v3681_v18 }
 0x22c   :  { %4954 = vst [vmem:[#allocation90_spill] sm:$0xff] %v3848_v30  ;;  %4955 = vst [vmem:[#allocation12_spill] sm:$0xff] %v3851_v28  ;;  %v3869_v30 = vmul.f32 %v1210_v2, %v3685_v24  ;;  %v3872_v28 = vmul.f32 %v1210_v2, %v3700_v4 }
 0x22d   :  { %4956 = vst [vmem:[#allocation30_spill] sm:$0xff] %v3854_v60  ;;  %4957 = vst [vmem:[#allocation79_spill] sm:$0xff] %v3857_v38  ;;  %v3875_v60 = vmul.f32 %v1210_v2, %v3702_v25  ;;  %v3878_v38 = vmul.f32 %v1210_v2, %v3704_v12 }
 0x22e   :  { %4958 = vst [vmem:[#allocation31_spill] sm:$0xff] %v3863_v3  ;;  %4959 = vst [vmem:[#allocation80_spill] sm:$0xff] %v3866_v10  ;;  %v3884_v3 = vmul.f32 %v1210_v2, %v3710_v33  ;;  %v3887_v10 = vmul.f32 %v1214_v59, %v3679_v17  ;;  %v3905_v2 = vmul.f32 %v1214_v59, %v3708_v29  ;;  %v4977_v29 = vld [vmem:[#allocation62_spill] sm:$0xff] }
 0x22f   :  { %4960 = vst [vmem:[#allocation32_spill] sm:$0xff] %v3869_v30  ;;  %4961 = vst [vmem:[#allocation81_spill] sm:$0xff] %v3872_v28  ;;  %v3890_v30 = vmul.f32 %v1214_v59, %v3681_v18  ;;  %v3893_v28 = vmul.f32 %v1214_v59, %v3685_v24  ;;  %v3908_v17 = vmul.f32 %v1214_v59, %v3710_v33  ;;  %v4978_v33 = vld [vmem:[#allocation49_spill] sm:$0xff] }
 0x230   :  { %4962 = vst [vmem:[#allocation33_spill] sm:$0xff] %v3875_v60  ;;  %4963 = vst [vmem:[#allocation34_spill] sm:$0xff] %v3878_v38  ;;  %v3896_v60 = vmul.f32 %v1214_v59, %v3700_v4  ;;  %v3899_v38 = vmul.f32 %v1214_v59, %v3702_v25  ;;  %v3912_v18 = vadd.f32 %v3715_v40, %v3423_v13  ;;  %v4979_v40 = vld [vmem:[#allocation36_spill] sm:$0xff] }
 0x231   :  { %4964 = vst [vmem:[#allocation82_spill] sm:$0xff] %v3881_v21  ;;  %v3902_v21 = vmul.f32 %v1214_v59, %v3704_v12  ;;  %v3916_v24 = vadd.f32 %v3718_v31, %v3427_v22  ;;  %v3920_v4 = vadd.f32 %v3724_v19, %v3431_v50  ;;  %v3924_v12 = vadd.f32 %v3727_v20, %v3435_v52  ;;  %v4975_v19 = vld [vmem:[#allocation83_spill] sm:$0xff]  ;;  %v4976_v31 = vld [vmem:[#allocation26_spill] sm:$0xff] }
 0x232   :  { %v3928_v59 = vadd.f32 %v3730_v41, %v3439_v48  ;;  %v3932_v13 = vadd.f32 %v3733_v42, %v3443_v36  ;;  %v3936_v22 = vadd.f32 %v3737_v45, %v3447_v26  ;;  %v3940_v50 = vadd.f32 %v3740_v1, %v3451_v34  ;;  %v4974_v42 = vld [vmem:[#allocation48_spill] sm:$0xff]  ;;  %v4980_v20 = vld [vmem:[#allocation75_spill] sm:$0xff]  ;;  %v4981_v45 = vld [vmem:[#allocation14_spill] sm:$0xff] }
 0x233   :  { %v3944_v52 = vadd.f32 %v3743_v57, %v3455_v44  ;;  %v3948_v48 = vadd.f32 %v3746_v9, %v3459_v43  ;;  %v3952_v36 = vadd.f32 %v3749_v32, %v3463_v46  ;;  %v3956_v26 = vadd.f32 %v3752_v5, %v3467_v47  ;;  %v4965_v5 = vld [vmem:[#allocation52_spill] sm:$0xff]  ;;  %v4970_v32 = vld [vmem:[#allocation55_spill] sm:$0xff]  ;;  %v4972_v9 = vld [vmem:[#allocation74_spill] sm:$0xff] }
 0x234   :  { %v3960_v34 = vadd.f32 %v3755_v53, %v3471_v51  ;;  %v3964_v44 = vadd.f32 %v3758_v49, %v3475_v56  ;;  %v3968_v43 = vadd.f32 %v3761_v35, %v3479_v58  ;;  %v3972_v46 = vadd.f32 %v3764_v15, %v3483_v27  ;;  %v4967_v15 = vld [vmem:[#allocation25_spill] sm:$0xff]  ;;  %v4982_v1 = vld [vmem:[#allocation27_spill] sm:$0xff]  ;;  %v4984_v35 = vld [vmem:[#allocation84_spill] sm:$0xff] }
 0x235   :  { %v3976_v47 = vadd.f32 %v3767_v7, %v3487_v39  ;;  %v3980_v51 = vadd.f32 %v3770_v55, %v3491_v61  ;;  %v3984_v56 = vadd.f32 %v3773_v54, %v3495_v62  ;;  %v3988_v58 = vadd.f32 %v3776_v37, %v3499_v63  ;;  %v4966_v7 = vld [vmem:[#allocation54_spill] sm:$0xff]  ;;  %v4968_v55 = vld [vmem:[#allocation56_spill] sm:$0xff]  ;;  %v4969_v54 = vld [vmem:[#allocation57_spill] sm:$0xff] }
 0x236   :  { %v3992_v27 = vadd.f32 %v3779_v16, %v3503_v14  ;;  %v3996_v39 = vadd.f32 %v4965_v5, %v3507_v0  ;;  %v4000_v61 = vadd.f32 %v4967_v15, %v4966_v7  ;;  %v4004_v62 = vadd.f32 %v3788_v8, %v4968_v55  ;;  %v4971_v37 = vld [vmem:[#allocation58_spill] sm:$0xff]  ;;  %v4973_v16 = vld [vmem:[#allocation59_spill] sm:$0xff]  ;;  %v4985_v5 = vld [vmem:[#allocation60_spill] sm:$0xff] }
 0x237   :  { %v4008_v63 = vadd.f32 %v4970_v32, %v4969_v54  ;;  %v4012_v14 = vadd.f32 %v4972_v9, %v4971_v37  ;;  %v4016_v0 = vadd.f32 %v4974_v42, %v4973_v16  ;;  %v4020_v25 = vadd.f32 %v4976_v31, %v4975_v19  ;;  %v4983_v53 = vld [vmem:[#allocation15_spill] sm:$0xff]  ;;  %v4986_v15 = vld [vmem:[#allocation64_spill] sm:$0xff]  ;;  %v4988_v32 = vld [vmem:[#allocation37_spill] sm:$0xff] }
 0x238   :  { %v4024_v8 = vadd.f32 %v4978_v33, %v4977_v29  ;;  %v4028_v41 = vadd.f32 %v4980_v20, %v4979_v40  ;;  %v4032_v57 = vadd.f32 %v4982_v1, %v4981_v45  ;;  %v4036_v49 = vadd.f32 %v3812_v6, %v4983_v53  ;;  %v4987_v55 = vld [vmem:[#allocation76_spill] sm:$0xff]  ;;  %v4989_v37 = vld [vmem:[#allocation61_spill] sm:$0xff]  ;;  %v4993_v29 = vld [vmem:[#allocation50_spill] sm:$0xff] }
 0x239   :  { %v4040_v7 = vadd.f32 %v4985_v5, %v4984_v35  ;;  %v4044_v54 = vadd.f32 %v4987_v55, %v4986_v15  ;;  %v4048_v9 = vadd.f32 %v4989_v37, %v4988_v32  ;;  %v4990_v16 = vld [vmem:[#allocation16_spill] sm:$0xff]  ;;  %v4992_v31 = vld [vmem:[#allocation85_spill] sm:$0xff]  ;;  %v4997_v45 = vld [vmem:[#allocation38_spill] sm:$0xff] }
 0x23a   :  { %v4991_v42 = vld [vmem:[#allocation28_spill] sm:$0xff]  ;;  %v4056_v6 = vadd.f32 %v4993_v29, %v4992_v31  ;;  %v4994_v33 = vld [vmem:[#allocation65_spill] sm:$0xff]  ;;  %v5002_v15 = vld [vmem:[#allocation39_spill] sm:$0xff] }
 0x23b   :  { %v4052_v19 = vadd.f32 %v4991_v42, %v4990_v16  ;;  %v4995_v40 = vld [vmem:[#allocation77_spill] sm:$0xff]  ;;  %v5003_v55 = vld [vmem:[#allocation51_spill] sm:$0xff]  ;;  %v5005_v37 = vld [vmem:[#allocation66_spill] sm:$0xff] }
 0x23c   :  { %v4060_v20 = vadd.f32 %v4995_v40, %v4994_v33  ;;  %v4998_v1 = vld [vmem:[#allocation29_spill] sm:$0xff]  ;;  %v4072_v32 = vadd.f32 %v5003_v55, %v5002_v15  ;;  %v5006_v16 = vld [vmem:[#allocation78_spill] sm:$0xff]  ;;  %v5008_v31 = vld [vmem:[#allocation40_spill] sm:$0xff] }
 0x23d   :  { %v4064_v53 = vadd.f32 %v4998_v1, %v4997_v45  ;;  %v5000_v35 = vld [vmem:[#allocation17_spill] sm:$0xff]  ;;  %v4076_v42 = vadd.f32 %v5006_v16, %v5005_v37  ;;  %v5011_v40 = vld [vmem:[#allocation18_spill] sm:$0xff]  ;;  %v5020_v55 = vld [vmem:[#allocation19_spill] sm:$0xff] }
 0x23e   :  { %4996 = vst [vmem:[#allocation35_spill] sm:$0xff] %v4060_v20  ;;  %v4068_v5 = vadd.f32 %v3836_v23, %v5000_v35  ;;  %5004 = vst [vmem:[#allocation54_spill] sm:$0xff] %v4072_v32  ;;  %v5009_v29 = vld [vmem:[#allocation53_spill] sm:$0xff]  ;;  %v5012_v20 = vld [vmem:[#allocation90_spill] sm:$0xff] }
 0x23f   :  { %4999 = vst [vmem:[#allocation13_spill] sm:$0xff] %v4064_v53  ;;  %5007 = vst [vmem:[#allocation25_spill] sm:$0xff] %v4076_v42  ;;  %v4080_v33 = vadd.f32 %v5009_v29, %v5008_v31  ;;  %v4084_v45 = vadd.f32 %v5012_v20, %v5011_v40  ;;  %v5014_v1 = vld [vmem:[#allocation86_spill] sm:$0xff]  ;;  %v5015_v53 = vld [vmem:[#allocation12_spill] sm:$0xff] }
 0x240   :  { %5001 = vst [vmem:[#allocation52_spill] sm:$0xff] %v4068_v5  ;;  %v4088_v23 = vadd.f32 %v5015_v53, %v5014_v1  ;;  %v5017_v35 = vld [vmem:[#allocation67_spill] sm:$0xff]  ;;  %v5018_v5 = vld [vmem:[#allocation30_spill] sm:$0xff]  ;;  %v5023_v16 = vld [vmem:[#allocation41_spill] sm:$0xff] }
 0x241   :  { %5010 = vst [vmem:[#allocation56_spill] sm:$0xff] %v4080_v33  ;;  %5013 = vst [vmem:[#allocation57_spill] sm:$0xff] %v4084_v45  ;;  %v4092_v15 = vadd.f32 %v5018_v5, %v5017_v35  ;;  %v5021_v32 = vld [vmem:[#allocation79_spill] sm:$0xff]  ;;  %v4100_v31 = vadd.f32 %v3860_v11, %v5023_v16  ;;  %v5025_v29 = vld [vmem:[#allocation68_spill] sm:$0xff] }
 0x242   :  { %5016 = vst [vmem:[#allocation55_spill] sm:$0xff] %v4088_v23  ;;  %v4096_v37 = vadd.f32 %v5021_v32, %v5020_v55  ;;  %v5026_v33 = vld [vmem:[#allocation31_spill] sm:$0xff]  ;;  %v4108_v53 = vld [vmem:[#allocation6 + $0x50] sm:$0xff]  ;;  %v5028_v1 = vld [vmem:[#allocation42_spill] sm:$0xff] }
 0x243   :  { %5019 = vst [vmem:[#allocation58_spill] sm:$0xff] %v4092_v15  ;;  %5024 = vst [vmem:[#allocation59_spill] sm:$0xff] %v4100_v31  ;;  %v4104_v20 = vadd.f32 %v5026_v33, %v5025_v29  ;;  %v4106_v40 = vld [vmem:[#allocation6 + $0x48] sm:$0xff]  ;;  %v5029_v23 = vld [vmem:[#allocation80_spill] sm:$0xff] }
 0x244   :  { %5022 = vst [vmem:[#allocation74_spill] sm:$0xff] %v4096_v37  ;;  %v4112_v5 = vadd.f32 %v5029_v23, %v5028_v1  ;;  %v5031_v35 = vld [vmem:[#allocation20_spill] sm:$0xff]  ;;  %v5034_v55 = vld [vmem:[#allocation43_spill] sm:$0xff]  ;;  %v5035_v37 = vld [vmem:[#allocation81_spill] sm:$0xff] }
 0x245   :  { %5027 = vst [vmem:[#allocation48_spill] sm:$0xff] %v4104_v20  ;;  %v5032_v15 = vld [vmem:[#allocation32_spill] sm:$0xff]  ;;  %v4120_v11 = vadd.f32 %v5035_v37, %v5034_v55  ;;  %v5037_v16 = vld [vmem:[#allocation69_spill] sm:$0xff]  ;;  %v4128_v20 = vld [vmem:[#allocation6 + $0x60] sm:$0xff] }
 0x246   :  { %5030 = vst [vmem:[#allocation83_spill] sm:$0xff] %v4112_v5  ;;  %v4116_v32 = vadd.f32 %v5032_v15, %v5031_v35  ;;  %v5038_v31 = vld [vmem:[#allocation33_spill] sm:$0xff]  ;;  %v4130_v45 = vld [vmem:[#allocation6 + $0x68] sm:$0xff]  ;;  %v5040_v23 = vld [vmem:[#allocation44_spill] sm:$0xff] }
 0x247   :  { %5036 = vst [vmem:[#allocation62_spill] sm:$0xff] %v4120_v11  ;;  %v4124_v33 = vadd.f32 %v5038_v31, %v5037_v16  ;;  %v4126_v29 = vld [vmem:[#allocation6 + $0x58] sm:$0xff]  ;;  %v5041_v1 = vld [vmem:[#allocation34_spill] sm:$0xff]  ;;  %v5045_v37 = vld [vmem:[#allocation87_spill] sm:$0xff] }
 0x248   :  { %5033 = vst [vmem:[#allocation26_spill] sm:$0xff] %v4116_v32  ;;  %v4134_v5 = vadd.f32 %v5041_v1, %v5040_v23  ;;  %v5042_v15 = vld [vmem:[#allocation70_spill] sm:$0xff]  ;;  %v4142_v55 = vadd.f32 %v3884_v3, %v5045_v37  ;;  %v5047_v31 = vld [vmem:[#allocation71_spill] sm:$0xff]  ;;  %v4150_v11 = vld [vmem:[#allocation6 + $0x78] sm:$0xff] }
 0x249   :  { %5039 = vst [vmem:[#allocation49_spill] sm:$0xff] %v4124_v33  ;;  %v5043_v35 = vld [vmem:[#allocation82_spill] sm:$0xff]  ;;  %v4146_v16 = vadd.f32 %v3887_v10, %v5047_v31  ;;  %v4148_v33 = vld [vmem:[#allocation6 + $0x70] sm:$0xff]  ;;  %v5049_v23 = vld [vmem:[#allocation23_spill] sm:$0xff] }
 0x24a   :  { %v4138_v32 = vadd.f32 %v5043_v35, %v5042_v15  ;;  %5046 = vst [vmem:[#allocation75_spill] sm:$0xff] %v4142_v55  ;;  %v4152_v42 = vld [vmem:[#allocation6 + $0x80] sm:$0xff]  ;;  %v4156_v1 = vadd.f32 %v3890_v30, %v5049_v23  ;;  %v5050_v15 = vld [vmem:[#allocation88_spill] sm:$0xff]  ;;  %v5052_v10 = vld [vmem:[#allocation47_spill] sm:$0xff] }
 0x24b   :  { %5048 = vst [vmem:[#allocation14_spill] sm:$0xff] %v4146_v16  ;;  %v4160_v35 = vadd.f32 %v3893_v28, %v5050_v15  ;;  %v5051_v3 = vld [vmem:[#allocation72_spill] sm:$0xff]  ;;  %v4168_v31 = vadd.f32 %v3899_v38, %v5052_v10  ;;  %v5055_v23 = vld [vmem:[#allocation73_spill] sm:$0xff]  ;;  %v4188_v38 = vadd.f32 %v3916_v24, %v4108_v53  ;;  %v4208_v24 = vadd.f32 %v3936_v22, %v4150_v11 }
 0x24c   :  { %5044 = vst [vmem:[#allocation36_spill] sm:$0xff] %v4138_v32  ;;  %v4164_v37 = vadd.f32 %v3896_v60, %v5051_v3  ;;  %v5053_v16 = vld [vmem:[#allocation24_spill] sm:$0xff]  ;;  %v5054_v32 = vld [vmem:[#allocation89_spill] sm:$0xff]  ;;  %v4180_v28 = vadd.f32 %v3908_v17, %v5055_v23  ;;  %v4184_v60 = vadd.f32 %v3912_v18, %v4106_v40  ;;  %v4200_v17 = vadd.f32 %v3928_v59, %v4130_v45  ;;  %v5065_v3 = vld [vmem:[#allocation54_spill] sm:$0xff] }
 0x24d   :  { %v4172_v55 = vadd.f32 %v3902_v21, %v5053_v16  ;;  %v4176_v30 = vadd.f32 %v3905_v2, %v5054_v32  ;;  %5057 = vst [vmem:[#allocation15_spill] sm:$0xff] %v4188_v38  ;;  %v4192_v21 = vadd.f32 %v3920_v4, %v4126_v29  ;;  %v4196_v2 = vadd.f32 %v3924_v12, %v4128_v20  ;;  %v5059_v32 = vld [vmem:[#allocation35_spill] sm:$0xff]  ;;  %v5061_v16 = vld [vmem:[#allocation13_spill] sm:$0xff]  ;;  %v5063_v15 = vld [vmem:[#allocation52_spill] sm:$0xff] }
 0x24e   :  { %5056 = vst [vmem:[#allocation27_spill] sm:$0xff] %v4184_v60  ;;  %v4204_v18 = vadd.f32 %v3932_v13, %v4148_v33  ;;  %v4212_v4 = vadd.f32 %v3940_v50, %v4152_v42  ;;  %v4216_v12 = vadd.f32 %v3944_v52, %v4106_v40  ;;  %v4220_v59 = vadd.f32 %v3948_v48, %v4108_v53  ;;  %v5067_v10 = vld [vmem:[#allocation25_spill] sm:$0xff]  ;;  %v5069_v23 = vld [vmem:[#allocation56_spill] sm:$0xff] }
 0x24f   :  { %5058 = vst [vmem:[#allocation84_spill] sm:$0xff] %v4192_v21  ;;  %v4224_v13 = vadd.f32 %v3952_v36, %v4126_v29  ;;  %v4228_v22 = vadd.f32 %v3956_v26, %v4128_v20  ;;  %v4232_v50 = vadd.f32 %v3960_v34, %v4130_v45  ;;  %v4236_v52 = vadd.f32 %v3964_v44, %v4148_v33 }
 0x250   :  { %v4240_v48 = vadd.f32 %v3968_v43, %v4150_v11  ;;  %v4244_v36 = vadd.f32 %v3972_v46, %v4152_v42  ;;  %v4248_v26 = vadd.f32 %v3976_v47, %v4106_v40  ;;  %v4252_v34 = vadd.f32 %v3980_v51, %v4108_v53 }
 0x251   :  { %v4256_v44 = vadd.f32 %v3984_v56, %v4126_v29  ;;  %v4260_v43 = vadd.f32 %v3988_v58, %v4128_v20  ;;  %v4264_v46 = vadd.f32 %v3992_v27, %v4130_v45  ;;  %v4268_v47 = vadd.f32 %v3996_v39, %v4148_v33 }
 0x252   :  { %v4272_v51 = vadd.f32 %v4000_v61, %v4150_v11  ;;  %v4276_v56 = vadd.f32 %v4004_v62, %v4152_v42  ;;  %v4280_v58 = vadd.f32 %v4008_v63, %v4106_v40  ;;  %v4284_v27 = vadd.f32 %v4012_v14, %v4108_v53 }
 0x253   :  { %v4288_v39 = vadd.f32 %v4016_v0, %v4126_v29  ;;  %v4292_v61 = vadd.f32 %v4020_v25, %v4128_v20  ;;  %v4296_v62 = vadd.f32 %v4024_v8, %v4130_v45  ;;  %v4300_v63 = vadd.f32 %v4028_v41, %v4148_v33 }
 0x254   :  { %v4304_v14 = vadd.f32 %v4032_v57, %v4150_v11  ;;  %v4308_v0 = vadd.f32 %v4036_v49, %v4152_v42  ;;  %v4312_v25 = vadd.f32 %v4040_v7, %v4106_v40  ;;  %v4316_v8 = vadd.f32 %v4044_v54, %v4108_v53 }
 0x255   :  { %v4320_v41 = vadd.f32 %v4048_v9, %v4126_v29  ;;  %v4324_v57 = vadd.f32 %v4052_v19, %v4128_v20  ;;  %v4328_v49 = vadd.f32 %v4056_v6, %v4130_v45  ;;  %v4332_v7 = vadd.f32 %v5059_v32, %v4148_v33 }
 0x256   :  { %v4336_v54 = vadd.f32 %v5061_v16, %v4150_v11  ;;  %v4340_v9 = vadd.f32 %v5063_v15, %v4152_v42  ;;  %v4344_v19 = vadd.f32 %v5065_v3, %v4106_v40  ;;  %v4348_v6 = vadd.f32 %v5067_v10, %v4108_v53 }
 0x257   :  { %5060 = vst [vmem:[#allocation60_spill] sm:$0xff] %v4332_v7  ;;  %v4352_v32 = vadd.f32 %v5069_v23, %v4126_v29  ;;  %v5071_v7 = vld [vmem:[#allocation57_spill] sm:$0xff] }
 0x258   :  { %5062 = vst [vmem:[#allocation64_spill] sm:$0xff] %v4336_v54  ;;  %5064 = vst [vmem:[#allocation76_spill] sm:$0xff] %v4340_v9  ;;  %v4356_v16 = vadd.f32 %v5071_v7, %v4128_v20  ;;  %v5073_v54 = vld [vmem:[#allocation55_spill] sm:$0xff]  ;;  %v5075_v9 = vld [vmem:[#allocation58_spill] sm:$0xff] }
 0x259   :  { %5066 = vst [vmem:[#allocation37_spill] sm:$0xff] %v4344_v19  ;;  %5068 = vst [vmem:[#allocation61_spill] sm:$0xff] %v4348_v6  ;;  %v4360_v15 = vadd.f32 %v5073_v54, %v4130_v45  ;;  %v4364_v3 = vadd.f32 %v5075_v9, %v4148_v33  ;;  %v5077_v19 = vld [vmem:[#allocation74_spill] sm:$0xff]  ;;  %v5079_v6 = vld [vmem:[#allocation59_spill] sm:$0xff] }
 0x25a   :  { %5070 = vst [vmem:[#allocation16_spill] sm:$0xff] %v4352_v32  ;;  %5072 = vst [vmem:[#allocation28_spill] sm:$0xff] %v4356_v16  ;;  %v4368_v10 = vadd.f32 %v5077_v19, %v4150_v11  ;;  %v4372_v23 = vadd.f32 %v5079_v6, %v4152_v42  ;;  %v5080_v32 = vld [vmem:[#allocation48_spill] sm:$0xff]  ;;  %v5082_v16 = vld [vmem:[#allocation83_spill] sm:$0xff] }
 0x25b   :  { %5074 = vst [vmem:[#allocation85_spill] sm:$0xff] %v4360_v15  ;;  %5076 = vst [vmem:[#allocation50_spill] sm:$0xff] %v4364_v3  ;;  %v4376_v7 = vadd.f32 %v5080_v32, %v4106_v40  ;;  %v4380_v54 = vadd.f32 %v5082_v16, %v4108_v53  ;;  %v5084_v15 = vld [vmem:[#allocation26_spill] sm:$0xff]  ;;  %v4396_v32 = vadd.f32 %v4134_v5, %v4148_v33 }
 0x25c   :  { %5078 = vst [vmem:[#allocation65_spill] sm:$0xff] %v4368_v10  ;;  %v4384_v9 = vadd.f32 %v5084_v15, %v4126_v29  ;;  %v5086_v3 = vld [vmem:[#allocation62_spill] sm:$0xff]  ;;  %v5087_v10 = vld [vmem:[#allocation49_spill] sm:$0xff]  ;;  %v4416_v5 = vadd.f32 %v4160_v35, %v4126_v29  ;;  %v4436_v29 = vadd.f32 %v4180_v28, %v4152_v42  ;;  %v1426_v28 = vmax.f32 %v4228_v22, 0.0 }
 0x25d   :  { %5081 = vst [vmem:[#allocation77_spill] sm:$0xff] %v4376_v7  ;;  %5083 = vst [vmem:[#allocation38_spill] sm:$0xff] %v4380_v54  ;;  %v4388_v19 = vadd.f32 %v5086_v3, %v4128_v20  ;;  %v4392_v6 = vadd.f32 %v5087_v10, %v4130_v45  ;;  %v5088_v7 = vld [vmem:[#allocation36_spill] sm:$0xff]  ;;  %v5089_v54 = vld [vmem:[#allocation75_spill] sm:$0xff]  ;;  %v4412_v10 = vadd.f32 %v4156_v1, %v4108_v53  ;;  %v1436_v22 = vmax.f32 %v4268_v47, 0.0 }
 0x25e   :  { %5085 = vst [vmem:[#allocation29_spill] sm:$0xff] %v4384_v9  ;;  %v4400_v16 = vadd.f32 %v5088_v7, %v4150_v11  ;;  %v4404_v15 = vadd.f32 %v5089_v54, %v4152_v42  ;;  %v5090_v9 = vld [vmem:[#allocation14_spill] sm:$0xff]  ;;  %5092 = vst [vmem:[#allocation39_spill] sm:$0xff] %v4416_v5  ;;  %v4420_v7 = vadd.f32 %v4164_v37, %v4128_v20  ;;  %v1419_v37 = vmax.f32 %v4200_v17, 0.0  ;;  %v5098_v35 = vld [vmem:[#allocation60_spill] sm:$0xff] }
 0x25f   :  { %v4408_v3 = vadd.f32 %v5090_v9, %v4106_v40  ;;  %5091 = vst [vmem:[#allocation17_spill] sm:$0xff] %v4412_v10  ;;  %v4424_v54 = vadd.f32 %v4168_v31, %v4130_v45  ;;  %v4428_v40 = vadd.f32 %v4172_v55, %v4148_v33  ;;  %v4432_v53 = vadd.f32 %v4176_v30, %v4150_v11  ;;  %v5099_v20 = vld [vmem:[#allocation64_spill] sm:$0xff] }
 0x260   :  { %5093 = vst [vmem:[#allocation51_spill] sm:$0xff] %v4420_v7  ;;  %5097 = vst [vmem:[#allocation53_spill] sm:$0xff] %v4436_v29  ;;  %v1418_v45 = vmax.f32 %v4196_v2, 0.0  ;;  %v1420_v33 = vmax.f32 %v4204_v18, 0.0  ;;  %v1421_v55 = vmax.f32 %v4208_v24, 0.0  ;;  %v1422_v11 = vmax.f32 %v4212_v4, 0.0 }
 0x261   :  { %5094 = vst [vmem:[#allocation66_spill] sm:$0xff] %v4424_v54  ;;  %5095 = vst [vmem:[#allocation78_spill] sm:$0xff] %v4428_v40  ;;  %v1423_v31 = vmax.f32 %v4216_v12, 0.0  ;;  %v1424_v42 = vmax.f32 %v4220_v59, 0.0  ;;  %v1425_v30 = vmax.f32 %v4224_v13, 0.0  ;;  %v1427_v9 = vmax.f32 %v4232_v50, 0.0 }
 0x262   :  { %5096 = vst [vmem:[#allocation40_spill] sm:$0xff] %v4432_v53  ;;  %v1428_v2 = vmax.f32 %v4236_v52, 0.0  ;;  %v1429_v17 = vmax.f32 %v4240_v48, 0.0  ;;  %v1430_v18 = vmax.f32 %v4244_v36, 0.0  ;;  %v1431_v24 = vmax.f32 %v4248_v26, 0.0  ;;  %v5100_v1 = vld [vmem:[#allocation76_spill] sm:$0xff] }
 0x263   :  { %v1432_v4 = vmax.f32 %v4252_v34, 0.0  ;;  %v1433_v12 = vmax.f32 %v4256_v44, 0.0  ;;  %v1434_v59 = vmax.f32 %v4260_v43, 0.0  ;;  %v1435_v13 = vmax.f32 %v4264_v46, 0.0  ;;  %v5101_v21 = vld [vmem:[#allocation37_spill] sm:$0xff]  ;;  %v5103_v60 = vld [vmem:[#allocation16_spill] sm:$0xff] }
 0x264   :  { %v1437_v50 = vmax.f32 %v4272_v51, 0.0  ;;  %v1438_v52 = vmax.f32 %v4276_v56, 0.0  ;;  %v1439_v48 = vmax.f32 %v4280_v58, 0.0  ;;  %v1440_v36 = vmax.f32 %v4284_v27, 0.0  ;;  %v5102_v38 = vld [vmem:[#allocation61_spill] sm:$0xff]  ;;  %v5104_v29 = vld [vmem:[#allocation28_spill] sm:$0xff] }
 0x265   :  { %v1441_v26 = vmax.f32 %v4288_v39, 0.0  ;;  %v1442_v34 = vmax.f32 %v4292_v61, 0.0  ;;  %v1443_v44 = vmax.f32 %v4296_v62, 0.0  ;;  %v1444_v43 = vmax.f32 %v4300_v63, 0.0  ;;  %v5105_v53 = vld [vmem:[#allocation85_spill] sm:$0xff]  ;;  %v5106_v40 = vld [vmem:[#allocation50_spill] sm:$0xff] }
 0x266   :  { %v1445_v46 = vmax.f32 %v4304_v14, 0.0  ;;  %v1446_v47 = vmax.f32 %v4308_v0, 0.0  ;;  %v1447_v51 = vmax.f32 %v4312_v25, 0.0  ;;  %v1448_v56 = vmax.f32 %v4316_v8, 0.0  ;;  %v5107_v54 = vld [vmem:[#allocation65_spill] sm:$0xff]  ;;  %v5109_v5 = vld [vmem:[#allocation38_spill] sm:$0xff] }
 0x267   :  { %v1449_v58 = vmax.f32 %v4320_v41, 0.0  ;;  %v1450_v27 = vmax.f32 %v4324_v57, 0.0  ;;  %v1451_v39 = vmax.f32 %v4328_v49, 0.0  ;;  %v1452_v61 = vmax.f32 %v5098_v35, 0.0  ;;  %v5108_v7 = vld [vmem:[#allocation77_spill] sm:$0xff] }
 0x268   :  { %v1453_v62 = vmax.f32 %v5099_v20, 0.0  ;;  %v1454_v63 = vmax.f32 %v5100_v1, 0.0  ;;  %v1455_v14 = vmax.f32 %v5101_v21, 0.0  ;;  %v1456_v0 = vmax.f32 %v5102_v38, 0.0  ;;  %v5110_v10 = vld [vmem:[#allocation29_spill] sm:$0xff] }
 0x269   :  { %v1457_v25 = vmax.f32 %v5103_v60, 0.0  ;;  %v1458_v8 = vmax.f32 %v5104_v29, 0.0  ;;  %v1459_v41 = vmax.f32 %v5105_v53, 0.0  ;;  %v1460_v57 = vmax.f32 %v5106_v40, 0.0 }
 0x26a   :  { %v1461_v49 = vmax.f32 %v5107_v54, 0.0  ;;  %v1462_v35 = vmax.f32 %v4372_v23, 0.0  ;;  %v1463_v20 = vmax.f32 %v5108_v7, 0.0  ;;  %v1464_v1 = vmax.f32 %v5109_v5, 0.0  ;;  %v5111_v23 = vld [vmem:[#allocation17_spill] sm:$0xff]  ;;  %v5112_v5 = vld [vmem:[#allocation39_spill] sm:$0xff] }
 0x26b   :  { %v1465_v21 = vmax.f32 %v5110_v10, 0.0  ;;  %v1466_v38 = vmax.f32 %v4388_v19, 0.0  ;;  %v1467_v60 = vmax.f32 %v4392_v6, 0.0  ;;  %v1468_v29 = vmax.f32 %v4396_v32, 0.0  ;;  %v5113_v19 = vld [vmem:[#allocation51_spill] sm:$0xff]  ;;  %v5114_v32 = vld [vmem:[#allocation66_spill] sm:$0xff] }
 0x26c   :  { %v1469_v53 = vmax.f32 %v4400_v16, 0.0  ;;  %v1470_v40 = vmax.f32 %v4404_v15, 0.0  ;;  %v1471_v54 = vmax.f32 %v4408_v3, 0.0  ;;  %v1472_v7 = vmax.f32 %v5111_v23, 0.0  ;;  %v5115_v15 = vld [vmem:[#allocation78_spill] sm:$0xff]  ;;  %v5116_v23 = vld [vmem:[#allocation40_spill] sm:$0xff] }
 0x26d   :  { %v1473_v10 = vmax.f32 %v5112_v5, 0.0  ;;  %v1474_v6 = vmax.f32 %v5113_v19, 0.0  ;;  %v1475_v16 = vmax.f32 %v5114_v32, 0.0  ;;  %v1476_v3 = vmax.f32 %v5115_v15, 0.0  ;;  %v5117_v19 = vld [vmem:[#allocation53_spill] sm:$0xff]  ;;  %v5118_v15 = vld [vmem:[#allocation27_spill] sm:$0xff] }
 0x26e   :  { %v1477_v5 = vmax.f32 %v5116_v23, 0.0  ;;  %v1478_v32 = vmax.f32 %v5117_v19, 0.0  ;;  %v5119_v23 = vmax.f32 %v5118_v15, 0.0  ;;  %v5120_v19 = vld [vmem:[#allocation15_spill] sm:$0xff] }
 0x26f   :  { %v5121_v15 = vmax.f32 %v5120_v19, 0.0 }
 0x271   :  { %v1479_v19 = vpack.c.bf16 %v5121_v15, %v5119_v23  ;;  %v5122_v15 = vld [vmem:[#allocation84_spill] sm:$0xff] }
 0x272   :  { %v5123_v23 = vmax.f32 %v5122_v15, 0.0 }
 0x273   :  { %1511 = vst [vmem:[#allocation2] sm:$0xff] %v1479_v19  ;;  %v1497_v19 = vpack.c.bf16 %v1452_v61, %v1451_v39 }
 0x274   :  { %v1480_v15 = vpack.c.bf16 %v1418_v45, %v5123_v23  ;;  %v1481_v23 = vpack.c.bf16 %v1420_v33, %v1419_v37  ;;  %v1482_v45 = vpack.c.bf16 %v1422_v11, %v1421_v55  ;;  %v1483_v33 = vpack.c.bf16 %v1424_v42, %v1423_v31 }
 0x275   :  { %v1484_v37 = vpack.c.bf16 %v1426_v28, %v1425_v30  ;;  %v1485_v11 = vpack.c.bf16 %v1428_v2, %v1427_v9  ;;  %v1486_v55 = vpack.c.bf16 %v1430_v18, %v1429_v17  ;;  %v1487_v31 = vpack.c.bf16 %v1432_v4, %v1431_v24  ;;  %1529 = vst [vmem:[#allocation2 + $0x90] sm:$0xff] %v1497_v19 }
 0x276   :  { %v1488_v42 = vpack.c.bf16 %v1434_v59, %v1433_v12  ;;  %v1489_v28 = vpack.c.bf16 %v1436_v22, %v1435_v13  ;;  %v1490_v30 = vpack.c.bf16 %v1438_v52, %v1437_v50  ;;  %v1491_v2 = vpack.c.bf16 %v1440_v36, %v1439_v48  ;;  %1512 = vst [vmem:[#allocation2 + $0x8] sm:$0xff] %v1480_v15 }
 0x277   :  { %1513 = vst [vmem:[#allocation2 + $0x10] sm:$0xff] %v1481_v23  ;;  %1514 = vst [vmem:[#allocation2 + $0x18] sm:$0xff] %v1482_v45  ;;  %v1492_v9 = vpack.c.bf16 %v1442_v34, %v1441_v26  ;;  %v1493_v17 = vpack.c.bf16 %v1444_v43, %v1443_v44  ;;  %v1494_v18 = vpack.c.bf16 %v1446_v47, %v1445_v46 }
 0x278   :  { %1515 = vst [vmem:[#allocation2 + $0x20] sm:$0xff] %v1483_v33  ;;  %v1495_v4 = vpack.c.bf16 %v1448_v56, %v1447_v51  ;;  %1516 = vst [vmem:[#allocation2 + $0x28] sm:$0xff] %v1484_v37  ;;  %v1496_v24 = vpack.c.bf16 %v1450_v27, %v1449_v58  ;;  %v1498_v12 = vpack.c.bf16 %v1454_v63, %v1453_v62 }
 0x279   :  { %1517 = vst [vmem:[#allocation2 + $0x30] sm:$0xff] %v1485_v11  ;;  %1518 = vst [vmem:[#allocation2 + $0x38] sm:$0xff] %v1486_v55  ;;  %v1499_v59 = vpack.c.bf16 %v1456_v0, %v1455_v14  ;;  %v1500_v13 = vpack.c.bf16 %v1458_v8, %v1457_v25  ;;  %v1501_v22 = vpack.c.bf16 %v1460_v57, %v1459_v41 }
 0x27a   :  { %1519 = vst [vmem:[#allocation2 + $0x40] sm:$0xff] %v1487_v31  ;;  %1520 = vst [vmem:[#allocation2 + $0x48] sm:$0xff] %v1488_v42  ;;  %v1502_v50 = vpack.c.bf16 %v1462_v35, %v1461_v49  ;;  %v1503_v52 = vpack.c.bf16 %v1464_v1, %v1463_v20  ;;  %v1504_v48 = vpack.c.bf16 %v1466_v38, %v1465_v21 }
 0x27b   :  { %1521 = vst [vmem:[#allocation2 + $0x50] sm:$0xff] %v1489_v28  ;;  %1522 = vst [vmem:[#allocation2 + $0x58] sm:$0xff] %v1490_v30  ;;  %v1505_v36 = vpack.c.bf16 %v1468_v29, %v1467_v60  ;;  %v1506_v26 = vpack.c.bf16 %v1470_v40, %v1469_v53  ;;  %v1507_v34 = vpack.c.bf16 %v1472_v7, %v1471_v54 }
 0x27c   :  { %1523 = vst [vmem:[#allocation2 + $0x60] sm:$0xff] %v1491_v2  ;;  %1524 = vst [vmem:[#allocation2 + $0x68] sm:$0xff] %v1492_v9  ;;  %v1508_v44 = vpack.c.bf16 %v1474_v6, %v1473_v10  ;;  %v1509_v43 = vpack.c.bf16 %v1476_v3, %v1475_v16  ;;  %v1510_v46 = vpack.c.bf16 %v1478_v32, %v1477_v5 }
 0x27d   :  { %1525 = vst [vmem:[#allocation2 + $0x70] sm:$0xff] %v1493_v17  ;;  %1526 = vst [vmem:[#allocation2 + $0x78] sm:$0xff] %v1494_v18 }
 0x27e   :  { %1527 = vst [vmem:[#allocation2 + $0x80] sm:$0xff] %v1495_v4  ;;  %1528 = vst [vmem:[#allocation2 + $0x88] sm:$0xff] %v1496_v24 }
 0x27f   :  { %1530 = vst [vmem:[#allocation2 + $0x98] sm:$0xff] %v1498_v12  ;;  %1531 = vst [vmem:[#allocation2 + $0xa0] sm:$0xff] %v1499_v59 }
 0x280   :  { %1532 = vst [vmem:[#allocation2 + $0xa8] sm:$0xff] %v1500_v13  ;;  %1533 = vst [vmem:[#allocation2 + $0xb0] sm:$0xff] %v1501_v22 }
 0x281   :  { %1534 = vst [vmem:[#allocation2 + $0xb8] sm:$0xff] %v1502_v50  ;;  %1535 = vst [vmem:[#allocation2 + $0xc0] sm:$0xff] %v1503_v52 }
 0x282   :  { %1536 = vst [vmem:[#allocation2 + $0xc8] sm:$0xff] %v1504_v48  ;;  %1537 = vst [vmem:[#allocation2 + $0xd0] sm:$0xff] %v1505_v36 }
 0x283   :  { %1538 = vst [vmem:[#allocation2 + $0xd8] sm:$0xff] %v1506_v26  ;;  %1539 = vst [vmem:[#allocation2 + $0xe0] sm:$0xff] %v1507_v34 }
 0x284   :  { %1540 = vst [vmem:[#allocation2 + $0xe8] sm:$0xff] %v1508_v44  ;;  %1541 = vst [vmem:[#allocation2 + $0xf0] sm:$0xff] %v1509_v43 }
 0x285   :  { %1542 = vst [vmem:[#allocation2 + $0xf8] sm:$0xff] %v1510_v46 }
 0x286 LB: > { %v5124_v47 = vld [vmem:[#allocation21_spill] sm:$0xff]  ;;  %s1784_s8 = sshll.u32 %s1971_s1, 5  ;;  %v5126_v27 = vld [vmem:[#allocation22_spill] sm:$0xff]  ;;  %vm1585_vm4 = vcmask 523264   ;;  %v5128_v13 = vld [vmem:[#allocation63_spill] sm:$0xff]  ;;  %s1730_s10 = scalar_lea.vmem [#allocation8], %s1971_s1  ;;  %s1971_s1 = sphi %s4508_s1, %s1561_s1  }
 0x287   : > { %1797 = vmatprep.subr.bf16.mxu0 %v5124_v47  ;;  %1821 = vmatprep.subr.bf16.mxu1 %v5124_v47  ;;  %v5125_v51 = vld [vmem:[#allocation45_spill] sm:$0xff]  ;;  %s1564_s9 = scalar_lea.vmem [#allocation2], %s1784_s8  ;;  %v5127_v61 = vld [vmem:[#allocation46_spill] sm:$0xff]  ;;  %s1561_s1 = sadd.s32 1, %s1971_s1  }
 0x288   : > { %1798 = vmatpush3.bf16.msra.mxu0 %v5124_v47  ;;  %1825 = vmatpush3.bf16.msra.mxu1 %v5124_v47  ;;  %p1558_p2 = scmp.ge.s32.totalorder %s1561_s1, 8  }
 0x289   : > { %1799 = vmatprep.subr.bf16.mxu0 %v5125_v51  ;;  %1822 = vmatprep.subr.bf16.mxu1 %v5125_v51  ;;  %s1990_s11 = smov (%p1558_p2), [#allocation8]  }
 0x28a   :  { %s1738_s12 = sshll.u32 (%p1558_p2), %s1990_s11, 4  ;;  %s1739_s12 = int_to_ptr.vmem [resolvable:$true] %s1738_s12 }
 0x28b   :  { %s1937_s13 = scalar_lea.vmem (%p1558_p2), %s1739_s12, 128  ;;  %p1942_p4 = scmp.lt.s32.totalorder (%p1558_p2), %s1739_s12, %s1739_s12 }
 0x28c   : > { %v1565_v56 = vld [vmem:[%s1564_s9] sm:$0xff]  ;;  %1800 = vmatpush3.bf16.msra.mxu0 %v5125_v51  ;;  %v1566_v58 = vld [vmem:[%s1564_s9 + $0x8] sm:$0xff]  ;;  %1826 = vmatpush3.bf16.msra.mxu1 %v5125_v51  ;;  %v1567_v39 = vld [vmem:[%s1564_s9 + $0x10] sm:$0xff]  ;;  %p1938_p3 = scmp.ne.s32.totalorder (%p1558_p2), %s1739_s12, %s1937_s13  ;;  %p1943_p5 = scmp.lt.s32.totalorder (%p1558_p2), %s1937_s13, %s1937_s13 }
 0x28d   : > { %1569 = vxpose.xlu0.c.b16.start [1/4] (short) %v1565_v56, 128  ;;  %1801 = vmatprep.subr.bf16.mxu0 %v5126_v27  ;;  %v1568_v62 = vld [vmem:[%s1564_s9 + $0x18] sm:$0xff] }
 0x28e   : > { %1823 = vmatprep.subr.bf16.mxu1 %v5126_v27  ;;  %p1944_p6 = por (%p1558_p2), %p1943_p5, %p1942_p4 }
 0x290   : > { %1802 = vmatpush3.bf16.msra.mxu0 %v5126_v27  ;;  %1827 = vmatpush3.bf16.msra.mxu1 %v5126_v27  ;;  %p1945_p7 = pnand (%p1558_p2), %p1944_p6, %p1938_p3 }
 0x291   : > { %1570 = vxpose.xlu0.c.b16.cont [2/4] (short) %v1566_v58, 128  ;;  %1803 = vmatprep.subr.bf16.mxu0 %v5127_v61 }
 0x292   : > { %1824 = vmatprep.subr.bf16.mxu1 %v5127_v61 }
 0x294   : > { %1804 = vmatpush3.bf16.msra.mxu0 %v5127_v61  ;;  %1828 = vmatpush3.bf16.msra.mxu1 %v5127_v61 }
 0x295   : > { %1571 = vxpose.xlu0.c.b16.cont [3/4] (short) %v1567_v39, 128 }
 0x299   : > { %1572 = vxpose.xlu0.c.b16.end [4/4] (short) %v1568_v62, 128 }
 0x2f3   : > { %v1577_v63 = vpop.trf.xlu0 }
 0x2f4   : > { %1805 = vmatprep.mubr.msk.bf16.mxu0 %vm1585_vm4, %v1577_v63 }
 0x2f7   : > { %v1578_v14 = vpop.trf.xlu0 }
 0x2f8   : > { %1806 = vmatmul.mubr.msk.bf16.vlgmr.msra.gmra.mrb[0].mxu0 %vm1585_vm4, %v1578_v14 }
 0x2fb   : > { %v1579_v0 = vpop.trf.xlu0 }
 0x2fc   : > { %1809 = vmatprep.mubr.msk.bf16.mxu0 %vm1585_vm4, %v1579_v0 }
 0x2ff   : > { %v1580_v25 = vpop.trf.xlu0 }
 0x300   : > { %1810 = vmatmul.mubr.msk.bf16.gmra.mrb[4].mxu0 %vm1585_vm4, %v1580_v25 }
 0x303   : > { %v1581_v8 = vpop.trf.xlu0 }
 0x304   : > { %1813 = vmatprep.mubr.msk.bf16.mxu1 %vm1585_vm4, %v1581_v8 }
 0x307   : > { %v1582_v41 = vpop.trf.xlu0 }
 0x308   : > { %1814 = vmatmul.mubr.msk.bf16.vlgmr.msra.gmra.mrb[0].mxu1 %vm1585_vm4, %v1582_v41 }
 0x30b   : > { %v1583_v57 = vpop.trf.xlu0 }
 0x30c   : > { %1817 = vmatprep.mubr.msk.bf16.mxu1 %vm1585_vm4, %v1583_v57 }
 0x30f   : > { %v1584_v49 = vpop.trf.xlu0 }
 0x310   : > { %1818 = vmatmul.mubr.msk.bf16.gmra.mrb[4].mxu1 %vm1585_vm4, %v1584_v49 }
 0x3cb   : > { %v1807_v35 = vpop.f32.mrb[0].mxu0 }
 0x3cc   : > { %v1644_v20 = vpop.f32.mrb[1].mxu0 }
 0x3cd   : > { %v1808_v1 = vpop.f32.mrb[2].mxu0 }
 0x3ce   : > { %v1647_v21 = vpop.f32.mrb[3].mxu0 }
 0x3d3   : > { %v1811_v38 = vpop.f32.mrb[4].mxu0 }
 0x3d4   : > { %v1709_v60 = vmax.f32 %v1807_v35, %v1811_v38  ;;  %v1660_v29 = vpop.f32.mrb[5].mxu0 }
 0x3d5   : > { %v1707_v53 = vmax.f32 %v1644_v20, %v1660_v29  ;;  %v1812_v40 = vpop.f32.mrb[6].mxu0 }
 0x3d6   : > { %v1710_v54 = vmax.f32 %v1808_v1, %v1812_v40  ;;  %v1663_v7 = vpop.f32.mrb[7].mxu0 }
 0x3d7   : > { %v1708_v10 = vmax.f32 %v1647_v21, %v1663_v7 }
 0x3db   : > { %v1815_v6 = vpop.f32.mrb[0].mxu1 }
 0x3dc   : > { %v1713_v16 = vmax.f32 %v1709_v60, %v1815_v6  ;;  %v1676_v3 = vpop.f32.mrb[1].mxu1 }
 0x3dd   : > { %v1711_v5 = vmax.f32 %v1707_v53, %v1676_v3  ;;  %v1816_v32 = vpop.f32.mrb[2].mxu1 }
 0x3de   : > { %v1714_v15 = vmax.f32 %v1710_v54, %v1816_v32  ;;  %v1679_v23 = vpop.f32.mrb[3].mxu1 }
 0x3df   : > { %v1712_v45 = vmax.f32 %v1708_v10, %v1679_v23 }
 0x3e3   : > { %v1819_v33 = vpop.f32.mrb[4].mxu1 }
 0x3e4   : > { %v1717_v37 = vmax.f32 %v1713_v16, %v1819_v33  ;;  %v1692_v11 = vpop.f32.mrb[5].mxu1 }
 0x3e5   : > { %v1715_v55 = vmax.f32 %v1711_v5, %v1692_v11  ;;  %v1820_v31 = vpop.f32.mrb[6].mxu1 }
 0x3e6   : > { %v1718_v42 = vmax.f32 %v1714_v15, %v1820_v31  ;;  %v1695_v28 = vpop.f32.mrb[7].mxu1 }
 0x3e7   : > { %v1716_v30 = vmax.f32 %v1712_v45, %v1695_v28 }
 0x3e8   : > { %v1720_v2 = vmax.f32 %v1717_v37, %v1718_v42 }
 0x3e9   : > { %v1719_v9 = vmax.f32 %v1715_v55, %v1716_v30 }
 0x3eb   : > { %v1721_v17 = vmax.f32 %v1719_v9, %v1720_v2 }
 0x3ed   : > { %v1722_v18 = vrot.slane %v1721_v17, 4 }
 0x3ef   : > { %v1723_v4 = vmax.f32 %v1721_v17, %v1722_v18 }
 0x3f1   : > { %v1724_v24 = vrot.slane %v1723_v4, 2 }
 0x3f3   : > { %v1725_v19 = vmax.f32 %v1723_v4, %v1724_v24 }
 0x3f5   : > { %v1726_v12 = vrot.slane %v1725_v19, 1 }
 0x3f7   : > { %v1727_v59 = vmax.f32 %v1725_v19, %v1726_v12  ;;  %1560 = sbr.rel (!%p1558_p2) target bundleno = 646 (0x286), region = 45 }
 0x3f9   : > { %v1728_v22 = vadd.f32 %v1727_v59, %v5128_v13 }
 0x3fb   : > { %v1729_v50 = vmax.f32 %v1728_v22, 0.0 }
 0x3fd   : > { %1731 = vst [vmem:[%s1730_s10] sm:$0x1] %v1729_v50 }
 0x3fe   :  { %1948 = shalt.err (!%p1945_p7)
}
 0x3ff   :  { %s1949_s16 = scalar_lea.hbm %s4557_s2, 128 }
 0x400   :  { %p1950_p8 = scmp.ne.s32.totalorder %s4557_s2, %s1949_s16  ;;  %p1953_p9 = scmp.lt.u32.totalorder %s1949_s16, %s4557_s2 }
 0x402   :  { %p1955_p10 = pnand %p1953_p9, %p1950_p8 }
 0x404   :  { %1958 = shalt.err (!%p1955_p10)
}
 0x405   :  { %1741 = dma.vmem_to_hbm [thread:$0]  %s1739_s12, 128, %s4557_s2, [#allocation5]  }
 0x406   :  { %1967 = dma.done.wait [#allocation5], 128  }
 0x407   :  { %1968 = vsyncadd [#allocation5], 4294967168 }
 0x408   :  { %1745 = vsyncpa [#allocation4], 1 }
 0x409   :  { %1746 = vsyncpa [#allocation7], 1 }
 0x40a   :  { %1747 = vsyncpa [#allocation5], 1 }

</bundles_post_ra>
